<compile_context>
chip_gen: v6e
topology: v6e:2x2x1
jax: 0.10.0
libtpu: 0.0.40
codegen_flags: <defaults>
</compile_context>

<pallas_src>
import functools

import jax
import jax.numpy as jnp
from jax.experimental import pallas as pl
from jax.experimental.pallas import tpu as pltpu

SIDE_CHANNELS = 32  # ResBlock(nc * 2, 32)


# --------------------------------------------------------------------------- #
# Pallas kernel: fused 3x3 conv (zero padding) + bias (+ residual) (+ PReLU)   #
# --------------------------------------------------------------------------- #
def _make_conv3x3_kernel(H, W, Cout, act, has_residual):
    """Kernel operating on a row-halo-padded, spatially flattened NHWC block.

    x_ref : (HW + 2*(W+1), Cin)  f32   (W+1 zero rows of halo on each side)
    w_ref : (9, Cin, Cout)       bf16  (tap t = (dy+1)*3 + (dx+1))
    b_ref : (1, Cout)            f32
    a_ref : (1, Cout)            f32   (only if act == "prelu")
    r_ref : (HW, Cout)           f32   (only if has_residual)
    o_ref : (HW, Cout)           f32
    """
    HW = H * W
    pad = W + 1

    def kernel(*refs):
        x_ref, w_ref, b_ref = refs[0], refs[1], refs[2]
        i = 3
        a_ref = None
        if act == "prelu":
            a_ref = refs[i]
            i += 1
        r_ref = None
        if has_residual:
            r_ref = refs[i]
            i += 1
        o_ref = refs[i]

        # Column index of every output pixel (row-major flattening).
        col = jax.lax.broadcasted_iota(jnp.int32, (HW, 1), 0) % W
        left_ok = col > 0          # tap at dx = -1 is valid
        right_ok = col < (W - 1)   # tap at dx = +1 is valid

        acc = jnp.zeros((HW, Cout), jnp.float32)
        for dy in (-1, 0, 1):
            for dx in (-1, 0, 1):
                t = (dy + 1) * 3 + (dx + 1)
                start = pad + dy * W + dx          # static slice offset
                tap = x_ref[start:start + HW, :]
                if dx == -1:
                    tap = jnp.where(left_ok, tap, 0.0)
                elif dx == 1:
                    tap = jnp.where(right_ok, tap, 0.0)
                acc = acc + jnp.dot(tap.astype(jnp.bfloat16), w_ref[t],
                                    preferred_element_type=jnp.float32)

        r = acc + b_ref[...]
        if has_residual:
            r = r + r_ref[...]
        if act == "prelu":
            r = jnp.where(r >= 0.0, r, a_ref[...] * r)
        o_ref[...] = r

    return kernel


def conv3x3(x_flat, w9_bf16, bias, H, W, alpha=None, residual=None, act="prelu"):
    """Conv2d(3x3, stride 1, pad 1) (+ residual) (+ PReLU) on token-major activations.

    x_flat: (B, HW, Cin) f32; w9_bf16: (9, Cin, Cout) bf16; bias/alpha: (Cout,);
    residual: (B, HW, Cout) or None.  Returns (B, HW, Cout) f32.
    """
    B, HW, Cin = x_flat.shape
    Cout = w9_bf16.shape[-1]
    pad = W + 1
    Mp = HW + 2 * pad
    xbig = jnp.pad(x_flat, ((0, 0), (pad, pad), (0, 0)))

    kernel = _make_conv3x3_kernel(H, W, Cout, act, residual is not None)

    in_specs = [
        pl.BlockSpec((None, Mp, Cin), lambda b: (b, 0, 0)),
        pl.BlockSpec((9, Cin, Cout), lambda b: (0, 0, 0)),
        pl.BlockSpec((1, Cout), lambda b: (0, 0)),
    ]
    args = [xbig, w9_bf16, bias.reshape(1, Cout).astype(jnp.float32)]
    if act == "prelu":
        in_specs.append(pl.BlockSpec((1, Cout), lambda b: (0, 0)))
        args.append(alpha.reshape(1, Cout).astype(jnp.float32))
    if residual is not None:
        in_specs.append(pl.BlockSpec((None, HW, Cout), lambda b: (b, 0, 0)))
        args.append(residual)

    return pl.pallas_call(
        kernel,
        out_shape=jax.ShapeDtypeStruct((B, HW, Cout), jnp.float32),
        grid=(B,),
        in_specs=in_specs,
        out_specs=pl.BlockSpec((None, HW, Cout), lambda b: (b, 0, 0)),
        compiler_params=pltpu.CompilerParams(dimension_semantics=("parallel",)),
    )(*args)


# --------------------------------------------------------------------------- #
# Bilinear backward warp (border clamp) - data-dependent gather, done in XLA.  #
# --------------------------------------------------------------------------- #
# TODO(synk): a DMA/row-gather Pallas version could fuse this into conv0; the gather is
#             O(HW*C) either way so it is no longer a bottleneck.
def _bwarp_nhwc(img, flow):
    """img: (B, H, W, C); flow: (B, H, W, 2) with [..., 0]=fx, [..., 1]=fy."""
    B, H, W, C = img.shape
    yy, xx = jnp.meshgrid(jnp.arange(H, dtype=jnp.float32),
                          jnp.arange(W, dtype=jnp.float32), indexing="ij")
    sx = jnp.clip(xx[None] + flow[..., 0], 0.0, float(W - 1))
    sy = jnp.clip(yy[None] + flow[..., 1], 0.0, float(H - 1))
    x0f = jnp.floor(sx)
    y0f = jnp.floor(sy)
    wx = (sx - x0f)[..., None]
    wy = (sy - y0f)[..., None]
    x0 = x0f.astype(jnp.int32)
    y0 = y0f.astype(jnp.int32)
    x1 = jnp.minimum(x0 + 1, W - 1)
    y1 = jnp.minimum(y0 + 1, H - 1)

    img_flat = img.reshape(B, H * W, C)
    bidx = jnp.arange(B)[:, None]

    def gather(yi, xi):
        idx = (yi * W + xi).reshape(B, H * W)
        return img_flat[bidx, idx].reshape(B, H, W, C)

    return (gather(y0, x0) * (1.0 - wy) * (1.0 - wx)
            + gather(y0, x1) * (1.0 - wy) * wx
            + gather(y1, x0) * wy * (1.0 - wx)
            + gather(y1, x1) * wy * wx)


# --------------------------------------------------------------------------- #
# Weight packing                                                               #
# --------------------------------------------------------------------------- #
def _pack_conv_w(w_hwio):
    """(3, 3, Cin, Cout) -> (9, Cin, Cout) bf16, tap-major t = ky*3 + kx."""
    kh, kw, cin, cout = w_hwio.shape
    return w_hwio.reshape(kh * kw, cin, cout).astype(jnp.bfloat16)


def _build_deconv_w9(wt, n_branch):
    """Pack ConvTranspose2d(k=4, s=2, p=1) weights (kH, kW, Cin, Cout) into a
    (9, Cin, 4*Cout) per-tap GEMM tensor; the 4 Cout blocks are the 2x2 sub-pixel
    parities (py, px)."""
    cin, cout = wt.shape[2], wt.shape[3]
    w9 = jnp.zeros((9, cin, 4 * cout), jnp.float32)
    for py in range(2):
        for px in range(2):
            col = (py * 2 + px) * cout
            for dy in range(2):
                for dx in range(2):
                    t = (py + dy) * 3 + (px + dx)
                    ky = 3 - py - 2 * dy
                    kx = 3 - px - 2 * dx
                    w9 = w9.at[t, :, col:col + cout].set(wt[ky, kx])
    return w9.astype(jnp.bfloat16)


# --------------------------------------------------------------------------- #
# Parameters & forward                                                         #
# --------------------------------------------------------------------------- #
def init_params(key, nc=32, n_branch=9):
    c2 = 2 * nc
    sc = SIDE_CHANNELS

    def nrm(k, shape, scale=0.1):
        return scale * jax.random.normal(k, shape, jnp.float32)

    ks = jax.random.split(key, 14)
    return {
        "conv0_w": nrm(ks[0], (3, 3, c2 + 1, c2)), "conv0_b": nrm(ks[1], (c2,), 0.01),
        "conv0_a": jnp.full((c2,), 0.25, jnp.float32),
        "rb1_w": nrm(ks[2], (3, 3, c2, c2)), "rb1_b": nrm(ks[3], (c2,), 0.01),
        "rb1_a": jnp.full((c2,), 0.25, jnp.float32),
        "rb2_w": nrm(ks[4], (3, 3, sc, sc)), "rb2_b": nrm(ks[5], (sc,), 0.01),
        "rb2_a": jnp.full((sc,), 0.25, jnp.float32),
        "rb3_w": nrm(ks[6], (3, 3, c2, c2)), "rb3_b": nrm(ks[7], (c2,), 0.01),
        "rb3_a": jnp.full((c2,), 0.25, jnp.float32),
        "rb4_w": nrm(ks[8], (3, 3, sc, sc)), "rb4_b": nrm(ks[9], (sc,), 0.01),
        "rb4_a": jnp.full((sc,), 0.25, jnp.float32),
        "rb5_w": nrm(ks[10], (3, 3, c2, c2)), "rb5_b": nrm(ks[11], (c2,), 0.01),
        "rb_prelu_a": jnp.full((c2,), 0.25, jnp.float32),
        # PyTorch ConvTranspose2d weight is (Cin, Cout, 4, 4); stored here already
        # permuted to (kH, kW, Cin, Cout).
        "deconv_w": nrm(ks[12], (4, 4, c2, 2 * n_branch + 1)),
        "deconv_b": nrm(ks[13], (2 * n_branch + 1,), 0.01),
    }


def decoder1v1_forward(params, feat0, feat1, f01, f10, z0, z1, n_branch=9):
    """Inputs NCHW: feat*: (B, nc, H, W), f*: (B, 2, H, W), z*: (B, 1, H, W).
    Returns (res_f01, res_f10, res_z0, res_z1) like the PyTorch module."""
    B, nc, H, W = feat0.shape
    HW = H * W
    c2 = 2 * nc
    side = SIDE_CHANNELS
    cdc = 2 * n_branch + 1

    def to_nhwc(x):
        return jnp.transpose(x, (0, 2, 3, 1))

    feat0_h, feat1_h = to_nhwc(feat0), to_nhwc(feat1)
    f01_h, f10_h = to_nhwc(f01), to_nhwc(f10)
    z0_h, z1_h = to_nhwc(z0), to_nhwc(z1)

    # Backward warp of the opposite feature map by the forward/backward flow.
    warped1 = _bwarp_nhwc(feat1_h, f01_h)
    warped0 = _bwarp_nhwc(feat0_h, f10_h)

    # Stack both directions along batch so every GEMM shares one parallel grid.
    f_in = jnp.concatenate([
        jnp.concatenate([feat0_h, warped1, z0_h], axis=-1),
        jnp.concatenate([feat1_h, warped0, z1_h], axis=-1),
    ], axis=0).reshape(2 * B, HW, c2 + 1)

    # Pad conv0 Cin (2*nc+1) up to a multiple of 8 with zero channels (free, aligned).
    cin0 = c2 + 1
    cin0_p = ((cin0 + 7) // 8) * 8
    f_in = jnp.pad(f_in, ((0, 0), (0, 0), (0, cin0_p - cin0)))
    w0 = jnp.pad(params["conv0_w"], ((0, 0), (0, 0), (0, cin0_p - cin0), (0, 0)))

    # convrelu(2*nc+1, 2*nc)
    x = conv3x3(f_in, _pack_conv_w(w0), params["conv0_b"], H, W,
                alpha=params["conv0_a"])

    # ResBlock(2*nc, 32)
    out = conv3x3(x, _pack_conv_w(params["rb1_w"]), params["rb1_b"], H, W,
                  alpha=params["rb1_a"])
    s2 = conv3x3(out[..., -side:], _pack_conv_w(params["rb2_w"]), params["rb2_b"],
                 H, W, alpha=params["rb2_a"])
    out = jnp.concatenate([out[..., :-side], s2], axis=-1)
    out = conv3x3(out, _pack_conv_w(params["rb3_w"]), params["rb3_b"], H, W,
                  alpha=params["rb3_a"])
    s4 = conv3x3(out[..., -side:], _pack_conv_w(params["rb4_w"]), params["rb4_b"],
                 H, W, alpha=params["rb4_a"])
    out = jnp.concatenate([out[..., :-side], s4], axis=-1)
    # prelu(x + conv5(out)) -- residual fused in the kernel epilogue.
    out = conv3x3(out, _pack_conv_w(params["rb5_w"]), params["rb5_b"], H, W,
                  alpha=params["rb_prelu_a"], residual=x)

    # ConvTranspose2d(2*nc, 2*n_branch+1, 4, 2, 1) as a 3x3-tap GEMM over the 4
    # sub-pixel parities; no in-kernel activation.
    w_dc = _build_deconv_w9(params["deconv_w"], n_branch)
    b_dc = jnp.tile(params["deconv_b"], 4)
    f_out = conv3x3(out, w_dc, b_dc, H, W, act=None)            # (2B, HW, 4*cdc)

    # Sub-pixel parity interleave -> (2B, 2H, 2W, cdc).
    f_out = f_out.reshape(2 * B, H, W, 2, 2, cdc)
    f_out = f_out.transpose(0, 1, 3, 2, 4, 5).reshape(2 * B, 2 * H, 2 * W, cdc)

    flow = jnp.transpose(f_out[..., :2 * n_branch], (0, 3, 1, 2))
    flow = flow.reshape(2 * B, n_branch, 2, 2 * H, 2 * W)
    # sigmoid * 0.99 + 0.01 on the single res_z channel (tiny, kept in f32).
    z = jax.nn.sigmoid(f_out[..., 2 * n_branch:2 * n_branch + 1]) * 0.99 + 0.01
    z = jnp.transpose(z, (0, 3, 1, 2))

    return flow[:B], flow[B:], z[:B], z[B:]


# --------------------------------------------------------------------------- #
if __name__ == "__main__":
    key = jax.random.PRNGKey(0)
    nc, n_branch = 32, 9
    B, H, W = 2, 8, 8

    kp, k0, k1, k2, k3, k4, k5 = jax.random.split(key, 7)
    params = init_params(kp, nc, n_branch)
    feat0 = jax.random.normal(k0, (B, nc, H, W), jnp.float32)
    feat1 = jax.random.normal(k1, (B, nc, H, W), jnp.float32)
    f01 = 2.0 * jax.random.normal(k2, (B, 2, H, W), jnp.float32)
    f10 = 2.0 * jax.random.normal(k3, (B, 2, H, W), jnp.float32)
    z0 = jax.random.uniform(k4, (B, 1, H, W), jnp.float32)
    z1 = jax.random.uniform(k5, (B, 1, H, W), jnp.float32)

    fwd = jax.jit(functools.partial(decoder1v1_forward, n_branch=n_branch))
    res_f01, res_f10, res_z0, res_z1 = fwd(params, feat0, feat1, f01, f10, z0, z1)
    jax.block_until_ready((res_f01, res_f10, res_z0, res_z1))

    assert res_f01.shape == (B, n_branch, 2, 2 * H, 2 * W)
    assert res_f10.shape == (B, n_branch, 2, 2 * H, 2 * W)
    assert res_z0.shape == (B, 1, 2 * H, 2 * W)
    assert res_z1.shape == (B, 1, 2 * H, 2 * W)
    assert bool(jnp.all(jnp.isfinite(res_f01))) and bool(jnp.all(jnp.isfinite(res_f10)))
    assert bool(jnp.all(res_z0 >= 0.01)) and bool(jnp.all(res_z0 <= 1.0))
    assert bool(jnp.all(res_z1 >= 0.01)) and bool(jnp.all(res_z1 <= 1.0))
    print("KERNEL_OK")
</pallas_src>

<mosaic_0001>
module attributes {stable_mosaic.version = 11 : i64} {
  func.func @kernel(%arg0: i32, %arg1: memref<1x82x72xf32, #tpu.memory_space<vmem>>, %arg2: memref<9x72x64xbf16, #tpu.memory_space<vmem>>, %arg3: memref<1x64xf32, #tpu.memory_space<vmem>>, %arg4: memref<1x64xf32, #tpu.memory_space<vmem>>, %arg5: memref<1x64x64xf32, #tpu.memory_space<vmem>>) attributes {dimension_semantics = [#tpu.dimension_semantics<parallel>], iteration_bounds = array<i64: 4>, scalar_prefetch = 0 : i64, scratch_operands = 0 : i64, tpu.core_type = #tpu.core_type<tc>, window_params = [{transform_indices = @transform_0, window_bounds = array<i64: 1, 82, 72>}, {pipeline_mode = #tpu.pipeline_mode<synchronous>, transform_indices = @transform_1, window_bounds = array<i64: 9, 72, 64>}, {pipeline_mode = #tpu.pipeline_mode<synchronous>, transform_indices = @transform_2, window_bounds = array<i64: 1, 64>}, {pipeline_mode = #tpu.pipeline_mode<synchronous>, transform_indices = @transform_3, window_bounds = array<i64: 1, 64>}, {transform_indices = @transform_4, window_bounds = array<i64: 1, 64, 64>}]} {
    %0 = tpu.iota {dimensions = array<i32: 0>} : vector<64x1xi32>
    %c8_i32 = arith.constant 8 : i32
    %c0_i32 = arith.constant 0 : i32
    %1 = arith.cmpi eq, %c8_i32, %c0_i32 : i32
    %c1_i32 = arith.constant 1 : i32
    %2 = arith.select %1, %c1_i32, %c8_i32 : i32
    %3 = vector.broadcast %2 : i32 to vector<64x1xi32>
    %4 = arith.remsi %0, %3 : vector<64x1xi32>
    %c0_i32_0 = arith.constant 0 : i32
    %5 = vector.broadcast %c0_i32_0 : i32 to vector<64x1xi32>
    %6 = arith.cmpi ne, %4, %5 : vector<64x1xi32>
    %c0_i32_1 = arith.constant 0 : i32
    %7 = vector.broadcast %c0_i32_1 : i32 to vector<64x1xi32>
    %8 = arith.cmpi slt, %4, %7 : vector<64x1xi32>
    %c0_i32_2 = arith.constant 0 : i32
    %9 = arith.cmpi slt, %2, %c0_i32_2 : i32
    %10 = vector.broadcast %9 : i1 to vector<64x1xi1>
    %11 = vector.broadcast %10 : vector<64x1xi1> to vector<64x1xi1>
    %12 = arith.xori %8, %11 : vector<64x1xi1>
    %13 = arith.andi %12, %6 : vector<64x1xi1>
    %14 = vector.broadcast %2 : i32 to vector<64x1xi32>
    %15 = arith.addi %4, %14 : vector<64x1xi32>
    %16 = arith.select %13, %15, %4 : vector<64x1xi1>, vector<64x1xi32>
    %c0_i32_3 = arith.constant 0 : i32
    %17 = vector.broadcast %c0_i32_3 : i32 to vector<64x1xi32>
    %18 = arith.cmpi sgt, %16, %17 : vector<64x1xi32>
    %c7_i32 = arith.constant 7 : i32
    %19 = vector.broadcast %c7_i32 : i32 to vector<64x1xi32>
    %20 = arith.cmpi slt, %16, %19 : vector<64x1xi32>
    %cst = arith.constant 0.000000e+00 : f32
    %21 = vector.broadcast %cst : f32 to vector<64x64xf32>
    %c0 = arith.constant 0 : index
    %c0_4 = arith.constant 0 : index
    %c0_5 = arith.constant 0 : index
    %22 = vector.load %arg1[%c0, %c0_4, %c0_5] : memref<1x82x72xf32, #tpu.memory_space<vmem>>, vector<1x64x72xf32>
    %23 = vector.shape_cast %22 : vector<1x64x72xf32> to vector<64x72xf32>
    %cst_6 = arith.constant 0.000000e+00 : f32
    %24 = vector.shape_cast %18 : vector<64x1xi1> to vector<64x1xi1>
    %25 = vector.broadcast %24 : vector<64x1xi1> to vector<64x72xi1>
    %26 = vector.broadcast %cst_6 : f32 to vector<64x72xf32>
    %27 = arith.select %25, %23, %26 : vector<64x72xi1>, vector<64x72xf32>
    %28 = arith.truncf %27 : vector<64x72xf32> to vector<64x72xbf16>
    %c0_7 = arith.constant 0 : index
    %c0_8 = arith.constant 0 : index
    %c0_9 = arith.constant 0 : index
    %29 = vector.load %arg2[%c0_7, %c0_8, %c0_9] : memref<9x72x64xbf16, #tpu.memory_space<vmem>>, vector<1x72x64xbf16>
    %30 = vector.shape_cast %29 : vector<1x72x64xbf16> to vector<72x64xbf16>
    %cst_10 = arith.constant dense<0.000000e+00> : vector<64x64xf32>
    %31 = tpu.matmul %28, %30, %cst_10 {dimension_numbers = #tpu.dot_dimension_numbers<[1], [0], [0], [1], [0, 0, 1, 1], [], []>} : vector<64x72xbf16>, vector<72x64xbf16>, vector<64x64xf32> -> vector<64x64xf32>
    %32 = arith.addf %21, %31 : vector<64x64xf32>
    %c0_11 = arith.constant 0 : index
    %c1 = arith.constant 1 : index
    %c0_12 = arith.constant 0 : index
    %33 = vector.load %arg1[%c0_11, %c1, %c0_12] : memref<1x82x72xf32, #tpu.memory_space<vmem>>, vector<1x64x72xf32>
    %34 = vector.shape_cast %33 : vector<1x64x72xf32> to vector<64x72xf32>
    %35 = arith.truncf %34 : vector<64x72xf32> to vector<64x72xbf16>
    %c1_13 = arith.constant 1 : index
    %c0_14 = arith.constant 0 : index
    %c0_15 = arith.constant 0 : index
    %36 = vector.load %arg2[%c1_13, %c0_14, %c0_15] : memref<9x72x64xbf16, #tpu.memory_space<vmem>>, vector<1x72x64xbf16>
    %37 = vector.shape_cast %36 : vector<1x72x64xbf16> to vector<72x64xbf16>
    %cst_16 = arith.constant dense<0.000000e+00> : vector<64x64xf32>
    %38 = tpu.matmul %35, %37, %cst_16 {dimension_numbers = #tpu.dot_dimension_numbers<[1], [0], [0], [1], [0, 0, 1, 1], [], []>} : vector<64x72xbf16>, vector<72x64xbf16>, vector<64x64xf32> -> vector<64x64xf32>
    %39 = arith.addf %32, %38 : vector<64x64xf32>
    %c0_17 = arith.constant 0 : index
    %c2 = arith.constant 2 : index
    %c0_18 = arith.constant 0 : index
    %40 = vector.load %arg1[%c0_17, %c2, %c0_18] : memref<1x82x72xf32, #tpu.memory_space<vmem>>, vector<1x64x72xf32>
    %41 = vector.shape_cast %40 : vector<1x64x72xf32> to vector<64x72xf32>
    %cst_19 = arith.constant 0.000000e+00 : f32
    %42 = vector.shape_cast %20 : vector<64x1xi1> to vector<64x1xi1>
    %43 = vector.broadcast %42 : vector<64x1xi1> to vector<64x72xi1>
    %44 = vector.broadcast %cst_19 : f32 to vector<64x72xf32>
    %45 = arith.select %43, %41, %44 : vector<64x72xi1>, vector<64x72xf32>
    %46 = arith.truncf %45 : vector<64x72xf32> to vector<64x72xbf16>
    %c2_20 = arith.constant 2 : index
    %c0_21 = arith.constant 0 : index
    %c0_22 = arith.constant 0 : index
    %47 = vector.load %arg2[%c2_20, %c0_21, %c0_22] : memref<9x72x64xbf16, #tpu.memory_space<vmem>>, vector<1x72x64xbf16>
    %48 = vector.shape_cast %47 : vector<1x72x64xbf16> to vector<72x64xbf16>
    %cst_23 = arith.constant dense<0.000000e+00> : vector<64x64xf32>
    %49 = tpu.matmul %46, %48, %cst_23 {dimension_numbers = #tpu.dot_dimension_numbers<[1], [0], [0], [1], [0, 0, 1, 1], [], []>} : vector<64x72xbf16>, vector<72x64xbf16>, vector<64x64xf32> -> vector<64x64xf32>
    %50 = arith.addf %39, %49 : vector<64x64xf32>
    %c0_24 = arith.constant 0 : index
    %c8 = arith.constant 8 : index
    %c0_25 = arith.constant 0 : index
    %51 = vector.load %arg1[%c0_24, %c8, %c0_25] : memref<1x82x72xf32, #tpu.memory_space<vmem>>, vector<1x64x72xf32>
    %52 = vector.shape_cast %51 : vector<1x64x72xf32> to vector<64x72xf32>
    %cst_26 = arith.constant 0.000000e+00 : f32
    %53 = vector.shape_cast %18 : vector<64x1xi1> to vector<64x1xi1>
    %54 = vector.broadcast %53 : vector<64x1xi1> to vector<64x72xi1>
    %55 = vector.broadcast %cst_26 : f32 to vector<64x72xf32>
    %56 = arith.select %54, %52, %55 : vector<64x72xi1>, vector<64x72xf32>
    %57 = arith.truncf %56 : vector<64x72xf32> to vector<64x72xbf16>
    %c3 = arith.constant 3 : index
    %c0_27 = arith.constant 0 : index
    %c0_28 = arith.constant 0 : index
    %58 = vector.load %arg2[%c3, %c0_27, %c0_28] : memref<9x72x64xbf16, #tpu.memory_space<vmem>>, vector<1x72x64xbf16>
    %59 = vector.shape_cast %58 : vector<1x72x64xbf16> to vector<72x64xbf16>
    %cst_29 = arith.constant dense<0.000000e+00> : vector<64x64xf32>
    %60 = tpu.matmul %57, %59, %cst_29 {dimension_numbers = #tpu.dot_dimension_numbers<[1], [0], [0], [1], [0, 0, 1, 1], [], []>} : vector<64x72xbf16>, vector<72x64xbf16>, vector<64x64xf32> -> vector<64x64xf32>
    %61 = arith.addf %50, %60 : vector<64x64xf32>
    %c0_30 = arith.constant 0 : index
    %c9 = arith.constant 9 : index
    %c0_31 = arith.constant 0 : index
    %62 = vector.load %arg1[%c0_30, %c9, %c0_31] : memref<1x82x72xf32, #tpu.memory_space<vmem>>, vector<1x64x72xf32>
    %63 = vector.shape_cast %62 : vector<1x64x72xf32> to vector<64x72xf32>
    %64 = arith.truncf %63 : vector<64x72xf32> to vector<64x72xbf16>
    %c4 = arith.constant 4 : index
    %c0_32 = arith.constant 0 : index
    %c0_33 = arith.constant 0 : index
    %65 = vector.load %arg2[%c4, %c0_32, %c0_33] : memref<9x72x64xbf16, #tpu.memory_space<vmem>>, vector<1x72x64xbf16>
    %66 = vector.shape_cast %65 : vector<1x72x64xbf16> to vector<72x64xbf16>
    %cst_34 = arith.constant dense<0.000000e+00> : vector<64x64xf32>
    %67 = tpu.matmul %64, %66, %cst_34 {dimension_numbers = #tpu.dot_dimension_numbers<[1], [0], [0], [1], [0, 0, 1, 1], [], []>} : vector<64x72xbf16>, vector<72x64xbf16>, vector<64x64xf32> -> vector<64x64xf32>
    %68 = arith.addf %61, %67 : vector<64x64xf32>
    %c0_35 = arith.constant 0 : index
    %c10 = arith.constant 10 : index
    %c0_36 = arith.constant 0 : index
    %69 = vector.load %arg1[%c0_35, %c10, %c0_36] : memref<1x82x72xf32, #tpu.memory_space<vmem>>, vector<1x64x72xf32>
    %70 = vector.shape_cast %69 : vector<1x64x72xf32> to vector<64x72xf32>
    %cst_37 = arith.constant 0.000000e+00 : f32
    %71 = vector.shape_cast %20 : vector<64x1xi1> to vector<64x1xi1>
    %72 = vector.broadcast %71 : vector<64x1xi1> to vector<64x72xi1>
    %73 = vector.broadcast %cst_37 : f32 to vector<64x72xf32>
    %74 = arith.select %72, %70, %73 : vector<64x72xi1>, vector<64x72xf32>
    %75 = arith.truncf %74 : vector<64x72xf32> to vector<64x72xbf16>
    %c5 = arith.constant 5 : index
    %c0_38 = arith.constant 0 : index
    %c0_39 = arith.constant 0 : index
    %76 = vector.load %arg2[%c5, %c0_38, %c0_39] : memref<9x72x64xbf16, #tpu.memory_space<vmem>>, vector<1x72x64xbf16>
    %77 = vector.shape_cast %76 : vector<1x72x64xbf16> to vector<72x64xbf16>
    %cst_40 = arith.constant dense<0.000000e+00> : vector<64x64xf32>
    %78 = tpu.matmul %75, %77, %cst_40 {dimension_numbers = #tpu.dot_dimension_numbers<[1], [0], [0], [1], [0, 0, 1, 1], [], []>} : vector<64x72xbf16>, vector<72x64xbf16>, vector<64x64xf32> -> vector<64x64xf32>
    %79 = arith.addf %68, %78 : vector<64x64xf32>
    %c0_41 = arith.constant 0 : index
    %c16 = arith.constant 16 : index
    %c0_42 = arith.constant 0 : index
    %80 = vector.load %arg1[%c0_41, %c16, %c0_42] : memref<1x82x72xf32, #tpu.memory_space<vmem>>, vector<1x64x72xf32>
    %81 = vector.shape_cast %80 : vector<1x64x72xf32> to vector<64x72xf32>
    %cst_43 = arith.constant 0.000000e+00 : f32
    %82 = vector.shape_cast %18 : vector<64x1xi1> to vector<64x1xi1>
    %83 = vector.broadcast %82 : vector<64x1xi1> to vector<64x72xi1>
    %84 = vector.broadcast %cst_43 : f32 to vector<64x72xf32>
    %85 = arith.select %83, %81, %84 : vector<64x72xi1>, vector<64x72xf32>
    %86 = arith.truncf %85 : vector<64x72xf32> to vector<64x72xbf16>
    %c6 = arith.constant 6 : index
    %c0_44 = arith.constant 0 : index
    %c0_45 = arith.constant 0 : index
    %87 = vector.load %arg2[%c6, %c0_44, %c0_45] : memref<9x72x64xbf16, #tpu.memory_space<vmem>>, vector<1x72x64xbf16>
    %88 = vector.shape_cast %87 : vector<1x72x64xbf16> to vector<72x64xbf16>
    %cst_46 = arith.constant dense<0.000000e+00> : vector<64x64xf32>
    %89 = tpu.matmul %86, %88, %cst_46 {dimension_numbers = #tpu.dot_dimension_numbers<[1], [0], [0], [1], [0, 0, 1, 1], [], []>} : vector<64x72xbf16>, vector<72x64xbf16>, vector<64x64xf32> -> vector<64x64xf32>
    %90 = arith.addf %79, %89 : vector<64x64xf32>
    %c0_47 = arith.constant 0 : index
    %c17 = arith.constant 17 : index
    %c0_48 = arith.constant 0 : index
    %91 = vector.load %arg1[%c0_47, %c17, %c0_48] : memref<1x82x72xf32, #tpu.memory_space<vmem>>, vector<1x64x72xf32>
    %92 = vector.shape_cast %91 : vector<1x64x72xf32> to vector<64x72xf32>
    %93 = arith.truncf %92 : vector<64x72xf32> to vector<64x72xbf16>
    %c7 = arith.constant 7 : index
    %c0_49 = arith.constant 0 : index
    %c0_50 = arith.constant 0 : index
    %94 = vector.load %arg2[%c7, %c0_49, %c0_50] : memref<9x72x64xbf16, #tpu.memory_space<vmem>>, vector<1x72x64xbf16>
    %95 = vector.shape_cast %94 : vector<1x72x64xbf16> to vector<72x64xbf16>
    %cst_51 = arith.constant dense<0.000000e+00> : vector<64x64xf32>
    %96 = tpu.matmul %93, %95, %cst_51 {dimension_numbers = #tpu.dot_dimension_numbers<[1], [0], [0], [1], [0, 0, 1, 1], [], []>} : vector<64x72xbf16>, vector<72x64xbf16>, vector<64x64xf32> -> vector<64x64xf32>
    %97 = arith.addf %90, %96 : vector<64x64xf32>
    %c0_52 = arith.constant 0 : index
    %c18 = arith.constant 18 : index
    %c0_53 = arith.constant 0 : index
    %98 = vector.load %arg1[%c0_52, %c18, %c0_53] : memref<1x82x72xf32, #tpu.memory_space<vmem>>, vector<1x64x72xf32>
    %99 = vector.shape_cast %98 : vector<1x64x72xf32> to vector<64x72xf32>
    %cst_54 = arith.constant 0.000000e+00 : f32
    %100 = vector.shape_cast %20 : vector<64x1xi1> to vector<64x1xi1>
    %101 = vector.broadcast %100 : vector<64x1xi1> to vector<64x72xi1>
    %102 = vector.broadcast %cst_54 : f32 to vector<64x72xf32>
    %103 = arith.select %101, %99, %102 : vector<64x72xi1>, vector<64x72xf32>
    %104 = arith.truncf %103 : vector<64x72xf32> to vector<64x72xbf16>
    %c8_55 = arith.constant 8 : index
    %c0_56 = arith.constant 0 : index
    %c0_57 = arith.constant 0 : index
    %105 = vector.load %arg2[%c8_55, %c0_56, %c0_57] : memref<9x72x64xbf16, #tpu.memory_space<vmem>>, vector<1x72x64xbf16>
    %106 = vector.shape_cast %105 : vector<1x72x64xbf16> to vector<72x64xbf16>
    %cst_58 = arith.constant dense<0.000000e+00> : vector<64x64xf32>
    %107 = tpu.matmul %104, %106, %cst_58 {dimension_numbers = #tpu.dot_dimension_numbers<[1], [0], [0], [1], [0, 0, 1, 1], [], []>} : vector<64x72xbf16>, vector<72x64xbf16>, vector<64x64xf32> -> vector<64x64xf32>
    %108 = arith.addf %97, %107 : vector<64x64xf32>
    %c0_59 = arith.constant 0 : index
    %c0_60 = arith.constant 0 : index
    %109 = vector.load %arg3[%c0_59, %c0_60] : memref<1x64xf32, #tpu.memory_space<vmem>>, vector<1x64xf32>
    %110 = vector.broadcast %109 : vector<1x64xf32> to vector<64x64xf32>
    %111 = arith.addf %108, %110 : vector<64x64xf32>
    %cst_61 = arith.constant 0.000000e+00 : f32
    %112 = vector.broadcast %cst_61 : f32 to vector<64x64xf32>
    %113 = arith.cmpf oge, %111, %112 : vector<64x64xf32>
    %c0_62 = arith.constant 0 : index
    %c0_63 = arith.constant 0 : index
    %114 = vector.load %arg4[%c0_62, %c0_63] : memref<1x64xf32, #tpu.memory_space<vmem>>, vector<1x64xf32>
    %115 = vector.broadcast %114 : vector<1x64xf32> to vector<64x64xf32>
    %116 = arith.mulf %115, %111 : vector<64x64xf32>
    %117 = arith.select %113, %111, %116 : vector<64x64xi1>, vector<64x64xf32>
    %c0_64 = arith.constant 0 : index
    %c0_65 = arith.constant 0 : index
    %c0_66 = arith.constant 0 : index
    %118 = vector.load %arg5[%c0_64, %c0_65, %c0_66] : memref<1x64x64xf32, #tpu.memory_space<vmem>>, vector<1x64x64xf32>
    %119 = vector.shape_cast %118 : vector<1x64x64xf32> to vector<64x64xf32>
    %120 = vector.shape_cast %117 : vector<64x64xf32> to vector<1x64x64xf32>
    tpu.vector_store %arg5[%c0_64, %c0_65, %c0_66], %120 {strides = array<i32>} : memref<1x64x64xf32, #tpu.memory_space<vmem>>, vector<1x64x64xf32>,
    return
  }
  func.func @transform_0(%arg0: i32) -> (i32, i32, i32) {
    %c0_i32 = arith.constant 0 : i32
    %c0_i32_0 = arith.constant 0 : i32
    %c0_i32_1 = arith.constant 0 : i32
    return %arg0, %c0_i32, %c0_i32_0 : i32, i32, i32
  }
  func.func @transform_1(%arg0: i32) -> (i32, i32, i32) {
    %c0_i32 = arith.constant 0 : i32
    %c0_i32_0 = arith.constant 0 : i32
    %c0_i32_1 = arith.constant 0 : i32
    %c0_i32_2 = arith.constant 0 : i32
    return %c0_i32, %c0_i32_0, %c0_i32_1 : i32, i32, i32
  }
  func.func @transform_2(%arg0: i32) -> (i32, i32) {
    %c0_i32 = arith.constant 0 : i32
    %c0_i32_0 = arith.constant 0 : i32
    %c0_i32_1 = arith.constant 0 : i32
    return %c0_i32, %c0_i32_0 : i32, i32
  }
  func.func @transform_3(%arg0: i32) -> (i32, i32) {
    %c0_i32 = arith.constant 0 : i32
    %c0_i32_0 = arith.constant 0 : i32
    %c0_i32_1 = arith.constant 0 : i32
    return %c0_i32, %c0_i32_0 : i32, i32
  }
  func.func @transform_4(%arg0: i32) -> (i32, i32, i32) {
    %c0_i32 = arith.constant 0 : i32
    %c0_i32_0 = arith.constant 0 : i32
    %c0_i32_1 = arith.constant 0 : i32
    return %arg0, %c0_i32, %c0_i32_0 : i32, i32, i32
  }
}

module attributes {stable_mosaic.version = 11 : i64} {
  func.func @kernel(%arg0: i32, %arg1: memref<1x82x64xf32, #tpu.memory_space<vmem>>, %arg2: memref<9x64x64xbf16, #tpu.memory_space<vmem>>, %arg3: memref<1x64xf32, #tpu.memory_space<vmem>>, %arg4: memref<1x64xf32, #tpu.memory_space<vmem>>, %arg5: memref<1x64x64xf32, #tpu.memory_space<vmem>>) attributes {dimension_semantics = [#tpu.dimension_semantics<parallel>], iteration_bounds = array<i64: 4>, scalar_prefetch = 0 : i64, scratch_operands = 0 : i64, tpu.core_type = #tpu.core_type<tc>, window_params = [{transform_indices = @transform_0, window_bounds = array<i64: 1, 82, 64>}, {pipeline_mode = #tpu.pipeline_mode<synchronous>, transform_indices = @transform_1, window_bounds = array<i64: 9, 64, 64>}, {pipeline_mode = #tpu.pipeline_mode<synchronous>, transform_indices = @transform_2, window_bounds = array<i64: 1, 64>}, {pipeline_mode = #tpu.pipeline_mode<synchronous>, transform_indices = @transform_3, window_bounds = array<i64: 1, 64>}, {transform_indices = @transform_4, window_bounds = array<i64: 1, 64, 64>}]} {
    %0 = tpu.iota {dimensions = array<i32: 0>} : vector<64x1xi32>
    %c8_i32 = arith.constant 8 : i32
    %c0_i32 = arith.constant 0 : i32
    %1 = arith.cmpi eq, %c8_i32, %c0_i32 : i32
    %c1_i32 = arith.constant 1 : i32
    %2 = arith.select %1, %c1_i32, %c8_i32 : i32
    %3 = vector.broadcast %2 : i32 to vector<64x1xi32>
    %4 = arith.remsi %0, %3 : vector<64x1xi32>
    %c0_i32_0 = arith.constant 0 : i32
    %5 = vector.broadcast %c0_i32_0 : i32 to vector<64x1xi32>
    %6 = arith.cmpi ne, %4, %5 : vector<64x1xi32>
    %c0_i32_1 = arith.constant 0 : i32
    %7 = vector.broadcast %c0_i32_1 : i32 to vector<64x1xi32>
    %8 = arith.cmpi slt, %4, %7 : vector<64x1xi32>
    %c0_i32_2 = arith.constant 0 : i32
    %9 = arith.cmpi slt, %2, %c0_i32_2 : i32
    %10 = vector.broadcast %9 : i1 to vector<64x1xi1>
    %11 = vector.broadcast %10 : vector<64x1xi1> to vector<64x1xi1>
    %12 = arith.xori %8, %11 : vector<64x1xi1>
    %13 = arith.andi %12, %6 : vector<64x1xi1>
    %14 = vector.broadcast %2 : i32 to vector<64x1xi32>
    %15 = arith.addi %4, %14 : vector<64x1xi32>
    %16 = arith.select %13, %15, %4 : vector<64x1xi1>, vector<64x1xi32>
    %c0_i32_3 = arith.constant 0 : i32
    %17 = vector.broadcast %c0_i32_3 : i32 to vector<64x1xi32>
    %18 = arith.cmpi sgt, %16, %17 : vector<64x1xi32>
    %c7_i32 = arith.constant 7 : i32
    %19 = vector.broadcast %c7_i32 : i32 to vector<64x1xi32>
    %20 = arith.cmpi slt, %16, %19 : vector<64x1xi32>
    %cst = arith.constant 0.000000e+00 : f32
    %21 = vector.broadcast %cst : f32 to vector<64x64xf32>
    %c0 = arith.constant 0 : index
    %c0_4 = arith.constant 0 : index
    %c0_5 = arith.constant 0 : index
    %22 = vector.load %arg1[%c0, %c0_4, %c0_5] : memref<1x82x64xf32, #tpu.memory_space<vmem>>, vector<1x64x64xf32>
    %23 = vector.shape_cast %22 : vector<1x64x64xf32> to vector<64x64xf32>
    %cst_6 = arith.constant 0.000000e+00 : f32
    %24 = vector.shape_cast %18 : vector<64x1xi1> to vector<64x1xi1>
    %25 = vector.broadcast %24 : vector<64x1xi1> to vector<64x64xi1>
    %26 = vector.broadcast %cst_6 : f32 to vector<64x64xf32>
    %27 = arith.select %25, %23, %26 : vector<64x64xi1>, vector<64x64xf32>
    %28 = arith.truncf %27 : vector<64x64xf32> to vector<64x64xbf16>
    %c0_7 = arith.constant 0 : index
    %c0_8 = arith.constant 0 : index
    %c0_9 = arith.constant 0 : index
    %29 = vector.load %arg2[%c0_7, %c0_8, %c0_9] : memref<9x64x64xbf16, #tpu.memory_space<vmem>>, vector<1x64x64xbf16>
    %30 = vector.shape_cast %29 : vector<1x64x64xbf16> to vector<64x64xbf16>
    %cst_10 = arith.constant dense<0.000000e+00> : vector<64x64xf32>
    %31 = tpu.matmul %28, %30, %cst_10 {dimension_numbers = #tpu.dot_dimension_numbers<[1], [0], [0], [1], [0, 0, 1, 1], [], []>} : vector<64x64xbf16>, vector<64x64xbf16>, vector<64x64xf32> -> vector<64x64xf32>
    %32 = arith.addf %21, %31 : vector<64x64xf32>
    %c0_11 = arith.constant 0 : index
    %c1 = arith.constant 1 : index
    %c0_12 = arith.constant 0 : index
    %33 = vector.load %arg1[%c0_11, %c1, %c0_12] : memref<1x82x64xf32, #tpu.memory_space<vmem>>, vector<1x64x64xf32>
    %34 = vector.shape_cast %33 : vector<1x64x64xf32> to vector<64x64xf32>
    %35 = arith.truncf %34 : vector<64x64xf32> to vector<64x64xbf16>
    %c1_13 = arith.constant 1 : index
    %c0_14 = arith.constant 0 : index
    %c0_15 = arith.constant 0 : index
    %36 = vector.load %arg2[%c1_13, %c0_14, %c0_15] : memref<9x64x64xbf16, #tpu.memory_space<vmem>>, vector<1x64x64xbf16>
    %37 = vector.shape_cast %36 : vector<1x64x64xbf16> to vector<64x64xbf16>
    %cst_16 = arith.constant dense<0.000000e+00> : vector<64x64xf32>
    %38 = tpu.matmul %35, %37, %cst_16 {dimension_numbers = #tpu.dot_dimension_numbers<[1], [0], [0], [1], [0, 0, 1, 1], [], []>} : vector<64x64xbf16>, vector<64x64xbf16>, vector<64x64xf32> -> vector<64x64xf32>
    %39 = arith.addf %32, %38 : vector<64x64xf32>
    %c0_17 = arith.constant 0 : index
    %c2 = arith.constant 2 : index
    %c0_18 = arith.constant 0 : index
    %40 = vector.load %arg1[%c0_17, %c2, %c0_18] : memref<1x82x64xf32, #tpu.memory_space<vmem>>, vector<1x64x64xf32>
    %41 = vector.shape_cast %40 : vector<1x64x64xf32> to vector<64x64xf32>
    %cst_19 = arith.constant 0.000000e+00 : f32
    %42 = vector.shape_cast %20 : vector<64x1xi1> to vector<64x1xi1>
    %43 = vector.broadcast %42 : vector<64x1xi1> to vector<64x64xi1>
    %44 = vector.broadcast %cst_19 : f32 to vector<64x64xf32>
    %45 = arith.select %43, %41, %44 : vector<64x64xi1>, vector<64x64xf32>
    %46 = arith.truncf %45 : vector<64x64xf32> to vector<64x64xbf16>
    %c2_20 = arith.constant 2 : index
    %c0_21 = arith.constant 0 : index
    %c0_22 = arith.constant 0 : index
    %47 = vector.load %arg2[%c2_20, %c0_21, %c0_22] : memref<9x64x64xbf16, #tpu.memory_space<vmem>>, vector<1x64x64xbf16>
    %48 = vector.shape_cast %47 : vector<1x64x64xbf16> to vector<64x64xbf16>
    %cst_23 = arith.constant dense<0.000000e+00> : vector<64x64xf32>
    %49 = tpu.matmul %46, %48, %cst_23 {dimension_numbers = #tpu.dot_dimension_numbers<[1], [0], [0], [1], [0, 0, 1, 1], [], []>} : vector<64x64xbf16>, vector<64x64xbf16>, vector<64x64xf32> -> vector<64x64xf32>
    %50 = arith.addf %39, %49 : vector<64x64xf32>
    %c0_24 = arith.constant 0 : index
    %c8 = arith.constant 8 : index
    %c0_25 = arith.constant 0 : index
    %51 = vector.load %arg1[%c0_24, %c8, %c0_25] : memref<1x82x64xf32, #tpu.memory_space<vmem>>, vector<1x64x64xf32>
    %52 = vector.shape_cast %51 : vector<1x64x64xf32> to vector<64x64xf32>
    %cst_26 = arith.constant 0.000000e+00 : f32
    %53 = vector.shape_cast %18 : vector<64x1xi1> to vector<64x1xi1>
    %54 = vector.broadcast %53 : vector<64x1xi1> to vector<64x64xi1>
    %55 = vector.broadcast %cst_26 : f32 to vector<64x64xf32>
    %56 = arith.select %54, %52, %55 : vector<64x64xi1>, vector<64x64xf32>
    %57 = arith.truncf %56 : vector<64x64xf32> to vector<64x64xbf16>
    %c3 = arith.constant 3 : index
    %c0_27 = arith.constant 0 : index
    %c0_28 = arith.constant 0 : index
    %58 = vector.load %arg2[%c3, %c0_27, %c0_28] : memref<9x64x64xbf16, #tpu.memory_space<vmem>>, vector<1x64x64xbf16>
    %59 = vector.shape_cast %58 : vector<1x64x64xbf16> to vector<64x64xbf16>
    %cst_29 = arith.constant dense<0.000000e+00> : vector<64x64xf32>
    %60 = tpu.matmul %57, %59, %cst_29 {dimension_numbers = #tpu.dot_dimension_numbers<[1], [0], [0], [1], [0, 0, 1, 1], [], []>} : vector<64x64xbf16>, vector<64x64xbf16>, vector<64x64xf32> -> vector<64x64xf32>
    %61 = arith.addf %50, %60 : vector<64x64xf32>
    %c0_30 = arith.constant 0 : index
    %c9 = arith.constant 9 : index
    %c0_31 = arith.constant 0 : index
    %62 = vector.load %arg1[%c0_30, %c9, %c0_31] : memref<1x82x64xf32, #tpu.memory_space<vmem>>, vector<1x64x64xf32>
    %63 = vector.shape_cast %62 : vector<1x64x64xf32> to vector<64x64xf32>
    %64 = arith.truncf %63 : vector<64x64xf32> to vector<64x64xbf16>
    %c4 = arith.constant 4 : index
    %c0_32 = arith.constant 0 : index
    %c0_33 = arith.constant 0 : index
    %65 = vector.load %arg2[%c4, %c0_32, %c0_33] : memref<9x64x64xbf16, #tpu.memory_space<vmem>>, vector<1x64x64xbf16>
    %66 = vector.shape_cast %65 : vector<1x64x64xbf16> to vector<64x64xbf16>
    %cst_34 = arith.constant dense<0.000000e+00> : vector<64x64xf32>
    %67 = tpu.matmul %64, %66, %cst_34 {dimension_numbers = #tpu.dot_dimension_numbers<[1], [0], [0], [1], [0, 0, 1, 1], [], []>} : vector<64x64xbf16>, vector<64x64xbf16>, vector<64x64xf32> -> vector<64x64xf32>
    %68 = arith.addf %61, %67 : vector<64x64xf32>
    %c0_35 = arith.constant 0 : index
    %c10 = arith.constant 10 : index
    %c0_36 = arith.constant 0 : index
    %69 = vector.load %arg1[%c0_35, %c10, %c0_36] : memref<1x82x64xf32, #tpu.memory_space<vmem>>, vector<1x64x64xf32>
    %70 = vector.shape_cast %69 : vector<1x64x64xf32> to vector<64x64xf32>
    %cst_37 = arith.constant 0.000000e+00 : f32
    %71 = vector.shape_cast %20 : vector<64x1xi1> to vector<64x1xi1>
    %72 = vector.broadcast %71 : vector<64x1xi1> to vector<64x64xi1>
    %73 = vector.broadcast %cst_37 : f32 to vector<64x64xf32>
    %74 = arith.select %72, %70, %73 : vector<64x64xi1>, vector<64x64xf32>
    %75 = arith.truncf %74 : vector<64x64xf32> to vector<64x64xbf16>
    %c5 = arith.constant 5 : index
    %c0_38 = arith.constant 0 : index
    %c0_39 = arith.constant 0 : index
    %76 = vector.load %arg2[%c5, %c0_38, %c0_39] : memref<9x64x64xbf16, #tpu.memory_space<vmem>>, vector<1x64x64xbf16>
    %77 = vector.shape_cast %76 : vector<1x64x64xbf16> to vector<64x64xbf16>
    %cst_40 = arith.constant dense<0.000000e+00> : vector<64x64xf32>
    %78 = tpu.matmul %75, %77, %cst_40 {dimension_numbers = #tpu.dot_dimension_numbers<[1], [0], [0], [1], [0, 0, 1, 1], [], []>} : vector<64x64xbf16>, vector<64x64xbf16>, vector<64x64xf32> -> vector<64x64xf32>
    %79 = arith.addf %68, %78 : vector<64x64xf32>
    %c0_41 = arith.constant 0 : index
    %c16 = arith.constant 16 : index
    %c0_42 = arith.constant 0 : index
    %80 = vector.load %arg1[%c0_41, %c16, %c0_42] : memref<1x82x64xf32, #tpu.memory_space<vmem>>, vector<1x64x64xf32>
    %81 = vector.shape_cast %80 : vector<1x64x64xf32> to vector<64x64xf32>
    %cst_43 = arith.constant 0.000000e+00 : f32
    %82 = vector.shape_cast %18 : vector<64x1xi1> to vector<64x1xi1>
    %83 = vector.broadcast %82 : vector<64x1xi1> to vector<64x64xi1>
    %84 = vector.broadcast %cst_43 : f32 to vector<64x64xf32>
    %85 = arith.select %83, %81, %84 : vector<64x64xi1>, vector<64x64xf32>
    %86 = arith.truncf %85 : vector<64x64xf32> to vector<64x64xbf16>
    %c6 = arith.constant 6 : index
    %c0_44 = arith.constant 0 : index
    %c0_45 = arith.constant 0 : index
    %87 = vector.load %arg2[%c6, %c0_44, %c0_45] : memref<9x64x64xbf16, #tpu.memory_space<vmem>>, vector<1x64x64xbf16>
    %88 = vector.shape_cast %87 : vector<1x64x64xbf16> to vector<64x64xbf16>
    %cst_46 = arith.constant dense<0.000000e+00> : vector<64x64xf32>
    %89 = tpu.matmul %86, %88, %cst_46 {dimension_numbers = #tpu.dot_dimension_numbers<[1], [0], [0], [1], [0, 0, 1, 1], [], []>} : vector<64x64xbf16>, vector<64x64xbf16>, vector<64x64xf32> -> vector<64x64xf32>
    %90 = arith.addf %79, %89 : vector<64x64xf32>
    %c0_47 = arith.constant 0 : index
    %c17 = arith.constant 17 : index
    %c0_48 = arith.constant 0 : index
    %91 = vector.load %arg1[%c0_47, %c17, %c0_48] : memref<1x82x64xf32, #tpu.memory_space<vmem>>, vector<1x64x64xf32>
    %92 = vector.shape_cast %91 : vector<1x64x64xf32> to vector<64x64xf32>
    %93 = arith.truncf %92 : vector<64x64xf32> to vector<64x64xbf16>
    %c7 = arith.constant 7 : index
    %c0_49 = arith.constant 0 : index
    %c0_50 = arith.constant 0 : index
    %94 = vector.load %arg2[%c7, %c0_49, %c0_50] : memref<9x64x64xbf16, #tpu.memory_space<vmem>>, vector<1x64x64xbf16>
    %95 = vector.shape_cast %94 : vector<1x64x64xbf16> to vector<64x64xbf16>
    %cst_51 = arith.constant dense<0.000000e+00> : vector<64x64xf32>
    %96 = tpu.matmul %93, %95, %cst_51 {dimension_numbers = #tpu.dot_dimension_numbers<[1], [0], [0], [1], [0, 0, 1, 1], [], []>} : vector<64x64xbf16>, vector<64x64xbf16>, vector<64x64xf32> -> vector<64x64xf32>
    %97 = arith.addf %90, %96 : vector<64x64xf32>
    %c0_52 = arith.constant 0 : index
    %c18 = arith.constant 18 : index
    %c0_53 = arith.constant 0 : index
    %98 = vector.load %arg1[%c0_52, %c18, %c0_53] : memref<1x82x64xf32, #tpu.memory_space<vmem>>, vector<1x64x64xf32>
    %99 = vector.shape_cast %98 : vector<1x64x64xf32> to vector<64x64xf32>
    %cst_54 = arith.constant 0.000000e+00 : f32
    %100 = vector.shape_cast %20 : vector<64x1xi1> to vector<64x1xi1>
    %101 = vector.broadcast %100 : vector<64x1xi1> to vector<64x64xi1>
    %102 = vector.broadcast %cst_54 : f32 to vector<64x64xf32>
    %103 = arith.select %101, %99, %102 : vector<64x64xi1>, vector<64x64xf32>
    %104 = arith.truncf %103 : vector<64x64xf32> to vector<64x64xbf16>
    %c8_55 = arith.constant 8 : index
    %c0_56 = arith.constant 0 : index
    %c0_57 = arith.constant 0 : index
    %105 = vector.load %arg2[%c8_55, %c0_56, %c0_57] : memref<9x64x64xbf16, #tpu.memory_space<vmem>>, vector<1x64x64xbf16>
    %106 = vector.shape_cast %105 : vector<1x64x64xbf16> to vector<64x64xbf16>
    %cst_58 = arith.constant dense<0.000000e+00> : vector<64x64xf32>
    %107 = tpu.matmul %104, %106, %cst_58 {dimension_numbers = #tpu.dot_dimension_numbers<[1], [0], [0], [1], [0, 0, 1, 1], [], []>} : vector<64x64xbf16>, vector<64x64xbf16>, vector<64x64xf32> -> vector<64x64xf32>
    %108 = arith.addf %97, %107 : vector<64x64xf32>
    %c0_59 = arith.constant 0 : index
    %c0_60 = arith.constant 0 : index
    %109 = vector.load %arg3[%c0_59, %c0_60] : memref<1x64xf32, #tpu.memory_space<vmem>>, vector<1x64xf32>
    %110 = vector.broadcast %109 : vector<1x64xf32> to vector<64x64xf32>
    %111 = arith.addf %108, %110 : vector<64x64xf32>
    %cst_61 = arith.constant 0.000000e+00 : f32
    %112 = vector.broadcast %cst_61 : f32 to vector<64x64xf32>
    %113 = arith.cmpf oge, %111, %112 : vector<64x64xf32>
    %c0_62 = arith.constant 0 : index
    %c0_63 = arith.constant 0 : index
    %114 = vector.load %arg4[%c0_62, %c0_63] : memref<1x64xf32, #tpu.memory_space<vmem>>, vector<1x64xf32>
    %115 = vector.broadcast %114 : vector<1x64xf32> to vector<64x64xf32>
    %116 = arith.mulf %115, %111 : vector<64x64xf32>
    %117 = arith.select %113, %111, %116 : vector<64x64xi1>, vector<64x64xf32>
    %c0_64 = arith.constant 0 : index
    %c0_65 = arith.constant 0 : index
    %c0_66 = arith.constant 0 : index
    %118 = vector.load %arg5[%c0_64, %c0_65, %c0_66] : memref<1x64x64xf32, #tpu.memory_space<vmem>>, vector<1x64x64xf32>
    %119 = vector.shape_cast %118 : vector<1x64x64xf32> to vector<64x64xf32>
    %120 = vector.shape_cast %117 : vector<64x64xf32> to vector<1x64x64xf32>
    tpu.vector_store %arg5[%c0_64, %c0_65, %c0_66], %120 {strides = array<i32>} : memref<1x64x64xf32, #tpu.memory_space<vmem>>, vector<1x64x64xf32>,
    return
  }
  func.func @transform_0(%arg0: i32) -> (i32, i32, i32) {
    %c0_i32 = arith.constant 0 : i32
    %c0_i32_0 = arith.constant 0 : i32
    %c0_i32_1 = arith.constant 0 : i32
    return %arg0, %c0_i32, %c0_i32_0 : i32, i32, i32
  }
  func.func @transform_1(%arg0: i32) -> (i32, i32, i32) {
    %c0_i32 = arith.constant 0 : i32
    %c0_i32_0 = arith.constant 0 : i32
    %c0_i32_1 = arith.constant 0 : i32
    %c0_i32_2 = arith.constant 0 : i32
    return %c0_i32, %c0_i32_0, %c0_i32_1 : i32, i32, i32
  }
  func.func @transform_2(%arg0: i32) -> (i32, i32) {
    %c0_i32 = arith.constant 0 : i32
    %c0_i32_0 = arith.constant 0 : i32
    %c0_i32_1 = arith.constant 0 : i32
    return %c0_i32, %c0_i32_0 : i32, i32
  }
  func.func @transform_3(%arg0: i32) -> (i32, i32) {
    %c0_i32 = arith.constant 0 : i32
    %c0_i32_0 = arith.constant 0 : i32
    %c0_i32_1 = arith.constant 0 : i32
    return %c0_i32, %c0_i32_0 : i32, i32
  }
  func.func @transform_4(%arg0: i32) -> (i32, i32, i32) {
    %c0_i32 = arith.constant 0 : i32
    %c0_i32_0 = arith.constant 0 : i32
    %c0_i32_1 = arith.constant 0 : i32
    return %arg0, %c0_i32, %c0_i32_0 : i32, i32, i32
  }
}

module attributes {stable_mosaic.version = 11 : i64} {
  func.func @kernel(%arg0: i32, %arg1: memref<1x82x32xf32, #tpu.memory_space<vmem>>, %arg2: memref<9x32x32xbf16, #tpu.memory_space<vmem>>, %arg3: memref<1x32xf32, #tpu.memory_space<vmem>>, %arg4: memref<1x32xf32, #tpu.memory_space<vmem>>, %arg5: memref<1x64x32xf32, #tpu.memory_space<vmem>>) attributes {dimension_semantics = [#tpu.dimension_semantics<parallel>], iteration_bounds = array<i64: 4>, scalar_prefetch = 0 : i64, scratch_operands = 0 : i64, tpu.core_type = #tpu.core_type<tc>, window_params = [{transform_indices = @transform_0, window_bounds = array<i64: 1, 82, 32>}, {pipeline_mode = #tpu.pipeline_mode<synchronous>, transform_indices = @transform_1, window_bounds = array<i64: 9, 32, 32>}, {pipeline_mode = #tpu.pipeline_mode<synchronous>, transform_indices = @transform_2, window_bounds = array<i64: 1, 32>}, {pipeline_mode = #tpu.pipeline_mode<synchronous>, transform_indices = @transform_3, window_bounds = array<i64: 1, 32>}, {transform_indices = @transform_4, window_bounds = array<i64: 1, 64, 32>}]} {
    %0 = tpu.iota {dimensions = array<i32: 0>} : vector<64x1xi32>
    %c8_i32 = arith.constant 8 : i32
    %c0_i32 = arith.constant 0 : i32
    %1 = arith.cmpi eq, %c8_i32, %c0_i32 : i32
    %c1_i32 = arith.constant 1 : i32
    %2 = arith.select %1, %c1_i32, %c8_i32 : i32
    %3 = vector.broadcast %2 : i32 to vector<64x1xi32>
    %4 = arith.remsi %0, %3 : vector<64x1xi32>
    %c0_i32_0 = arith.constant 0 : i32
    %5 = vector.broadcast %c0_i32_0 : i32 to vector<64x1xi32>
    %6 = arith.cmpi ne, %4, %5 : vector<64x1xi32>
    %c0_i32_1 = arith.constant 0 : i32
    %7 = vector.broadcast %c0_i32_1 : i32 to vector<64x1xi32>
    %8 = arith.cmpi slt, %4, %7 : vector<64x1xi32>
    %c0_i32_2 = arith.constant 0 : i32
    %9 = arith.cmpi slt, %2, %c0_i32_2 : i32
    %10 = vector.broadcast %9 : i1 to vector<64x1xi1>
    %11 = vector.broadcast %10 : vector<64x1xi1> to vector<64x1xi1>
    %12 = arith.xori %8, %11 : vector<64x1xi1>
    %13 = arith.andi %12, %6 : vector<64x1xi1>
    %14 = vector.broadcast %2 : i32 to vector<64x1xi32>
    %15 = arith.addi %4, %14 : vector<64x1xi32>
    %16 = arith.select %13, %15, %4 : vector<64x1xi1>, vector<64x1xi32>
    %c0_i32_3 = arith.constant 0 : i32
    %17 = vector.broadcast %c0_i32_3 : i32 to vector<64x1xi32>
    %18 = arith.cmpi sgt, %16, %17 : vector<64x1xi32>
    %c7_i32 = arith.constant 7 : i32
    %19 = vector.broadcast %c7_i32 : i32 to vector<64x1xi32>
    %20 = arith.cmpi slt, %16, %19 : vector<64x1xi32>
    %cst = arith.constant 0.000000e+00 : f32
    %21 = vector.broadcast %cst : f32 to vector<64x32xf32>
    %c0 = arith.constant 0 : index
    %c0_4 = arith.constant 0 : index
    %c0_5 = arith.constant 0 : index
    %22 = vector.load %arg1[%c0, %c0_4, %c0_5] : memref<1x82x32xf32, #tpu.memory_space<vmem>>, vector<1x64x32xf32>
    %23 = vector.shape_cast %22 : vector<1x64x32xf32> to vector<64x32xf32>
    %cst_6 = arith.constant 0.000000e+00 : f32
    %24 = vector.shape_cast %18 : vector<64x1xi1> to vector<64x1xi1>
    %25 = vector.broadcast %24 : vector<64x1xi1> to vector<64x32xi1>
    %26 = vector.broadcast %cst_6 : f32 to vector<64x32xf32>
    %27 = arith.select %25, %23, %26 : vector<64x32xi1>, vector<64x32xf32>
    %28 = arith.truncf %27 : vector<64x32xf32> to vector<64x32xbf16>
    %c0_7 = arith.constant 0 : index
    %c0_8 = arith.constant 0 : index
    %c0_9 = arith.constant 0 : index
    %29 = vector.load %arg2[%c0_7, %c0_8, %c0_9] : memref<9x32x32xbf16, #tpu.memory_space<vmem>>, vector<1x32x32xbf16>
    %30 = vector.shape_cast %29 : vector<1x32x32xbf16> to vector<32x32xbf16>
    %cst_10 = arith.constant dense<0.000000e+00> : vector<64x32xf32>
    %31 = tpu.matmul %28, %30, %cst_10 {dimension_numbers = #tpu.dot_dimension_numbers<[1], [0], [0], [1], [0, 0, 1, 1], [], []>} : vector<64x32xbf16>, vector<32x32xbf16>, vector<64x32xf32> -> vector<64x32xf32>
    %32 = arith.addf %21, %31 : vector<64x32xf32>
    %c0_11 = arith.constant 0 : index
    %c1 = arith.constant 1 : index
    %c0_12 = arith.constant 0 : index
    %33 = vector.load %arg1[%c0_11, %c1, %c0_12] : memref<1x82x32xf32, #tpu.memory_space<vmem>>, vector<1x64x32xf32>
    %34 = vector.shape_cast %33 : vector<1x64x32xf32> to vector<64x32xf32>
    %35 = arith.truncf %34 : vector<64x32xf32> to vector<64x32xbf16>
    %c1_13 = arith.constant 1 : index
    %c0_14 = arith.constant 0 : index
    %c0_15 = arith.constant 0 : index
    %36 = vector.load %arg2[%c1_13, %c0_14, %c0_15] : memref<9x32x32xbf16, #tpu.memory_space<vmem>>, vector<1x32x32xbf16>
    %37 = vector.shape_cast %36 : vector<1x32x32xbf16> to vector<32x32xbf16>
    %cst_16 = arith.constant dense<0.000000e+00> : vector<64x32xf32>
    %38 = tpu.matmul %35, %37, %cst_16 {dimension_numbers = #tpu.dot_dimension_numbers<[1], [0], [0], [1], [0, 0, 1, 1], [], []>} : vector<64x32xbf16>, vector<32x32xbf16>, vector<64x32xf32> -> vector<64x32xf32>
    %39 = arith.addf %32, %38 : vector<64x32xf32>
    %c0_17 = arith.constant 0 : index
    %c2 = arith.constant 2 : index
    %c0_18 = arith.constant 0 : index
    %40 = vector.load %arg1[%c0_17, %c2, %c0_18] : memref<1x82x32xf32, #tpu.memory_space<vmem>>, vector<1x64x32xf32>
    %41 = vector.shape_cast %40 : vector<1x64x32xf32> to vector<64x32xf32>
    %cst_19 = arith.constant 0.000000e+00 : f32
    %42 = vector.shape_cast %20 : vector<64x1xi1> to vector<64x1xi1>
    %43 = vector.broadcast %42 : vector<64x1xi1> to vector<64x32xi1>
    %44 = vector.broadcast %cst_19 : f32 to vector<64x32xf32>
    %45 = arith.select %43, %41, %44 : vector<64x32xi1>, vector<64x32xf32>
    %46 = arith.truncf %45 : vector<64x32xf32> to vector<64x32xbf16>
    %c2_20 = arith.constant 2 : index
    %c0_21 = arith.constant 0 : index
    %c0_22 = arith.constant 0 : index
    %47 = vector.load %arg2[%c2_20, %c0_21, %c0_22] : memref<9x32x32xbf16, #tpu.memory_space<vmem>>, vector<1x32x32xbf16>
    %48 = vector.shape_cast %47 : vector<1x32x32xbf16> to vector<32x32xbf16>
    %cst_23 = arith.constant dense<0.000000e+00> : vector<64x32xf32>
    %49 = tpu.matmul %46, %48, %cst_23 {dimension_numbers = #tpu.dot_dimension_numbers<[1], [0], [0], [1], [0, 0, 1, 1], [], []>} : vector<64x32xbf16>, vector<32x32xbf16>, vector<64x32xf32> -> vector<64x32xf32>
    %50 = arith.addf %39, %49 : vector<64x32xf32>
    %c0_24 = arith.constant 0 : index
    %c8 = arith.constant 8 : index
    %c0_25 = arith.constant 0 : index
    %51 = vector.load %arg1[%c0_24, %c8, %c0_25] : memref<1x82x32xf32, #tpu.memory_space<vmem>>, vector<1x64x32xf32>
    %52 = vector.shape_cast %51 : vector<1x64x32xf32> to vector<64x32xf32>
    %cst_26 = arith.constant 0.000000e+00 : f32
    %53 = vector.shape_cast %18 : vector<64x1xi1> to vector<64x1xi1>
    %54 = vector.broadcast %53 : vector<64x1xi1> to vector<64x32xi1>
    %55 = vector.broadcast %cst_26 : f32 to vector<64x32xf32>
    %56 = arith.select %54, %52, %55 : vector<64x32xi1>, vector<64x32xf32>
    %57 = arith.truncf %56 : vector<64x32xf32> to vector<64x32xbf16>
    %c3 = arith.constant 3 : index
    %c0_27 = arith.constant 0 : index
    %c0_28 = arith.constant 0 : index
    %58 = vector.load %arg2[%c3, %c0_27, %c0_28] : memref<9x32x32xbf16, #tpu.memory_space<vmem>>, vector<1x32x32xbf16>
    %59 = vector.shape_cast %58 : vector<1x32x32xbf16> to vector<32x32xbf16>
    %cst_29 = arith.constant dense<0.000000e+00> : vector<64x32xf32>
    %60 = tpu.matmul %57, %59, %cst_29 {dimension_numbers = #tpu.dot_dimension_numbers<[1], [0], [0], [1], [0, 0, 1, 1], [], []>} : vector<64x32xbf16>, vector<32x32xbf16>, vector<64x32xf32> -> vector<64x32xf32>
    %61 = arith.addf %50, %60 : vector<64x32xf32>
    %c0_30 = arith.constant 0 : index
    %c9 = arith.constant 9 : index
    %c0_31 = arith.constant 0 : index
    %62 = vector.load %arg1[%c0_30, %c9, %c0_31] : memref<1x82x32xf32, #tpu.memory_space<vmem>>, vector<1x64x32xf32>
    %63 = vector.shape_cast %62 : vector<1x64x32xf32> to vector<64x32xf32>
    %64 = arith.truncf %63 : vector<64x32xf32> to vector<64x32xbf16>
    %c4 = arith.constant 4 : index
    %c0_32 = arith.constant 0 : index
    %c0_33 = arith.constant 0 : index
    %65 = vector.load %arg2[%c4, %c0_32, %c0_33] : memref<9x32x32xbf16, #tpu.memory_space<vmem>>, vector<1x32x32xbf16>
    %66 = vector.shape_cast %65 : vector<1x32x32xbf16> to vector<32x32xbf16>
    %cst_34 = arith.constant dense<0.000000e+00> : vector<64x32xf32>
    %67 = tpu.matmul %64, %66, %cst_34 {dimension_numbers = #tpu.dot_dimension_numbers<[1], [0], [0], [1], [0, 0, 1, 1], [], []>} : vector<64x32xbf16>, vector<32x32xbf16>, vector<64x32xf32> -> vector<64x32xf32>
    %68 = arith.addf %61, %67 : vector<64x32xf32>
    %c0_35 = arith.constant 0 : index
    %c10 = arith.constant 10 : index
    %c0_36 = arith.constant 0 : index
    %69 = vector.load %arg1[%c0_35, %c10, %c0_36] : memref<1x82x32xf32, #tpu.memory_space<vmem>>, vector<1x64x32xf32>
    %70 = vector.shape_cast %69 : vector<1x64x32xf32> to vector<64x32xf32>
    %cst_37 = arith.constant 0.000000e+00 : f32
    %71 = vector.shape_cast %20 : vector<64x1xi1> to vector<64x1xi1>
    %72 = vector.broadcast %71 : vector<64x1xi1> to vector<64x32xi1>
    %73 = vector.broadcast %cst_37 : f32 to vector<64x32xf32>
    %74 = arith.select %72, %70, %73 : vector<64x32xi1>, vector<64x32xf32>
    %75 = arith.truncf %74 : vector<64x32xf32> to vector<64x32xbf16>
    %c5 = arith.constant 5 : index
    %c0_38 = arith.constant 0 : index
    %c0_39 = arith.constant 0 : index
    %76 = vector.load %arg2[%c5, %c0_38, %c0_39] : memref<9x32x32xbf16, #tpu.memory_space<vmem>>, vector<1x32x32xbf16>
    %77 = vector.shape_cast %76 : vector<1x32x32xbf16> to vector<32x32xbf16>
    %cst_40 = arith.constant dense<0.000000e+00> : vector<64x32xf32>
    %78 = tpu.matmul %75, %77, %cst_40 {dimension_numbers = #tpu.dot_dimension_numbers<[1], [0], [0], [1], [0, 0, 1, 1], [], []>} : vector<64x32xbf16>, vector<32x32xbf16>, vector<64x32xf32> -> vector<64x32xf32>
    %79 = arith.addf %68, %78 : vector<64x32xf32>
    %c0_41 = arith.constant 0 : index
    %c16 = arith.constant 16 : index
    %c0_42 = arith.constant 0 : index
    %80 = vector.load %arg1[%c0_41, %c16, %c0_42] : memref<1x82x32xf32, #tpu.memory_space<vmem>>, vector<1x64x32xf32>
    %81 = vector.shape_cast %80 : vector<1x64x32xf32> to vector<64x32xf32>
    %cst_43 = arith.constant 0.000000e+00 : f32
    %82 = vector.shape_cast %18 : vector<64x1xi1> to vector<64x1xi1>
    %83 = vector.broadcast %82 : vector<64x1xi1> to vector<64x32xi1>
    %84 = vector.broadcast %cst_43 : f32 to vector<64x32xf32>
    %85 = arith.select %83, %81, %84 : vector<64x32xi1>, vector<64x32xf32>
    %86 = arith.truncf %85 : vector<64x32xf32> to vector<64x32xbf16>
    %c6 = arith.constant 6 : index
    %c0_44 = arith.constant 0 : index
    %c0_45 = arith.constant 0 : index
    %87 = vector.load %arg2[%c6, %c0_44, %c0_45] : memref<9x32x32xbf16, #tpu.memory_space<vmem>>, vector<1x32x32xbf16>
    %88 = vector.shape_cast %87 : vector<1x32x32xbf16> to vector<32x32xbf16>
    %cst_46 = arith.constant dense<0.000000e+00> : vector<64x32xf32>
    %89 = tpu.matmul %86, %88, %cst_46 {dimension_numbers = #tpu.dot_dimension_numbers<[1], [0], [0], [1], [0, 0, 1, 1], [], []>} : vector<64x32xbf16>, vector<32x32xbf16>, vector<64x32xf32> -> vector<64x32xf32>
    %90 = arith.addf %79, %89 : vector<64x32xf32>
    %c0_47 = arith.constant 0 : index
    %c17 = arith.constant 17 : index
    %c0_48 = arith.constant 0 : index
    %91 = vector.load %arg1[%c0_47, %c17, %c0_48] : memref<1x82x32xf32, #tpu.memory_space<vmem>>, vector<1x64x32xf32>
    %92 = vector.shape_cast %91 : vector<1x64x32xf32> to vector<64x32xf32>
    %93 = arith.truncf %92 : vector<64x32xf32> to vector<64x32xbf16>
    %c7 = arith.constant 7 : index
    %c0_49 = arith.constant 0 : index
    %c0_50 = arith.constant 0 : index
    %94 = vector.load %arg2[%c7, %c0_49, %c0_50] : memref<9x32x32xbf16, #tpu.memory_space<vmem>>, vector<1x32x32xbf16>
    %95 = vector.shape_cast %94 : vector<1x32x32xbf16> to vector<32x32xbf16>
    %cst_51 = arith.constant dense<0.000000e+00> : vector<64x32xf32>
    %96 = tpu.matmul %93, %95, %cst_51 {dimension_numbers = #tpu.dot_dimension_numbers<[1], [0], [0], [1], [0, 0, 1, 1], [], []>} : vector<64x32xbf16>, vector<32x32xbf16>, vector<64x32xf32> -> vector<64x32xf32>
    %97 = arith.addf %90, %96 : vector<64x32xf32>
    %c0_52 = arith.constant 0 : index
    %c18 = arith.constant 18 : index
    %c0_53 = arith.constant 0 : index
    %98 = vector.load %arg1[%c0_52, %c18, %c0_53] : memref<1x82x32xf32, #tpu.memory_space<vmem>>, vector<1x64x32xf32>
    %99 = vector.shape_cast %98 : vector<1x64x32xf32> to vector<64x32xf32>
    %cst_54 = arith.constant 0.000000e+00 : f32
    %100 = vector.shape_cast %20 : vector<64x1xi1> to vector<64x1xi1>
    %101 = vector.broadcast %100 : vector<64x1xi1> to vector<64x32xi1>
    %102 = vector.broadcast %cst_54 : f32 to vector<64x32xf32>
    %103 = arith.select %101, %99, %102 : vector<64x32xi1>, vector<64x32xf32>
    %104 = arith.truncf %103 : vector<64x32xf32> to vector<64x32xbf16>
    %c8_55 = arith.constant 8 : index
    %c0_56 = arith.constant 0 : index
    %c0_57 = arith.constant 0 : index
    %105 = vector.load %arg2[%c8_55, %c0_56, %c0_57] : memref<9x32x32xbf16, #tpu.memory_space<vmem>>, vector<1x32x32xbf16>
    %106 = vector.shape_cast %105 : vector<1x32x32xbf16> to vector<32x32xbf16>
    %cst_58 = arith.constant dense<0.000000e+00> : vector<64x32xf32>
    %107 = tpu.matmul %104, %106, %cst_58 {dimension_numbers = #tpu.dot_dimension_numbers<[1], [0], [0], [1], [0, 0, 1, 1], [], []>} : vector<64x32xbf16>, vector<32x32xbf16>, vector<64x32xf32> -> vector<64x32xf32>
    %108 = arith.addf %97, %107 : vector<64x32xf32>
    %c0_59 = arith.constant 0 : index
    %c0_60 = arith.constant 0 : index
    %109 = vector.load %arg3[%c0_59, %c0_60] : memref<1x32xf32, #tpu.memory_space<vmem>>, vector<1x32xf32>
    %110 = vector.broadcast %109 : vector<1x32xf32> to vector<64x32xf32>
    %111 = arith.addf %108, %110 : vector<64x32xf32>
    %cst_61 = arith.constant 0.000000e+00 : f32
    %112 = vector.broadcast %cst_61 : f32 to vector<64x32xf32>
    %113 = arith.cmpf oge, %111, %112 : vector<64x32xf32>
    %c0_62 = arith.constant 0 : index
    %c0_63 = arith.constant 0 : index
    %114 = vector.load %arg4[%c0_62, %c0_63] : memref<1x32xf32, #tpu.memory_space<vmem>>, vector<1x32xf32>
    %115 = vector.broadcast %114 : vector<1x32xf32> to vector<64x32xf32>
    %116 = arith.mulf %115, %111 : vector<64x32xf32>
    %117 = arith.select %113, %111, %116 : vector<64x32xi1>, vector<64x32xf32>
    %c0_64 = arith.constant 0 : index
    %c0_65 = arith.constant 0 : index
    %c0_66 = arith.constant 0 : index
    %118 = vector.load %arg5[%c0_64, %c0_65, %c0_66] : memref<1x64x32xf32, #tpu.memory_space<vmem>>, vector<1x64x32xf32>
    %119 = vector.shape_cast %118 : vector<1x64x32xf32> to vector<64x32xf32>
    %120 = vector.shape_cast %117 : vector<64x32xf32> to vector<1x64x32xf32>
    tpu.vector_store %arg5[%c0_64, %c0_65, %c0_66], %120 {strides = array<i32>} : memref<1x64x32xf32, #tpu.memory_space<vmem>>, vector<1x64x32xf32>,
    return
  }
  func.func @transform_0(%arg0: i32) -> (i32, i32, i32) {
    %c0_i32 = arith.constant 0 : i32
    %c0_i32_0 = arith.constant 0 : i32
    %c0_i32_1 = arith.constant 0 : i32
    return %arg0, %c0_i32, %c0_i32_0 : i32, i32, i32
  }
  func.func @transform_1(%arg0: i32) -> (i32, i32, i32) {
    %c0_i32 = arith.constant 0 : i32
    %c0_i32_0 = arith.constant 0 : i32
    %c0_i32_1 = arith.constant 0 : i32
    %c0_i32_2 = arith.constant 0 : i32
    return %c0_i32, %c0_i32_0, %c0_i32_1 : i32, i32, i32
  }
  func.func @transform_2(%arg0: i32) -> (i32, i32) {
    %c0_i32 = arith.constant 0 : i32
    %c0_i32_0 = arith.constant 0 : i32
    %c0_i32_1 = arith.constant 0 : i32
    return %c0_i32, %c0_i32_0 : i32, i32
  }
  func.func @transform_3(%arg0: i32) -> (i32, i32) {
    %c0_i32 = arith.constant 0 : i32
    %c0_i32_0 = arith.constant 0 : i32
    %c0_i32_1 = arith.constant 0 : i32
    return %c0_i32, %c0_i32_0 : i32, i32
  }
  func.func @transform_4(%arg0: i32) -> (i32, i32, i32) {
    %c0_i32 = arith.constant 0 : i32
    %c0_i32_0 = arith.constant 0 : i32
    %c0_i32_1 = arith.constant 0 : i32
    return %arg0, %c0_i32, %c0_i32_0 : i32, i32, i32
  }
}

module attributes {stable_mosaic.version = 11 : i64} {
  func.func @kernel(%arg0: i32, %arg1: memref<1x82x64xf32, #tpu.memory_space<vmem>>, %arg2: memref<9x64x64xbf16, #tpu.memory_space<vmem>>, %arg3: memref<1x64xf32, #tpu.memory_space<vmem>>, %arg4: memref<1x64xf32, #tpu.memory_space<vmem>>, %arg5: memref<1x64x64xf32, #tpu.memory_space<vmem>>, %arg6: memref<1x64x64xf32, #tpu.memory_space<vmem>>) attributes {dimension_semantics = [#tpu.dimension_semantics<parallel>], iteration_bounds = array<i64: 4>, scalar_prefetch = 0 : i64, scratch_operands = 0 : i64, tpu.core_type = #tpu.core_type<tc>, window_params = [{transform_indices = @transform_0, window_bounds = array<i64: 1, 82, 64>}, {pipeline_mode = #tpu.pipeline_mode<synchronous>, transform_indices = @transform_1, window_bounds = array<i64: 9, 64, 64>}, {pipeline_mode = #tpu.pipeline_mode<synchronous>, transform_indices = @transform_2, window_bounds = array<i64: 1, 64>}, {pipeline_mode = #tpu.pipeline_mode<synchronous>, transform_indices = @transform_3, window_bounds = array<i64: 1, 64>}, {transform_indices = @transform_4, window_bounds = array<i64: 1, 64, 64>}, {transform_indices = @transform_5, window_bounds = array<i64: 1, 64, 64>}]} {
    %0 = tpu.iota {dimensions = array<i32: 0>} : vector<64x1xi32>
    %c8_i32 = arith.constant 8 : i32
    %c0_i32 = arith.constant 0 : i32
    %1 = arith.cmpi eq, %c8_i32, %c0_i32 : i32
    %c1_i32 = arith.constant 1 : i32
    %2 = arith.select %1, %c1_i32, %c8_i32 : i32
    %3 = vector.broadcast %2 : i32 to vector<64x1xi32>
    %4 = arith.remsi %0, %3 : vector<64x1xi32>
    %c0_i32_0 = arith.constant 0 : i32
    %5 = vector.broadcast %c0_i32_0 : i32 to vector<64x1xi32>
    %6 = arith.cmpi ne, %4, %5 : vector<64x1xi32>
    %c0_i32_1 = arith.constant 0 : i32
    %7 = vector.broadcast %c0_i32_1 : i32 to vector<64x1xi32>
    %8 = arith.cmpi slt, %4, %7 : vector<64x1xi32>
    %c0_i32_2 = arith.constant 0 : i32
    %9 = arith.cmpi slt, %2, %c0_i32_2 : i32
    %10 = vector.broadcast %9 : i1 to vector<64x1xi1>
    %11 = vector.broadcast %10 : vector<64x1xi1> to vector<64x1xi1>
    %12 = arith.xori %8, %11 : vector<64x1xi1>
    %13 = arith.andi %12, %6 : vector<64x1xi1>
    %14 = vector.broadcast %2 : i32 to vector<64x1xi32>
    %15 = arith.addi %4, %14 : vector<64x1xi32>
    %16 = arith.select %13, %15, %4 : vector<64x1xi1>, vector<64x1xi32>
    %c0_i32_3 = arith.constant 0 : i32
    %17 = vector.broadcast %c0_i32_3 : i32 to vector<64x1xi32>
    %18 = arith.cmpi sgt, %16, %17 : vector<64x1xi32>
    %c7_i32 = arith.constant 7 : i32
    %19 = vector.broadcast %c7_i32 : i32 to vector<64x1xi32>
    %20 = arith.cmpi slt, %16, %19 : vector<64x1xi32>
    %cst = arith.constant 0.000000e+00 : f32
    %21 = vector.broadcast %cst : f32 to vector<64x64xf32>
    %c0 = arith.constant 0 : index
    %c0_4 = arith.constant 0 : index
    %c0_5 = arith.constant 0 : index
    %22 = vector.load %arg1[%c0, %c0_4, %c0_5] : memref<1x82x64xf32, #tpu.memory_space<vmem>>, vector<1x64x64xf32>
    %23 = vector.shape_cast %22 : vector<1x64x64xf32> to vector<64x64xf32>
    %cst_6 = arith.constant 0.000000e+00 : f32
    %24 = vector.shape_cast %18 : vector<64x1xi1> to vector<64x1xi1>
    %25 = vector.broadcast %24 : vector<64x1xi1> to vector<64x64xi1>
    %26 = vector.broadcast %cst_6 : f32 to vector<64x64xf32>
    %27 = arith.select %25, %23, %26 : vector<64x64xi1>, vector<64x64xf32>
    %28 = arith.truncf %27 : vector<64x64xf32> to vector<64x64xbf16>
    %c0_7 = arith.constant 0 : index
    %c0_8 = arith.constant 0 : index
    %c0_9 = arith.constant 0 : index
    %29 = vector.load %arg2[%c0_7, %c0_8, %c0_9] : memref<9x64x64xbf16, #tpu.memory_space<vmem>>, vector<1x64x64xbf16>
    %30 = vector.shape_cast %29 : vector<1x64x64xbf16> to vector<64x64xbf16>
    %cst_10 = arith.constant dense<0.000000e+00> : vector<64x64xf32>
    %31 = tpu.matmul %28, %30, %cst_10 {dimension_numbers = #tpu.dot_dimension_numbers<[1], [0], [0], [1], [0, 0, 1, 1], [], []>} : vector<64x64xbf16>, vector<64x64xbf16>, vector<64x64xf32> -> vector<64x64xf32>
    %32 = arith.addf %21, %31 : vector<64x64xf32>
    %c0_11 = arith.constant 0 : index
    %c1 = arith.constant 1 : index
    %c0_12 = arith.constant 0 : index
    %33 = vector.load %arg1[%c0_11, %c1, %c0_12] : memref<1x82x64xf32, #tpu.memory_space<vmem>>, vector<1x64x64xf32>
    %34 = vector.shape_cast %33 : vector<1x64x64xf32> to vector<64x64xf32>
    %35 = arith.truncf %34 : vector<64x64xf32> to vector<64x64xbf16>
    %c1_13 = arith.constant 1 : index
    %c0_14 = arith.constant 0 : index
    %c0_15 = arith.constant 0 : index
    %36 = vector.load %arg2[%c1_13, %c0_14, %c0_15] : memref<9x64x64xbf16, #tpu.memory_space<vmem>>, vector<1x64x64xbf16>
    %37 = vector.shape_cast %36 : vector<1x64x64xbf16> to vector<64x64xbf16>
    %cst_16 = arith.constant dense<0.000000e+00> : vector<64x64xf32>
    %38 = tpu.matmul %35, %37, %cst_16 {dimension_numbers = #tpu.dot_dimension_numbers<[1], [0], [0], [1], [0, 0, 1, 1], [], []>} : vector<64x64xbf16>, vector<64x64xbf16>, vector<64x64xf32> -> vector<64x64xf32>
    %39 = arith.addf %32, %38 : vector<64x64xf32>
    %c0_17 = arith.constant 0 : index
    %c2 = arith.constant 2 : index
    %c0_18 = arith.constant 0 : index
    %40 = vector.load %arg1[%c0_17, %c2, %c0_18] : memref<1x82x64xf32, #tpu.memory_space<vmem>>, vector<1x64x64xf32>
    %41 = vector.shape_cast %40 : vector<1x64x64xf32> to vector<64x64xf32>
    %cst_19 = arith.constant 0.000000e+00 : f32
    %42 = vector.shape_cast %20 : vector<64x1xi1> to vector<64x1xi1>
    %43 = vector.broadcast %42 : vector<64x1xi1> to vector<64x64xi1>
    %44 = vector.broadcast %cst_19 : f32 to vector<64x64xf32>
    %45 = arith.select %43, %41, %44 : vector<64x64xi1>, vector<64x64xf32>
    %46 = arith.truncf %45 : vector<64x64xf32> to vector<64x64xbf16>
    %c2_20 = arith.constant 2 : index
    %c0_21 = arith.constant 0 : index
    %c0_22 = arith.constant 0 : index
    %47 = vector.load %arg2[%c2_20, %c0_21, %c0_22] : memref<9x64x64xbf16, #tpu.memory_space<vmem>>, vector<1x64x64xbf16>
    %48 = vector.shape_cast %47 : vector<1x64x64xbf16> to vector<64x64xbf16>
    %cst_23 = arith.constant dense<0.000000e+00> : vector<64x64xf32>
    %49 = tpu.matmul %46, %48, %cst_23 {dimension_numbers = #tpu.dot_dimension_numbers<[1], [0], [0], [1], [0, 0, 1, 1], [], []>} : vector<64x64xbf16>, vector<64x64xbf16>, vector<64x64xf32> -> vector<64x64xf32>
    %50 = arith.addf %39, %49 : vector<64x64xf32>
    %c0_24 = arith.constant 0 : index
    %c8 = arith.constant 8 : index
    %c0_25 = arith.constant 0 : index
    %51 = vector.load %arg1[%c0_24, %c8, %c0_25] : memref<1x82x64xf32, #tpu.memory_space<vmem>>, vector<1x64x64xf32>
    %52 = vector.shape_cast %51 : vector<1x64x64xf32> to vector<64x64xf32>
    %cst_26 = arith.constant 0.000000e+00 : f32
    %53 = vector.shape_cast %18 : vector<64x1xi1> to vector<64x1xi1>
    %54 = vector.broadcast %53 : vector<64x1xi1> to vector<64x64xi1>
    %55 = vector.broadcast %cst_26 : f32 to vector<64x64xf32>
    %56 = arith.select %54, %52, %55 : vector<64x64xi1>, vector<64x64xf32>
    %57 = arith.truncf %56 : vector<64x64xf32> to vector<64x64xbf16>
    %c3 = arith.constant 3 : index
    %c0_27 = arith.constant 0 : index
    %c0_28 = arith.constant 0 : index
    %58 = vector.load %arg2[%c3, %c0_27, %c0_28] : memref<9x64x64xbf16, #tpu.memory_space<vmem>>, vector<1x64x64xbf16>
    %59 = vector.shape_cast %58 : vector<1x64x64xbf16> to vector<64x64xbf16>
    %cst_29 = arith.constant dense<0.000000e+00> : vector<64x64xf32>
    %60 = tpu.matmul %57, %59, %cst_29 {dimension_numbers = #tpu.dot_dimension_numbers<[1], [0], [0], [1], [0, 0, 1, 1], [], []>} : vector<64x64xbf16>, vector<64x64xbf16>, vector<64x64xf32> -> vector<64x64xf32>
    %61 = arith.addf %50, %60 : vector<64x64xf32>
    %c0_30 = arith.constant 0 : index
    %c9 = arith.constant 9 : index
    %c0_31 = arith.constant 0 : index
    %62 = vector.load %arg1[%c0_30, %c9, %c0_31] : memref<1x82x64xf32, #tpu.memory_space<vmem>>, vector<1x64x64xf32>
    %63 = vector.shape_cast %62 : vector<1x64x64xf32> to vector<64x64xf32>
    %64 = arith.truncf %63 : vector<64x64xf32> to vector<64x64xbf16>
    %c4 = arith.constant 4 : index
    %c0_32 = arith.constant 0 : index
    %c0_33 = arith.constant 0 : index
    %65 = vector.load %arg2[%c4, %c0_32, %c0_33] : memref<9x64x64xbf16, #tpu.memory_space<vmem>>, vector<1x64x64xbf16>
    %66 = vector.shape_cast %65 : vector<1x64x64xbf16> to vector<64x64xbf16>
    %cst_34 = arith.constant dense<0.000000e+00> : vector<64x64xf32>
    %67 = tpu.matmul %64, %66, %cst_34 {dimension_numbers = #tpu.dot_dimension_numbers<[1], [0], [0], [1], [0, 0, 1, 1], [], []>} : vector<64x64xbf16>, vector<64x64xbf16>, vector<64x64xf32> -> vector<64x64xf32>
    %68 = arith.addf %61, %67 : vector<64x64xf32>
    %c0_35 = arith.constant 0 : index
    %c10 = arith.constant 10 : index
    %c0_36 = arith.constant 0 : index
    %69 = vector.load %arg1[%c0_35, %c10, %c0_36] : memref<1x82x64xf32, #tpu.memory_space<vmem>>, vector<1x64x64xf32>
    %70 = vector.shape_cast %69 : vector<1x64x64xf32> to vector<64x64xf32>
    %cst_37 = arith.constant 0.000000e+00 : f32
    %71 = vector.shape_cast %20 : vector<64x1xi1> to vector<64x1xi1>
    %72 = vector.broadcast %71 : vector<64x1xi1> to vector<64x64xi1>
    %73 = vector.broadcast %cst_37 : f32 to vector<64x64xf32>
    %74 = arith.select %72, %70, %73 : vector<64x64xi1>, vector<64x64xf32>
    %75 = arith.truncf %74 : vector<64x64xf32> to vector<64x64xbf16>
    %c5 = arith.constant 5 : index
    %c0_38 = arith.constant 0 : index
    %c0_39 = arith.constant 0 : index
    %76 = vector.load %arg2[%c5, %c0_38, %c0_39] : memref<9x64x64xbf16, #tpu.memory_space<vmem>>, vector<1x64x64xbf16>
    %77 = vector.shape_cast %76 : vector<1x64x64xbf16> to vector<64x64xbf16>
    %cst_40 = arith.constant dense<0.000000e+00> : vector<64x64xf32>
    %78 = tpu.matmul %75, %77, %cst_40 {dimension_numbers = #tpu.dot_dimension_numbers<[1], [0], [0], [1], [0, 0, 1, 1], [], []>} : vector<64x64xbf16>, vector<64x64xbf16>, vector<64x64xf32> -> vector<64x64xf32>
    %79 = arith.addf %68, %78 : vector<64x64xf32>
    %c0_41 = arith.constant 0 : index
    %c16 = arith.constant 16 : index
    %c0_42 = arith.constant 0 : index
    %80 = vector.load %arg1[%c0_41, %c16, %c0_42] : memref<1x82x64xf32, #tpu.memory_space<vmem>>, vector<1x64x64xf32>
    %81 = vector.shape_cast %80 : vector<1x64x64xf32> to vector<64x64xf32>
    %cst_43 = arith.constant 0.000000e+00 : f32
    %82 = vector.shape_cast %18 : vector<64x1xi1> to vector<64x1xi1>
    %83 = vector.broadcast %82 : vector<64x1xi1> to vector<64x64xi1>
    %84 = vector.broadcast %cst_43 : f32 to vector<64x64xf32>
    %85 = arith.select %83, %81, %84 : vector<64x64xi1>, vector<64x64xf32>
    %86 = arith.truncf %85 : vector<64x64xf32> to vector<64x64xbf16>
    %c6 = arith.constant 6 : index
    %c0_44 = arith.constant 0 : index
    %c0_45 = arith.constant 0 : index
    %87 = vector.load %arg2[%c6, %c0_44, %c0_45] : memref<9x64x64xbf16, #tpu.memory_space<vmem>>, vector<1x64x64xbf16>
    %88 = vector.shape_cast %87 : vector<1x64x64xbf16> to vector<64x64xbf16>
    %cst_46 = arith.constant dense<0.000000e+00> : vector<64x64xf32>
    %89 = tpu.matmul %86, %88, %cst_46 {dimension_numbers = #tpu.dot_dimension_numbers<[1], [0], [0], [1], [0, 0, 1, 1], [], []>} : vector<64x64xbf16>, vector<64x64xbf16>, vector<64x64xf32> -> vector<64x64xf32>
    %90 = arith.addf %79, %89 : vector<64x64xf32>
    %c0_47 = arith.constant 0 : index
    %c17 = arith.constant 17 : index
    %c0_48 = arith.constant 0 : index
    %91 = vector.load %arg1[%c0_47, %c17, %c0_48] : memref<1x82x64xf32, #tpu.memory_space<vmem>>, vector<1x64x64xf32>
    %92 = vector.shape_cast %91 : vector<1x64x64xf32> to vector<64x64xf32>
    %93 = arith.truncf %92 : vector<64x64xf32> to vector<64x64xbf16>
    %c7 = arith.constant 7 : index
    %c0_49 = arith.constant 0 : index
    %c0_50 = arith.constant 0 : index
    %94 = vector.load %arg2[%c7, %c0_49, %c0_50] : memref<9x64x64xbf16, #tpu.memory_space<vmem>>, vector<1x64x64xbf16>
    %95 = vector.shape_cast %94 : vector<1x64x64xbf16> to vector<64x64xbf16>
    %cst_51 = arith.constant dense<0.000000e+00> : vector<64x64xf32>
    %96 = tpu.matmul %93, %95, %cst_51 {dimension_numbers = #tpu.dot_dimension_numbers<[1], [0], [0], [1], [0, 0, 1, 1], [], []>} : vector<64x64xbf16>, vector<64x64xbf16>, vector<64x64xf32> -> vector<64x64xf32>
    %97 = arith.addf %90, %96 : vector<64x64xf32>
    %c0_52 = arith.constant 0 : index
    %c18 = arith.constant 18 : index
    %c0_53 = arith.constant 0 : index
    %98 = vector.load %arg1[%c0_52, %c18, %c0_53] : memref<1x82x64xf32, #tpu.memory_space<vmem>>, vector<1x64x64xf32>
    %99 = vector.shape_cast %98 : vector<1x64x64xf32> to vector<64x64xf32>
    %cst_54 = arith.constant 0.000000e+00 : f32
    %100 = vector.shape_cast %20 : vector<64x1xi1> to vector<64x1xi1>
    %101 = vector.broadcast %100 : vector<64x1xi1> to vector<64x64xi1>
    %102 = vector.broadcast %cst_54 : f32 to vector<64x64xf32>
    %103 = arith.select %101, %99, %102 : vector<64x64xi1>, vector<64x64xf32>
    %104 = arith.truncf %103 : vector<64x64xf32> to vector<64x64xbf16>
    %c8_55 = arith.constant 8 : index
    %c0_56 = arith.constant 0 : index
    %c0_57 = arith.constant 0 : index
    %105 = vector.load %arg2[%c8_55, %c0_56, %c0_57] : memref<9x64x64xbf16, #tpu.memory_space<vmem>>, vector<1x64x64xbf16>
    %106 = vector.shape_cast %105 : vector<1x64x64xbf16> to vector<64x64xbf16>
    %cst_58 = arith.constant dense<0.000000e+00> : vector<64x64xf32>
    %107 = tpu.matmul %104, %106, %cst_58 {dimension_numbers = #tpu.dot_dimension_numbers<[1], [0], [0], [1], [0, 0, 1, 1], [], []>} : vector<64x64xbf16>, vector<64x64xbf16>, vector<64x64xf32> -> vector<64x64xf32>
    %108 = arith.addf %97, %107 : vector<64x64xf32>
    %c0_59 = arith.constant 0 : index
    %c0_60 = arith.constant 0 : index
    %109 = vector.load %arg3[%c0_59, %c0_60] : memref<1x64xf32, #tpu.memory_space<vmem>>, vector<1x64xf32>
    %110 = vector.broadcast %109 : vector<1x64xf32> to vector<64x64xf32>
    %111 = arith.addf %108, %110 : vector<64x64xf32>
    %c0_61 = arith.constant 0 : index
    %c0_62 = arith.constant 0 : index
    %c0_63 = arith.constant 0 : index
    %112 = vector.load %arg5[%c0_61, %c0_62, %c0_63] : memref<1x64x64xf32, #tpu.memory_space<vmem>>, vector<1x64x64xf32>
    %113 = vector.shape_cast %112 : vector<1x64x64xf32> to vector<64x64xf32>
    %114 = arith.addf %111, %113 : vector<64x64xf32>
    %cst_64 = arith.constant 0.000000e+00 : f32
    %115 = vector.broadcast %cst_64 : f32 to vector<64x64xf32>
    %116 = arith.cmpf oge, %114, %115 : vector<64x64xf32>
    %c0_65 = arith.constant 0 : index
    %c0_66 = arith.constant 0 : index
    %117 = vector.load %arg4[%c0_65, %c0_66] : memref<1x64xf32, #tpu.memory_space<vmem>>, vector<1x64xf32>
    %118 = vector.broadcast %117 : vector<1x64xf32> to vector<64x64xf32>
    %119 = arith.mulf %118, %114 : vector<64x64xf32>
    %120 = arith.select %116, %114, %119 : vector<64x64xi1>, vector<64x64xf32>
    %c0_67 = arith.constant 0 : index
    %c0_68 = arith.constant 0 : index
    %c0_69 = arith.constant 0 : index
    %121 = vector.load %arg6[%c0_67, %c0_68, %c0_69] : memref<1x64x64xf32, #tpu.memory_space<vmem>>, vector<1x64x64xf32>
    %122 = vector.shape_cast %121 : vector<1x64x64xf32> to vector<64x64xf32>
    %123 = vector.shape_cast %120 : vector<64x64xf32> to vector<1x64x64xf32>
    tpu.vector_store %arg6[%c0_67, %c0_68, %c0_69], %123 {strides = array<i32>} : memref<1x64x64xf32, #tpu.memory_space<vmem>>, vector<1x64x64xf32>,
    return
  }
  func.func @transform_0(%arg0: i32) -> (i32, i32, i32) {
    %c0_i32 = arith.constant 0 : i32
    %c0_i32_0 = arith.constant 0 : i32
    %c0_i32_1 = arith.constant 0 : i32
    return %arg0, %c0_i32, %c0_i32_0 : i32, i32, i32
  }
  func.func @transform_1(%arg0: i32) -> (i32, i32, i32) {
    %c0_i32 = arith.constant 0 : i32
    %c0_i32_0 = arith.constant 0 : i32
    %c0_i32_1 = arith.constant 0 : i32
    %c0_i32_2 = arith.constant 0 : i32
    return %c0_i32, %c0_i32_0, %c0_i32_1 : i32, i32, i32
  }
  func.func @transform_2(%arg0: i32) -> (i32, i32) {
    %c0_i32 = arith.constant 0 : i32
    %c0_i32_0 = arith.constant 0 : i32
    %c0_i32_1 = arith.constant 0 : i32
    return %c0_i32, %c0_i32_0 : i32, i32
  }
  func.func @transform_3(%arg0: i32) -> (i32, i32) {
    %c0_i32 = arith.constant 0 : i32
    %c0_i32_0 = arith.constant 0 : i32
    %c0_i32_1 = arith.constant 0 : i32
    return %c0_i32, %c0_i32_0 : i32, i32
  }
  func.func @transform_4(%arg0: i32) -> (i32, i32, i32) {
    %c0_i32 = arith.constant 0 : i32
    %c0_i32_0 = arith.constant 0 : i32
    %c0_i32_1 = arith.constant 0 : i32
    return %arg0, %c0_i32, %c0_i32_0 : i32, i32, i32
  }
  func.func @transform_5(%arg0: i32) -> (i32, i32, i32) {
    %c0_i32 = arith.constant 0 : i32
    %c0_i32_0 = arith.constant 0 : i32
    %c0_i32_1 = arith.constant 0 : i32
    return %arg0, %c0_i32, %c0_i32_0 : i32, i32, i32
  }
}

module attributes {stable_mosaic.version = 11 : i64} {
  func.func @kernel(%arg0: i32, %arg1: memref<1x82x64xf32, #tpu.memory_space<vmem>>, %arg2: memref<9x64x76xbf16, #tpu.memory_space<vmem>>, %arg3: memref<1x76xf32, #tpu.memory_space<vmem>>, %arg4: memref<1x64x76xf32, #tpu.memory_space<vmem>>) attributes {dimension_semantics = [#tpu.dimension_semantics<parallel>], iteration_bounds = array<i64: 4>, scalar_prefetch = 0 : i64, scratch_operands = 0 : i64, tpu.core_type = #tpu.core_type<tc>, window_params = [{transform_indices = @transform_0, window_bounds = array<i64: 1, 82, 64>}, {pipeline_mode = #tpu.pipeline_mode<synchronous>, transform_indices = @transform_1, window_bounds = array<i64: 9, 64, 76>}, {pipeline_mode = #tpu.pipeline_mode<synchronous>, transform_indices = @transform_2, window_bounds = array<i64: 1, 76>}, {transform_indices = @transform_3, window_bounds = array<i64: 1, 64, 76>}]} {
    %0 = tpu.iota {dimensions = array<i32: 0>} : vector<64x1xi32>
    %c8_i32 = arith.constant 8 : i32
    %c0_i32 = arith.constant 0 : i32
    %1 = arith.cmpi eq, %c8_i32, %c0_i32 : i32
    %c1_i32 = arith.constant 1 : i32
    %2 = arith.select %1, %c1_i32, %c8_i32 : i32
    %3 = vector.broadcast %2 : i32 to vector<64x1xi32>
    %4 = arith.remsi %0, %3 : vector<64x1xi32>
    %c0_i32_0 = arith.constant 0 : i32
    %5 = vector.broadcast %c0_i32_0 : i32 to vector<64x1xi32>
    %6 = arith.cmpi ne, %4, %5 : vector<64x1xi32>
    %c0_i32_1 = arith.constant 0 : i32
    %7 = vector.broadcast %c0_i32_1 : i32 to vector<64x1xi32>
    %8 = arith.cmpi slt, %4, %7 : vector<64x1xi32>
    %c0_i32_2 = arith.constant 0 : i32
    %9 = arith.cmpi slt, %2, %c0_i32_2 : i32
    %10 = vector.broadcast %9 : i1 to vector<64x1xi1>
    %11 = vector.broadcast %10 : vector<64x1xi1> to vector<64x1xi1>
    %12 = arith.xori %8, %11 : vector<64x1xi1>
    %13 = arith.andi %12, %6 : vector<64x1xi1>
    %14 = vector.broadcast %2 : i32 to vector<64x1xi32>
    %15 = arith.addi %4, %14 : vector<64x1xi32>
    %16 = arith.select %13, %15, %4 : vector<64x1xi1>, vector<64x1xi32>
    %c0_i32_3 = arith.constant 0 : i32
    %17 = vector.broadcast %c0_i32_3 : i32 to vector<64x1xi32>
    %18 = arith.cmpi sgt, %16, %17 : vector<64x1xi32>
    %c7_i32 = arith.constant 7 : i32
    %19 = vector.broadcast %c7_i32 : i32 to vector<64x1xi32>
    %20 = arith.cmpi slt, %16, %19 : vector<64x1xi32>
    %cst = arith.constant 0.000000e+00 : f32
    %21 = vector.broadcast %cst : f32 to vector<64x76xf32>
    %c0 = arith.constant 0 : index
    %c0_4 = arith.constant 0 : index
    %c0_5 = arith.constant 0 : index
    %22 = vector.load %arg1[%c0, %c0_4, %c0_5] : memref<1x82x64xf32, #tpu.memory_space<vmem>>, vector<1x64x64xf32>
    %23 = vector.shape_cast %22 : vector<1x64x64xf32> to vector<64x64xf32>
    %cst_6 = arith.constant 0.000000e+00 : f32
    %24 = vector.shape_cast %18 : vector<64x1xi1> to vector<64x1xi1>
    %25 = vector.broadcast %24 : vector<64x1xi1> to vector<64x64xi1>
    %26 = vector.broadcast %cst_6 : f32 to vector<64x64xf32>
    %27 = arith.select %25, %23, %26 : vector<64x64xi1>, vector<64x64xf32>
    %28 = arith.truncf %27 : vector<64x64xf32> to vector<64x64xbf16>
    %c0_7 = arith.constant 0 : index
    %c0_8 = arith.constant 0 : index
    %c0_9 = arith.constant 0 : index
    %29 = vector.load %arg2[%c0_7, %c0_8, %c0_9] : memref<9x64x76xbf16, #tpu.memory_space<vmem>>, vector<1x64x76xbf16>
    %30 = vector.shape_cast %29 : vector<1x64x76xbf16> to vector<64x76xbf16>
    %cst_10 = arith.constant dense<0.000000e+00> : vector<64x76xf32>
    %31 = tpu.matmul %28, %30, %cst_10 {dimension_numbers = #tpu.dot_dimension_numbers<[1], [0], [0], [1], [0, 0, 1, 1], [], []>} : vector<64x64xbf16>, vector<64x76xbf16>, vector<64x76xf32> -> vector<64x76xf32>
    %32 = arith.addf %21, %31 : vector<64x76xf32>
    %c0_11 = arith.constant 0 : index
    %c1 = arith.constant 1 : index
    %c0_12 = arith.constant 0 : index
    %33 = vector.load %arg1[%c0_11, %c1, %c0_12] : memref<1x82x64xf32, #tpu.memory_space<vmem>>, vector<1x64x64xf32>
    %34 = vector.shape_cast %33 : vector<1x64x64xf32> to vector<64x64xf32>
    %35 = arith.truncf %34 : vector<64x64xf32> to vector<64x64xbf16>
    %c1_13 = arith.constant 1 : index
    %c0_14 = arith.constant 0 : index
    %c0_15 = arith.constant 0 : index
    %36 = vector.load %arg2[%c1_13, %c0_14, %c0_15] : memref<9x64x76xbf16, #tpu.memory_space<vmem>>, vector<1x64x76xbf16>
    %37 = vector.shape_cast %36 : vector<1x64x76xbf16> to vector<64x76xbf16>
    %cst_16 = arith.constant dense<0.000000e+00> : vector<64x76xf32>
    %38 = tpu.matmul %35, %37, %cst_16 {dimension_numbers = #tpu.dot_dimension_numbers<[1], [0], [0], [1], [0, 0, 1, 1], [], []>} : vector<64x64xbf16>, vector<64x76xbf16>, vector<64x76xf32> -> vector<64x76xf32>
    %39 = arith.addf %32, %38 : vector<64x76xf32>
    %c0_17 = arith.constant 0 : index
    %c2 = arith.constant 2 : index
    %c0_18 = arith.constant 0 : index
    %40 = vector.load %arg1[%c0_17, %c2, %c0_18] : memref<1x82x64xf32, #tpu.memory_space<vmem>>, vector<1x64x64xf32>
    %41 = vector.shape_cast %40 : vector<1x64x64xf32> to vector<64x64xf32>
    %cst_19 = arith.constant 0.000000e+00 : f32
    %42 = vector.shape_cast %20 : vector<64x1xi1> to vector<64x1xi1>
    %43 = vector.broadcast %42 : vector<64x1xi1> to vector<64x64xi1>
    %44 = vector.broadcast %cst_19 : f32 to vector<64x64xf32>
    %45 = arith.select %43, %41, %44 : vector<64x64xi1>, vector<64x64xf32>
    %46 = arith.truncf %45 : vector<64x64xf32> to vector<64x64xbf16>
    %c2_20 = arith.constant 2 : index
    %c0_21 = arith.constant 0 : index
    %c0_22 = arith.constant 0 : index
    %47 = vector.load %arg2[%c2_20, %c0_21, %c0_22] : memref<9x64x76xbf16, #tpu.memory_space<vmem>>, vector<1x64x76xbf16>
    %48 = vector.shape_cast %47 : vector<1x64x76xbf16> to vector<64x76xbf16>
    %cst_23 = arith.constant dense<0.000000e+00> : vector<64x76xf32>
    %49 = tpu.matmul %46, %48, %cst_23 {dimension_numbers = #tpu.dot_dimension_numbers<[1], [0], [0], [1], [0, 0, 1, 1], [], []>} : vector<64x64xbf16>, vector<64x76xbf16>, vector<64x76xf32> -> vector<64x76xf32>
    %50 = arith.addf %39, %49 : vector<64x76xf32>
    %c0_24 = arith.constant 0 : index
    %c8 = arith.constant 8 : index
    %c0_25 = arith.constant 0 : index
    %51 = vector.load %arg1[%c0_24, %c8, %c0_25] : memref<1x82x64xf32, #tpu.memory_space<vmem>>, vector<1x64x64xf32>
    %52 = vector.shape_cast %51 : vector<1x64x64xf32> to vector<64x64xf32>
    %cst_26 = arith.constant 0.000000e+00 : f32
    %53 = vector.shape_cast %18 : vector<64x1xi1> to vector<64x1xi1>
    %54 = vector.broadcast %53 : vector<64x1xi1> to vector<64x64xi1>
    %55 = vector.broadcast %cst_26 : f32 to vector<64x64xf32>
    %56 = arith.select %54, %52, %55 : vector<64x64xi1>, vector<64x64xf32>
    %57 = arith.truncf %56 : vector<64x64xf32> to vector<64x64xbf16>
    %c3 = arith.constant 3 : index
    %c0_27 = arith.constant 0 : index
    %c0_28 = arith.constant 0 : index
    %58 = vector.load %arg2[%c3, %c0_27, %c0_28] : memref<9x64x76xbf16, #tpu.memory_space<vmem>>, vector<1x64x76xbf16>
    %59 = vector.shape_cast %58 : vector<1x64x76xbf16> to vector<64x76xbf16>
    %cst_29 = arith.constant dense<0.000000e+00> : vector<64x76xf32>
    %60 = tpu.matmul %57, %59, %cst_29 {dimension_numbers = #tpu.dot_dimension_numbers<[1], [0], [0], [1], [0, 0, 1, 1], [], []>} : vector<64x64xbf16>, vector<64x76xbf16>, vector<64x76xf32> -> vector<64x76xf32>
    %61 = arith.addf %50, %60 : vector<64x76xf32>
    %c0_30 = arith.constant 0 : index
    %c9 = arith.constant 9 : index
    %c0_31 = arith.constant 0 : index
    %62 = vector.load %arg1[%c0_30, %c9, %c0_31] : memref<1x82x64xf32, #tpu.memory_space<vmem>>, vector<1x64x64xf32>
    %63 = vector.shape_cast %62 : vector<1x64x64xf32> to vector<64x64xf32>
    %64 = arith.truncf %63 : vector<64x64xf32> to vector<64x64xbf16>
    %c4 = arith.constant 4 : index
    %c0_32 = arith.constant 0 : index
    %c0_33 = arith.constant 0 : index
    %65 = vector.load %arg2[%c4, %c0_32, %c0_33] : memref<9x64x76xbf16, #tpu.memory_space<vmem>>, vector<1x64x76xbf16>
    %66 = vector.shape_cast %65 : vector<1x64x76xbf16> to vector<64x76xbf16>
    %cst_34 = arith.constant dense<0.000000e+00> : vector<64x76xf32>
    %67 = tpu.matmul %64, %66, %cst_34 {dimension_numbers = #tpu.dot_dimension_numbers<[1], [0], [0], [1], [0, 0, 1, 1], [], []>} : vector<64x64xbf16>, vector<64x76xbf16>, vector<64x76xf32> -> vector<64x76xf32>
    %68 = arith.addf %61, %67 : vector<64x76xf32>
    %c0_35 = arith.constant 0 : index
    %c10 = arith.constant 10 : index
    %c0_36 = arith.constant 0 : index
    %69 = vector.load %arg1[%c0_35, %c10, %c0_36] : memref<1x82x64xf32, #tpu.memory_space<vmem>>, vector<1x64x64xf32>
    %70 = vector.shape_cast %69 : vector<1x64x64xf32> to vector<64x64xf32>
    %cst_37 = arith.constant 0.000000e+00 : f32
    %71 = vector.shape_cast %20 : vector<64x1xi1> to vector<64x1xi1>
    %72 = vector.broadcast %71 : vector<64x1xi1> to vector<64x64xi1>
    %73 = vector.broadcast %cst_37 : f32 to vector<64x64xf32>
    %74 = arith.select %72, %70, %73 : vector<64x64xi1>, vector<64x64xf32>
    %75 = arith.truncf %74 : vector<64x64xf32> to vector<64x64xbf16>
    %c5 = arith.constant 5 : index
    %c0_38 = arith.constant 0 : index
    %c0_39 = arith.constant 0 : index
    %76 = vector.load %arg2[%c5, %c0_38, %c0_39] : memref<9x64x76xbf16, #tpu.memory_space<vmem>>, vector<1x64x76xbf16>
    %77 = vector.shape_cast %76 : vector<1x64x76xbf16> to vector<64x76xbf16>
    %cst_40 = arith.constant dense<0.000000e+00> : vector<64x76xf32>
    %78 = tpu.matmul %75, %77, %cst_40 {dimension_numbers = #tpu.dot_dimension_numbers<[1], [0], [0], [1], [0, 0, 1, 1], [], []>} : vector<64x64xbf16>, vector<64x76xbf16>, vector<64x76xf32> -> vector<64x76xf32>
    %79 = arith.addf %68, %78 : vector<64x76xf32>
    %c0_41 = arith.constant 0 : index
    %c16 = arith.constant 16 : index
    %c0_42 = arith.constant 0 : index
    %80 = vector.load %arg1[%c0_41, %c16, %c0_42] : memref<1x82x64xf32, #tpu.memory_space<vmem>>, vector<1x64x64xf32>
    %81 = vector.shape_cast %80 : vector<1x64x64xf32> to vector<64x64xf32>
    %cst_43 = arith.constant 0.000000e+00 : f32
    %82 = vector.shape_cast %18 : vector<64x1xi1> to vector<64x1xi1>
    %83 = vector.broadcast %82 : vector<64x1xi1> to vector<64x64xi1>
    %84 = vector.broadcast %cst_43 : f32 to vector<64x64xf32>
    %85 = arith.select %83, %81, %84 : vector<64x64xi1>, vector<64x64xf32>
    %86 = arith.truncf %85 : vector<64x64xf32> to vector<64x64xbf16>
    %c6 = arith.constant 6 : index
    %c0_44 = arith.constant 0 : index
    %c0_45 = arith.constant 0 : index
    %87 = vector.load %arg2[%c6, %c0_44, %c0_45] : memref<9x64x76xbf16, #tpu.memory_space<vmem>>, vector<1x64x76xbf16>
    %88 = vector.shape_cast %87 : vector<1x64x76xbf16> to vector<64x76xbf16>
    %cst_46 = arith.constant dense<0.000000e+00> : vector<64x76xf32>
    %89 = tpu.matmul %86, %88, %cst_46 {dimension_numbers = #tpu.dot_dimension_numbers<[1], [0], [0], [1], [0, 0, 1, 1], [], []>} : vector<64x64xbf16>, vector<64x76xbf16>, vector<64x76xf32> -> vector<64x76xf32>
    %90 = arith.addf %79, %89 : vector<64x76xf32>
    %c0_47 = arith.constant 0 : index
    %c17 = arith.constant 17 : index
    %c0_48 = arith.constant 0 : index
    %91 = vector.load %arg1[%c0_47, %c17, %c0_48] : memref<1x82x64xf32, #tpu.memory_space<vmem>>, vector<1x64x64xf32>
    %92 = vector.shape_cast %91 : vector<1x64x64xf32> to vector<64x64xf32>
    %93 = arith.truncf %92 : vector<64x64xf32> to vector<64x64xbf16>
    %c7 = arith.constant 7 : index
    %c0_49 = arith.constant 0 : index
    %c0_50 = arith.constant 0 : index
    %94 = vector.load %arg2[%c7, %c0_49, %c0_50] : memref<9x64x76xbf16, #tpu.memory_space<vmem>>, vector<1x64x76xbf16>
    %95 = vector.shape_cast %94 : vector<1x64x76xbf16> to vector<64x76xbf16>
    %cst_51 = arith.constant dense<0.000000e+00> : vector<64x76xf32>
    %96 = tpu.matmul %93, %95, %cst_51 {dimension_numbers = #tpu.dot_dimension_numbers<[1], [0], [0], [1], [0, 0, 1, 1], [], []>} : vector<64x64xbf16>, vector<64x76xbf16>, vector<64x76xf32> -> vector<64x76xf32>
    %97 = arith.addf %90, %96 : vector<64x76xf32>
    %c0_52 = arith.constant 0 : index
    %c18 = arith.constant 18 : index
    %c0_53 = arith.constant 0 : index
    %98 = vector.load %arg1[%c0_52, %c18, %c0_53] : memref<1x82x64xf32, #tpu.memory_space<vmem>>, vector<1x64x64xf32>
    %99 = vector.shape_cast %98 : vector<1x64x64xf32> to vector<64x64xf32>
    %cst_54 = arith.constant 0.000000e+00 : f32
    %100 = vector.shape_cast %20 : vector<64x1xi1> to vector<64x1xi1>
    %101 = vector.broadcast %100 : vector<64x1xi1> to vector<64x64xi1>
    %102 = vector.broadcast %cst_54 : f32 to vector<64x64xf32>
    %103 = arith.select %101, %99, %102 : vector<64x64xi1>, vector<64x64xf32>
    %104 = arith.truncf %103 : vector<64x64xf32> to vector<64x64xbf16>
    %c8_55 = arith.constant 8 : index
    %c0_56 = arith.constant 0 : index
    %c0_57 = arith.constant 0 : index
    %105 = vector.load %arg2[%c8_55, %c0_56, %c0_57] : memref<9x64x76xbf16, #tpu.memory_space<vmem>>, vector<1x64x76xbf16>
    %106 = vector.shape_cast %105 : vector<1x64x76xbf16> to vector<64x76xbf16>
    %cst_58 = arith.constant dense<0.000000e+00> : vector<64x76xf32>
    %107 = tpu.matmul %104, %106, %cst_58 {dimension_numbers = #tpu.dot_dimension_numbers<[1], [0], [0], [1], [0, 0, 1, 1], [], []>} : vector<64x64xbf16>, vector<64x76xbf16>, vector<64x76xf32> -> vector<64x76xf32>
    %108 = arith.addf %97, %107 : vector<64x76xf32>
    %c0_59 = arith.constant 0 : index
    %c0_60 = arith.constant 0 : index
    %109 = vector.load %arg3[%c0_59, %c0_60] : memref<1x76xf32, #tpu.memory_space<vmem>>, vector<1x76xf32>
    %110 = vector.broadcast %109 : vector<1x76xf32> to vector<64x76xf32>
    %111 = arith.addf %108, %110 : vector<64x76xf32>
    %c0_61 = arith.constant 0 : index
    %c0_62 = arith.constant 0 : index
    %c0_63 = arith.constant 0 : index
    %112 = vector.load %arg4[%c0_61, %c0_62, %c0_63] : memref<1x64x76xf32, #tpu.memory_space<vmem>>, vector<1x64x76xf32>
    %113 = vector.shape_cast %112 : vector<1x64x76xf32> to vector<64x76xf32>
    %114 = vector.shape_cast %111 : vector<64x76xf32> to vector<1x64x76xf32>
    tpu.vector_store %arg4[%c0_61, %c0_62, %c0_63], %114 {strides = array<i32>} : memref<1x64x76xf32, #tpu.memory_space<vmem>>, vector<1x64x76xf32>,
    return
  }
  func.func @transform_0(%arg0: i32) -> (i32, i32, i32) {
    %c0_i32 = arith.constant 0 : i32
    %c0_i32_0 = arith.constant 0 : i32
    %c0_i32_1 = arith.constant 0 : i32
    return %arg0, %c0_i32, %c0_i32_0 : i32, i32, i32
  }
  func.func @transform_1(%arg0: i32) -> (i32, i32, i32) {
    %c0_i32 = arith.constant 0 : i32
    %c0_i32_0 = arith.constant 0 : i32
    %c0_i32_1 = arith.constant 0 : i32
    %c0_i32_2 = arith.constant 0 : i32
    return %c0_i32, %c0_i32_0, %c0_i32_1 : i32, i32, i32
  }
  func.func @transform_2(%arg0: i32) -> (i32, i32) {
    %c0_i32 = arith.constant 0 : i32
    %c0_i32_0 = arith.constant 0 : i32
    %c0_i32_1 = arith.constant 0 : i32
    return %c0_i32, %c0_i32_0 : i32, i32
  }
  func.func @transform_3(%arg0: i32) -> (i32, i32, i32) {
    %c0_i32 = arith.constant 0 : i32
    %c0_i32_0 = arith.constant 0 : i32
    %c0_i32_1 = arith.constant 0 : i32
    return %arg0, %c0_i32, %c0_i32_0 : i32, i32, i32
  }
}

</mosaic_0001>

<bundles_post_ra>
// kernel: tile.9
= control target key start
LH: loop header
LB: loop body
LE: loop exit
PB: predicated region body
PF: predicated region fallthrough
CT: control target
= control target key end

     0   :  { %vm8_vm0 = vcmask 154624   ;;  %s40_s8 = smov 19   ;;  %s41_s9 = smov 38   ;;  %vm14_vm1 = vcmask 622024   ;;  %vm20_vm2 = vcmask 466224   ;;  %vm26_vm3 = vcmask 310424   ;;  %s58_s0 = inlined_call_operand.vmem [shape: f32[4,19], index: 0, kind: input, shape index: {}]   ;;  %s59_s1 = inlined_call_operand.vmem [shape: f32[1,76], index: 1, kind: output, shape index: {}]  }
   0x1   :  { %v5_v0 = vld [vmem:[%s58_s0] sm:$0xf]  ;;  %s39_s0 = smov 57  }
   0x2   :  { %6 = vst [vmem:[#allocation1] sm:$0xf] %v5_v0 }
   0x9   :  { %v11_v1 = vld [vmem:[#allocation1 + $0x3] sm:$0x1]   ;;  %v23_v2 = vld [vmem:[#allocation1 + $0x1] sm:$0x1]   ;;  %v7_v3 = vld [vmem:[#allocation1] sm:$0x1]  }
   0xa   :  { %12 = vrot.lane.b32.xlu0 %v11_v1, %s39_s0  ;;  %24 = vrot.lane.b32.xlu1 %v23_v2, %s40_s8  ;;  %v17_v4 = vld [vmem:[#allocation1 + $0x2] sm:$0x1]   ;;  %9 = vst.msk [vmem:[#allocation0] sm:$0x1] %vm8_vm0, %v7_v3  }
   0xe   :  { %18 = vrot.lane.b32.xlu0 %v17_v4, %s41_s9 }
  0x7c   :  { %v13_v5 = vpop.permute.xlu0 %12   ;;  %v25_v6 = vpop.permute.xlu1 %24  }
  0x7d   :  { %15 = vst.msk [vmem:[#allocation0] sm:$0x1] %vm14_vm1, %v13_v5  }
  0x80   :  { %v19_v7 = vpop.permute.xlu0 %18  }
  0x81   :  { %21 = vst.msk [vmem:[#allocation0] sm:$0x1] %vm20_vm2, %v19_v7  }
  0x82   :  { %27 = vst.msk [vmem:[#allocation0] sm:$0x1] %vm26_vm3, %v25_v6  }
  0x89   :  { %v32_v8 = vld [vmem:[#allocation0] sm:$0x1] }
  0x8a   :  { %35 = vst [vmem:[%s59_s1] sm:$0x1] %v32_v8 }

// kernel: tile.8
= control target key start
LH: loop header
LB: loop body
LE: loop exit
PB: predicated region body
PF: predicated region fallthrough
CT: control target
= control target key end

     0   :  { %s22_s0 = inlined_call_operand.vmem [shape: f32[19], index: 0, kind: input, shape index: {}]   ;;  %s23_s1 = inlined_call_operand.vmem [shape: f32[4,19], index: 1, kind: output, shape index: {}]  }
   0x1   :  { %v4_v0 = vld [vmem:[%s22_s0] ss:$0 sm:$0xff] }
   0x2   :  { %5 = vst [vmem:[%s23_s1] sm:$0xf] %v4_v0 }

// kernel: decoder1v1_forward.7
= control target key start
LH: loop header
LB: loop body
LE: loop exit
PB: predicated region body
PF: predicated region fallthrough
CT: control target
= control target key end

     0   :  { %s2244_s15 = smov 0   ;;  %s2845_s0 = inlined_call_operand.vmem [shape: f32[4,82,72], index: 0, kind: input, shape index: {}]   ;;  %s2846_s1 = inlined_call_operand.vmem [shape: bf16[9,72,64], index: 1, kind: input, shape index: {}]   ;;  %s2847_s2 = inlined_call_operand.vmem [shape: f32[1,64], index: 2, kind: input, shape index: {}]   ;;  %s2848_s3 = inlined_call_operand.vmem [shape: f32[1,64], index: 3, kind: input, shape index: {}]   ;;  %s2849_s4 = inlined_call_operand.vmem [shape: f32[4,64,64], index: 4, kind: output, shape index: {}]  }
   0x1 LB: > { %s1728_s16 = sadd.s32 4294967295, %s2217_s15   ;;  %p1732_p0 = scmp.ge.s32.totalorder %s2217_s15, 1  ;;  %s2217_s15 = sphi %s2244_s15, %s14_s15  }
   0x2   : > { %p162_p1 = scmp.lt.s32.totalorder %s2217_s15, 5 }
   0x4   : > { %p163_p2 = pnand %p1732_p0, %p162_p1 }
   0x6   : > { %166 = sbr.rel (%p163_p2) target bundleno = 322 (0x142), region = 36 }
   0xb   : > { %v2166_v0 = vld [vmem:[%s2846_s1 + $0x44] ss:$0 sps:$4 sm:$0xff]   ;;  %vm2854_vm0 = vcmask 1043456   ;;  %v2168_v1 = vld [vmem:[%s2846_s1 + $0x3c] sm:$0xff]   ;;  %v2170_v6 = vld [vmem:[%s2846_s1 + $0x34] sm:$0xff]   ;;  %v199_v7 = vlaneseq  ;;  %p188_p3 = scmp.lt.s32.totalorder %s1728_s16, 3 }
   0xc   : > { %v2167_v2 = vld [vmem:[%s2846_s1 + $0x20] ss:$0 sps:$4 sm:$0xff]   ;;  %2147 = vmatprep.subr.msk.bf16.mxu0 %vm2854_vm0, %v2166_v0  ;;  %v429_v3 = vsel %vm2854_vm0, %v2166_v0, 0  ;;  %v2169_v4 = vld [vmem:[%s2846_s1 + $0x18] sm:$0xff]   ;;  %v2171_v8 = vld [vmem:[%s2846_s1 + $0x10] sm:$0xff]   ;;  %vm2850_vm1 = vcmask 588800  }
   0xd   : > { %2148 = vmatprep.subr.msk.bf16.mxu1 %vm2854_vm0, %v2167_v2  ;;  %1976 = vmatpush3.bf16.msra.mxu0 %v429_v3  ;;  %v536_v5 = vsel %vm2854_vm0, %v2167_v2, 0  ;;  %s2924_s16 = smov (!%p188_p3, %s1728_s16), 3  ;;  %v2172_v9 = vld [vmem:[%s2846_s1 + $0x2c] sm:$0xff]   ;;  %v2279_v10 = vshrl.u32 %v199_v7, 7  ;;  %v2174_v16 = vld [vmem:[%s2846_s1 + $0x24] sm:$0xff]   ;;  %v2862_v36 = vmov 0 }
   0xe   : > { %1994 = vmatpush3.bf16.msra.mxu1 %v536_v5  ;;  %1977 = vmatprep.subr.bf16.mxu0 %v2168_v1  ;;  %v2173_v11 = vld [vmem:[%s2846_s1 + $0x8] sm:$0xff]   ;;  %s2157_s7 = smul.u32 88, %s2924_s16  ;;  %v2175_v22 = vld [vmem:[%s2846_s1] sm:$0xff]   ;;  %v2180_v0 = vld [vmem:[%s2846_s1 + $0x58] sm:$0xff]   ;;  %v2868_v5 = vmov 0  ;;  %s1893_s19 = sshll.u32 %s2924_s16, 6 }
   0xf   : > { %1995 = vmatprep.subr.bf16.mxu1 %v2169_v4  ;;  %v2286_v12 = vadd.s32 8, %v2279_v10  ;;  %v212_v13 = vand.u32 7, %v2279_v10  ;;  %v2290_v14 = vadd.s32 16, %v2279_v10  ;;  %v2293_v15 = vadd.s32 24, %v2279_v10  ;;  %v2176_v37 = vld [vmem:[%s2846_s1 + $0x68] ss:$0 sps:$4 sm:$0xff]   ;;  %s2824_s23 = scalar_lea.vmem %s2849_s4, %s1893_s19 }
  0x10   : > { %s2301_s12 = scalar_lea.vmem %s2845_s0, %s2157_s7  ;;  %v2177_v40 = vld [vmem:[%s2846_s1 + $0x8c] ss:$0 sps:$4 sm:$0xff]   ;;  %v689_v46 = vsel %vm2854_vm0, %v2176_v37, 0  ;;  %v2178_v47 = vld [vmem:[%s2846_s1 + $0x60] sm:$0xff]   ;;  %v204_v54 = vadd.s32 32, %v2279_v10  ;;  %v2410_v55 = vadd.s32 40, %v2279_v10 }
  0x11   : > { %1978 = vmatpush3.bf16.msra.mxu0 %v2168_v1  ;;  %v365_v17 = vld [vmem:[%s2301_s12 + $0x1] sm:$0xff]  ;;  %v2305_v18 = vld [vmem:[%s2301_s12 + $0x9] sm:$0xff]  ;;  %v219_v19 = vand.u32 7, %v2286_v12  ;;  %vm2308_vm2 = vcmp.gt.s32.totalorder %v212_v13, 0  ;;  %v226_v26 = vand.u32 7, %v2290_v14  ;;  %v233_v27 = vand.u32 7, %v2293_v15 }
  0x12   : > { %1996 = vmatpush3.bf16.msra.mxu1 %v2169_v4  ;;  %1979 = vmatprep.subr.bf16.mxu0 %v2170_v6  ;;  %v320_v21 = vld [vmem:[%s2301_s12] sm:$0xff]  ;;  %v373_v23 = vpack.c.bf16 %v2305_v18, %v365_v17  ;;  %v2318_v24 = vld [vmem:[%s2301_s12 + $0x8] sm:$0xff]  ;;  %v2331_v29 = vld [vmem:[%s2301_s12 + $0x10] sm:$0xff]  ;;  %vm2378_vm6 = vcmp.lt.s32.totalorder %v212_v13, 7  ;;  %v834_v51 = vsel %vm2854_vm0, %v2177_v40, 0  ;;  %v2421_v58 = vadd.s32 48, %v2279_v10 }
  0x13   : > { %1997 = vmatprep.subr.bf16.mxu1 %v2171_v8  ;;  %v344_v25 = vsel %vm2308_vm2, %v320_v21, 0.0  ;;  %vm2326_vm3 = vcmp.gt.s32.totalorder %v219_v19, 0  ;;  %v2334_v30 = vld [vmem:[%s2301_s12 + $0x18] sm:$0xff]  ;;  %vm2348_vm4 = vcmp.gt.s32.totalorder %v226_v26, 0  ;;  %vm2354_vm5 = vcmp.gt.s32.totalorder %v233_v27, 0  ;;  %v2376_v43 = vld [vmem:[%s2301_s12 + $0x21] sm:$0xff] }
  0x14   : > { %1985 = vmatprep.mubr.msk.bf16.mxu0 %vm2850_vm1, %v373_v23  ;;  %v345_v31 = vsel %vm2326_vm3, %v2318_v24, 0.0  ;;  %v2341_v32 = vld [vmem:[%s2301_s12 + $0x11] sm:$0xff]  ;;  %v2344_v33 = vld [vmem:[%s2301_s12 + $0x19] sm:$0xff]  ;;  %v2863_v36 = vsel %vm2354_vm5, 4294967295, %v2862_v36  ;;  %v346_v38 = vsel %vm2348_vm4, %v2331_v29, 0.0  ;;  %v347_v39 = vsel %vm2354_vm5, %v2334_v30, 0.0 }
  0x15   : > { %1980 = vmatpush3.bf16.msra.mxu0 %v2170_v6  ;;  %v352_v34 = vpack.c.bf16 %v345_v31, %v344_v25  ;;  %v2373_v41 = vpack.c.bf16 %v2344_v33, %v2341_v32  ;;  %v353_v42 = vpack.c.bf16 %v347_v39, %v346_v38  ;;  %v772_v45 = vsel %vm2308_vm2, %v2318_v24, 0.0  ;;  %v2391_v48 = vld [vmem:[%s2301_s12 + $0x29] sm:$0xff]  ;;  %v2394_v49 = vld [vmem:[%s2301_s12 + $0x20] sm:$0xff]  ;;  %v2413_v56 = vld [vmem:[%s2301_s12 + $0x31] sm:$0xff] }
  0x16   : > { %1998 = vmatpush3.bf16.msra.mxu1 %v2171_v8  ;;  %1981 = vmatprep.subr.bf16.mxu0 %v2172_v9  ;;  %v2397_v50 = vld [vmem:[%s2301_s12 + $0x28] sm:$0xff]  ;;  %v2406_v53 = vpack.c.bf16 %v2391_v48, %v2376_v43  ;;  %v2416_v57 = vld [vmem:[%s2301_s12 + $0x39] sm:$0xff]  ;;  %v2424_v59 = vadd.s32 56, %v2279_v10  ;;  %v2427_v60 = vld [vmem:[%s2301_s12 + $0x30] sm:$0xff]  ;;  %v240_v61 = vand.u32 7, %v204_v54  ;;  %v247_v62 = vand.u32 7, %v2410_v55 }
  0x17   : > { %1999 = vmatprep.subr.bf16.mxu1 %v2173_v11  ;;  %2003 = vmatprep.mubr.msk.bf16.mxu1 %vm2850_vm1, %v352_v34  ;;  %v2179_v52 = vld [vmem:[%s2846_s1 + $0x84] sm:$0xff]   ;;  %v2432_v63 = vld [vmem:[%s2301_s12 + $0x38] sm:$0xff]  ;;  %v254_v1 = vand.u32 7, %v2421_v58  ;;  %v773_v3 = vsel %vm2326_vm3, %v2331_v29, 0.0  ;;  %v2866_v4 = vmov 0  ;;  %v2454_v6 = vpack.c.bf16 %v2416_v57, %v2413_v56  ;;  %v2182_v23 = vld [vmem:[%s2846_s1 + $0x50] sm:$0xff]  }
  0x18   : > { %v261_v2 = vand.u32 7, %v2424_v59  ;;  %vm2444_vm7 = vcmp.gt.s32.totalorder %v240_v61, 0  ;;  %vm2448_vm8 = vcmp.gt.s32.totalorder %v247_v62, 0  ;;  %v2181_v7 = vld [vmem:[%s2846_s1 + $0x7c] sm:$0xff]   ;;  %vm2485_vm11 = vcmp.lt.s32.totalorder %v219_v19, 7  ;;  %v2493_v24 = vld [vmem:[%s2301_s12 + $0x12] sm:$0xff] }
  0x19   : > { %1982 = vmatpush3.bf16.msra.mxu0 %v2172_v9  ;;  %v2867_v4 = vsel %vm2444_vm7, 4294967295, %v2866_v4  ;;  %v2869_v5 = vsel %vm2448_vm8, 4294967295, %v2868_v5  ;;  %v348_v8 = vsel %vm2444_vm7, %v2394_v49, 0.0  ;;  %v349_v9 = vsel %vm2448_vm8, %v2397_v50, 0.0  ;;  %v2183_v12 = vld [vmem:[%s2846_s1 + $0x74] sm:$0xff]   ;;  %v603_v19 = vld [vmem:[%s2301_s12 + $0x2] sm:$0xff] }
  0x1a   : > { %2000 = vmatpush3.bf16.msra.mxu1 %v2173_v11  ;;  %1983 = vmatprep.subr.bf16.mxu0 %v2174_v16  ;;  %vm2467_vm9 = vcmp.gt.s32.totalorder %v254_v1, 0  ;;  %vm2473_vm10 = vcmp.gt.s32.totalorder %v261_v2, 0  ;;  %v354_v13 = vpack.c.bf16 %v349_v9, %v348_v8  ;;  %v780_v25 = vpack.c.bf16 %v773_v3, %v772_v45  ;;  %v2507_v34 = vld [vmem:[%s2301_s12 + $0x1a] sm:$0xff]  ;;  %v2515_v38 = vld [vmem:[%s2301_s12 + $0xa] sm:$0xff] }
  0x1b   : > { %2001 = vmatprep.subr.bf16.mxu1 %v2175_v22  ;;  %v351_v17 = vsel %vm2473_vm10, %v2432_v63, 0.0  ;;  %vm2502_vm12 = vcmp.lt.s32.totalorder %v226_v26, 7  ;;  %v627_v39 = vsel %vm2378_vm6, %v603_v19, 0.0  ;;  %vm2521_vm13 = vcmp.lt.s32.totalorder %v233_v27, 7  ;;  %v2526_v26 = vld [vmem:[%s2301_s12 + $0x2a] sm:$0xff]  ;;  %v2602_v19 = vld [vmem:[%s2301_s12 + $0x3a] sm:$0xff] }
  0x1c   : > { %v2878_v14 = vmov 0  ;;  %vm2535_vm14 = vcmp.lt.s32.totalorder %v240_v61, 7  ;;  %v2186_v27 = vld [vmem:[%s2846_s1 + $0xb0] ss:$0 sps:$4 sm:$0xff]   ;;  %vm2546_vm15 = vcmp.lt.s32.totalorder %v247_v62, 7  ;;  %v774_v54 = vsel %vm2348_vm4, %v2334_v30, 0.0 }
  0x1d   : > { %1984 = vmatpush3.bf16.msra.mxu0 %v2174_v16  ;;  %v350_v16 = vsel %vm2467_vm9, %v2427_v60, 0.0  ;;  %v2879_v14 = vsel %vm2521_vm13, 4294967295, %v2878_v14  ;;  %v775_v55 = vsel %vm2354_vm5, %v2394_v49, 0.0  ;;  %v2187_v62 = vld [vmem:[%s2846_s1 + $0xd4] ss:$0 sps:$4 sm:$0xff]   ;;  %v632_v3 = vsel %vm2546_vm15, %v2526_v26, 0.0 }
  0x1e   : > { %2002 = vmatpush3.bf16.msra.mxu1 %v2175_v22  ;;  %2149 = vmatprep.subr.msk.bf16.mxu0 %vm2854_vm0, %v2176_v37  ;;  %v355_v22 = vpack.c.bf16 %v351_v17, %v350_v16  ;;  %v2510_v37 = vld [vmem:[%s2301_s12 + $0x22] sm:$0xff]  ;;  %v776_v9 = vsel %vm2444_vm7, %v2397_v50, 0.0  ;;  %v781_v16 = vpack.c.bf16 %v775_v55, %v774_v54  ;;  %v2189_v17 = vld [vmem:[%s2846_s1 + $0xcc] sm:$0xff]   ;;  %v1116_v58 = vsel %vm2854_vm0, %v2187_v62, 0  ;;  %v2192_v55 = vld [vmem:[%s2846_s1 + $0x98] sm:$0xff]  }
  0x1f   : > { %2150 = vmatprep.subr.msk.bf16.mxu1 %vm2854_vm0, %v2177_v40  ;;  %v2184_v40 = vld [vmem:[%s2846_s1 + $0x48] sm:$0xff]   ;;  %v631_v61 = vsel %vm2535_vm14, %v2510_v37, 0.0  ;;  %vm2888_vm7 = vcmask 588800   ;;  %v1055_v54 = vsel %vm2485_vm11, %v2493_v24, 0.0  ;;  %v1481_v10 = vsel %vm2378_vm6, %v2493_v24, 0.0 }
  0x20   : > { %1986 = vmatmul.mubr.msk.bf16.vlgmr.msra.gmra.mxu0 %vm2850_vm1, %v2373_v41  ;;  %v2188_v8 = vld [vmem:[%s2846_s1 + $0xa8] sm:$0xff]   ;;  %vm2889_vm5 = vmmov %vm2888_vm7  ;;  %v1482_v11 = vsel %vm2485_vm11, %v2507_v34, 0.0 }
  0x21   : > { %2004 = vmatmul.mubr.msk.bf16.vlgmr.msra.gmra.mxu1 %vm2850_vm1, %v353_v42  ;;  %2012 = vmatpush3.bf16.msra.mxu0 %v689_v46  ;;  %v628_v42 = vsel %vm2485_vm11, %v2515_v38, 0.0  ;;  %v2185_v46 = vld [vmem:[%s2846_s1 + $0x6c] sm:$0xff]   ;;  %v2203_v20 = vld [vmem:[%s2846_s1 + $0x104] sm:$0xff]   ;;  %v1489_v21 = vpack.c.bf16 %v1482_v11, %v1481_v10 }
  0x22   : > { %2030 = vmatpush3.bf16.msra.mxu1 %v834_v51  ;;  %2013 = vmatprep.subr.bf16.mxu0 %v2178_v47  ;;  %v635_v15 = vpack.c.bf16 %v628_v42, %v627_v39  ;;  %v629_v51 = vsel %vm2502_vm12, %v2493_v24, 0.0  ;;  %v778_v42 = vsel %vm2467_vm9, %v2432_v63, 0.0  ;;  %v2209_v44 = vld [vmem:[%s2846_s1 + $0x128] sm:$0xff]  }
  0x23   : > { %2031 = vmatprep.subr.bf16.mxu1 %v2179_v52  ;;  %1989 = vmatprep.mubr.msk.bf16.mxu0 %vm2850_vm1, %v2406_v53  ;;  %v1480_v45 = vld [vmem:[%s2301_s12 + $0x4a] sm:$0xff] }
  0x24   : > { %2007 = vmatprep.mubr.msk.bf16.mxu1 %vm2850_vm1, %v354_v13  ;;  %v777_v13 = vsel %vm2448_vm8, %v2427_v60, 0.0  ;;  %vm2597_vm8 = vcmp.lt.s32.totalorder %v261_v2, 7 }
  0x25   : > { %2014 = vmatpush3.bf16.msra.mxu0 %v2178_v47  ;;  %v782_v39 = vpack.c.bf16 %v777_v13, %v776_v9  ;;  %v634_v2 = vsel %vm2597_vm8, %v2602_v19, 0.0  ;;  %v918_v9 = vpack.c.bf16 %v2376_v43, %v2344_v33  ;;  %v2198_v33 = vld [vmem:[%s2846_s1 + $0xf0] sm:$0xff]   ;;  %v2681_v43 = vld [vmem:[%s2301_s12 + $0x42] sm:$0xff]  ;;  %v1483_v47 = vsel %vm2502_vm12, %v2510_v37, 0.0 }
  0x26   : > { %2032 = vmatpush3.bf16.msra.mxu1 %v2179_v52  ;;  %2015 = vmatprep.subr.bf16.mxu0 %v2180_v0  ;;  %v630_v52 = vsel %vm2521_vm13, %v2507_v34, 0.0 }
  0x27   : > { %2033 = vmatprep.subr.bf16.mxu1 %v2181_v7 }
  0x28   : > { %1990 = vmatmul.mubr.msk.bf16.gmra.mxu0 %vm2850_vm1, %v2454_v6 }
  0x29   : > { %2008 = vmatmul.mubr.msk.bf16.gmra.mxu1 %vm2850_vm1, %v355_v22  ;;  %2016 = vmatpush3.bf16.msra.mxu0 %v2180_v0  ;;  %v971_v0 = vsel %vm2854_vm0, %v2186_v27, 0 }
  0x2a   : > { %2034 = vmatpush3.bf16.msra.mxu1 %v2181_v7  ;;  %2017 = vmatprep.subr.bf16.mxu0 %v2182_v23  ;;  %v636_v7 = vpack.c.bf16 %v630_v52, %v629_v51  ;;  %v1054_v52 = vsel %vm2378_vm6, %v2515_v38, 0.0 }
  0x2b   : > { %2035 = vmatprep.subr.bf16.mxu1 %v2183_v12  ;;  %2039 = vmatprep.mubr.msk.bf16.mxu1 %vm2850_vm1, %v780_v25  ;;  %v2607_v25 = vld [vmem:[%s2301_s12 + $0x40] sm:$0xff]  ;;  %v1062_v38 = vpack.c.bf16 %v1055_v54, %v1054_v52 }
  0x2c   : > { %2021 = vmatprep.mubr.msk.bf16.mxu0 %vm2850_vm1, %v635_v15  ;;  %vm2587_vm1 = vcmp.lt.s32.totalorder %v254_v1, 7  ;;  %v637_v1 = vpack.c.bf16 %v632_v3, %v631_v61  ;;  %v779_v15 = vsel %vm2473_vm10, %v2607_v25, 0.0  ;;  %v2193_v61 = vld [vmem:[%s2846_s1 + $0xbc] sm:$0xff]   ;;  %v2195_v3 = vld [vmem:[%s2846_s1 + $0xb4] sm:$0xff]  }
  0x2d   : > { %2018 = vmatpush3.bf16.msra.mxu0 %v2182_v23  ;;  %v2592_v23 = vld [vmem:[%s2301_s12 + $0x32] sm:$0xff]  ;;  %v783_v51 = vpack.c.bf16 %v779_v15, %v778_v42  ;;  %v1060_v42 = vsel %vm2587_vm1, %v2602_v19, 0.0  ;;  %v1061_v15 = vsel %vm2597_vm8, %v2681_v43, 0.0  ;;  %v2202_v54 = vld [vmem:[%s2846_s1 + $0xe0] sm:$0xff]  }
  0x2e   : > { %2036 = vmatpush3.bf16.msra.mxu1 %v2183_v12  ;;  %2019 = vmatprep.subr.bf16.mxu0 %v2184_v40  ;;  %v633_v59 = vsel %vm2587_vm1, %v2592_v23, 0.0  ;;  %v1065_v52 = vpack.c.bf16 %v1061_v15, %v1060_v42 }
  0x2f   : > { %2037 = vmatprep.subr.bf16.mxu1 %v2185_v46 }
  0x31   : > { %2020 = vmatpush3.bf16.msra.mxu0 %v2184_v40  ;;  %v2190_v40 = vld [vmem:[%s2846_s1 + $0xa0] sm:$0xff]  }
  0x32   : > { %2038 = vmatpush3.bf16.msra.mxu1 %v2185_v46  ;;  %2151 = vmatprep.subr.msk.bf16.mxu0 %vm2854_vm0, %v2186_v27  ;;  %v2191_v27 = vld [vmem:[%s2846_s1 + $0xc4] sm:$0xff]   ;;  %v638_v46 = vpack.c.bf16 %v634_v2, %v633_v59  ;;  %v919_v59 = vpack.c.bf16 %v2413_v56, %v2391_v48  ;;  %v2201_v56 = vld [vmem:[%s2846_s1 + $0x10c] sm:$0xff]  }
  0x33   : > { %2152 = vmatprep.subr.msk.bf16.mxu1 %vm2854_vm0, %v2187_v62  ;;  %v917_v62 = vpack.c.bf16 %v2341_v32, %v2305_v18  ;;  %vm2892_vm0 = vmmov %vm2889_vm5  ;;  %v1056_v18 = vsel %vm2502_vm12, %v2507_v34, 0.0  ;;  %v1057_v32 = vsel %vm2521_vm13, %v2510_v37, 0.0  ;;  %v2200_v48 = vld [vmem:[%s2846_s1 + $0xe8] sm:$0xff]   ;;  %v2210_v34 = vld [vmem:[%s2846_s1 + $0x120] sm:$0xff]  }
  0x34   : > { %2022 = vmatmul.mubr.msk.bf16.vlgmr.msra.gmra.mxu0 %vm2888_vm7, %v636_v7  ;;  %vm2890_vm7 = vmmov %vm2889_vm5  ;;  %v2196_v7 = vld [vmem:[%s2846_s1 + $0xf8] ss:$0 sps:$4 sm:$0xff]   ;;  %v1063_v13 = vpack.c.bf16 %v1057_v32, %v1056_v18 }
  0x35   : > { %2040 = vmatmul.mubr.msk.bf16.vlgmr.msra.gmra.mxu1 %vm2889_vm5, %v781_v16  ;;  %2048 = vmatpush3.bf16.msra.mxu0 %v971_v0  ;;  %v2194_v0 = vld [vmem:[%s2846_s1 + $0x90] sm:$0xff]   ;;  %v1058_v16 = vsel %vm2535_vm14, %v2526_v26, 0.0 }
  0x36   : > { %2066 = vmatpush3.bf16.msra.mxu1 %v1116_v58  ;;  %2049 = vmatprep.subr.bf16.mxu0 %v2188_v8 }
  0x37   : > { %2067 = vmatprep.subr.bf16.mxu1 %v2189_v17  ;;  %2025 = vmatprep.mubr.msk.bf16.mxu0 %vm2889_vm5, %v637_v1 }
  0x38   : > { %2043 = vmatprep.mubr.msk.bf16.mxu1 %vm2890_vm7, %v782_v39  ;;  %vm2891_vm7 = vmmov %vm2889_vm5  ;;  %v2199_v39 = vld [vmem:[%s2846_s1 + $0x114] sm:$0xff]  }
  0x39   : > { %2050 = vmatpush3.bf16.msra.mxu0 %v2188_v8  ;;  %v2197_v8 = vld [vmem:[%s2846_s1 + $0x11c] ss:$0 sps:$4 sm:$0xff]  }
  0x3a   : > { %2068 = vmatpush3.bf16.msra.mxu1 %v2189_v17  ;;  %2051 = vmatprep.subr.bf16.mxu0 %v2190_v40  ;;  %v1059_v17 = vsel %vm2546_vm15, %v2592_v23, 0.0 }
  0x3b   : > { %2069 = vmatprep.subr.bf16.mxu1 %v2191_v27  ;;  %v1064_v2 = vpack.c.bf16 %v1059_v17, %v1058_v16 }
  0x3c   : > { %2026 = vmatmul.mubr.msk.bf16.gmra.mxu0 %vm2889_vm5, %v638_v46  ;;  %vm2893_vm5 = vmmov %vm2892_vm0  ;;  %v1200_v46 = vsel %vm2326_vm3, %v2334_v30, 0.0  ;;  %v2205_v30 = vld [vmem:[%s2846_s1 + $0xfc] sm:$0xff]  }
  0x3d   : > { %2044 = vmatmul.mubr.msk.bf16.gmra.mxu1 %vm2891_vm7, %v783_v51  ;;  %2052 = vmatpush3.bf16.msra.mxu0 %v2190_v40  ;;  %v2693_v40 = vld [vmem:[%s2301_s12 + $0x41] sm:$0xff] }
  0x3e   : > { %2070 = vmatpush3.bf16.msra.mxu1 %v2191_v27  ;;  %2053 = vmatprep.subr.bf16.mxu0 %v2192_v55  ;;  %v1199_v27 = vsel %vm2308_vm2, %v2331_v29, 0.0  ;;  %v920_v51 = vpack.c.bf16 %v2693_v40, %v2416_v57  ;;  %v2204_v29 = vld [vmem:[%s2846_s1 + $0xd8] sm:$0xff]   ;;  %v1201_v57 = vsel %vm2348_vm4, %v2394_v49, 0.0  ;;  %vm2907_vm4 = vnez %v2869_v5  ;;  %v1343_v5 = vld [vmem:[%s2301_s12 + $0x49] sm:$0xff] }
  0x3f   : > { %2071 = vmatprep.subr.bf16.mxu1 %v2193_v61  ;;  %2057 = vmatprep.mubr.msk.bf16.mxu0 %vm2892_vm0, %v917_v62  ;;  %vm2894_vm0 = vcmask 1043456   ;;  %v1207_v28 = vpack.c.bf16 %v1200_v46, %v1199_v27  ;;  %v1204_v35 = vsel %vm2907_vm4, %v2432_v63, 0.0  ;;  %v2207_v49 = vld [vmem:[%s2846_s1 + $0x138] sm:$0xff]  }
  0x40   : > { %2075 = vmatprep.mubr.msk.bf16.mxu1 %vm2893_vm5, %v1062_v38  ;;  %vm2895_vm7 = vmmov %vm2894_vm0  ;;  %v2208_v38 = vld [vmem:[%s2846_s1 + $0x130] sm:$0xff]  }
  0x41   : > { %2054 = vmatpush3.bf16.msra.mxu0 %v2192_v55  ;;  %v1261_v58 = vsel %vm2895_vm7, %v2196_v7, 0  ;;  %vm2896_vm5 = vmmov %vm2894_vm0 }
  0x42   : > { %2072 = vmatpush3.bf16.msra.mxu1 %v2193_v61  ;;  %2055 = vmatprep.subr.bf16.mxu0 %v2194_v0  ;;  %vm2897_vm13 = vmmov %vm2894_vm0  ;;  %v2206_v61 = vld [vmem:[%s2846_s1 + $0x140] ss:$0 sps:$4 sm:$0xff]  }
  0x43   : > { %2073 = vmatprep.subr.bf16.mxu1 %v2195_v3  ;;  %v1398_v1 = vsel %vm2897_vm13, %v2197_v8, 0 }
  0x45   : > { %2056 = vmatpush3.bf16.msra.mxu0 %v2194_v0  ;;  %v1485_v0 = vsel %vm2535_vm14, %v2592_v23, 0.0  ;;  %vm2918_vm14 = vnez %v2879_v14 }
  0x46   : > { %2074 = vmatpush3.bf16.msra.mxu1 %v2195_v3  ;;  %2153 = vmatprep.subr.msk.bf16.mxu0 %vm2894_vm0, %v2196_v7  ;;  %vm2898_vm0 = vcmask 588800   ;;  %v1484_v23 = vsel %vm2918_vm14, %v2526_v26, 0.0  ;;  %v1488_v3 = vsel %vm2597_vm8, %v1480_v45, 0.0 }
  0x47   : > { %2154 = vmatprep.subr.msk.bf16.mxu1 %vm2896_vm5, %v2197_v8  ;;  %vm2899_vm7 = vmmov %vm2898_vm0  ;;  %v1490_v18 = vpack.c.bf16 %v1484_v23, %v1483_v47 }
  0x48   : > { %2058 = vmatmul.mubr.msk.bf16.vlgmr.msra.gmra.mxu0 %vm2898_vm0, %v918_v9  ;;  %vm2900_vm13 = vmmov %vm2898_vm0 }
  0x49   : > { %2076 = vmatmul.mubr.msk.bf16.vlgmr.msra.gmra.mxu1 %vm2899_vm7, %v1063_v13  ;;  %2084 = vmatpush3.bf16.msra.mxu0 %v1261_v58  ;;  %vm2901_vm5 = vmmov %vm2898_vm0 }
  0x4a   : > { %2102 = vmatpush3.bf16.msra.mxu1 %v1398_v1  ;;  %2085 = vmatprep.subr.bf16.mxu0 %v2198_v33  ;;  %vm2902_vm2 = vmmov %vm2898_vm0 }
  0x4b   : > { %2103 = vmatprep.subr.bf16.mxu1 %v2199_v39  ;;  %2061 = vmatprep.mubr.msk.bf16.mxu0 %vm2900_vm13, %v919_v59  ;;  %vm2903_vm3 = vmmov %vm2898_vm0  ;;  %vm2905_vm13 = vnez %v2863_v36 }
  0x4c   : > { %2079 = vmatprep.mubr.msk.bf16.mxu1 %vm2901_vm5, %v1064_v2  ;;  %vm2904_vm7 = vmmov %vm2898_vm0  ;;  %v1202_v55 = vsel %vm2905_vm13, %v2397_v50, 0.0  ;;  %vm2906_vm5 = vnez %v2867_v4  ;;  %v1198_v50 = vld [vmem:[%s2301_s12 + $0x48] sm:$0xff] }
  0x4d   : > { %2086 = vmatpush3.bf16.msra.mxu0 %v2198_v33  ;;  %v1208_v62 = vpack.c.bf16 %v1202_v55, %v1201_v57  ;;  %vm2911_vm13 = vmmov %vm2904_vm7  ;;  %v1206_v63 = vsel %vm2473_vm10, %v1198_v50, 0.0 }
  0x4e   : > { %2104 = vmatpush3.bf16.msra.mxu1 %v2199_v39  ;;  %2087 = vmatprep.subr.bf16.mxu0 %v2200_v48 }
  0x4f   : > { %2105 = vmatprep.subr.bf16.mxu1 %v2201_v56 }
  0x50   : > { %2062 = vmatmul.mubr.msk.bf16.gmra.mxu0 %vm2902_vm2, %v920_v51  ;;  %vm2908_vm2 = vcmask 1043456  }
  0x51   : > { %2080 = vmatmul.mubr.msk.bf16.gmra.mxu1 %vm2903_vm3, %v1065_v52  ;;  %2088 = vmatpush3.bf16.msra.mxu0 %v2200_v48  ;;  %vm2909_vm3 = vmmov %vm2908_vm2 }
  0x52   : > { %2106 = vmatpush3.bf16.msra.mxu1 %v2201_v56  ;;  %2089 = vmatprep.subr.bf16.mxu0 %v2202_v54  ;;  %v1543_v36 = vsel %vm2909_vm3, %v2206_v61, 0 }
  0x53   : > { %2107 = vmatprep.subr.bf16.mxu1 %v2203_v20  ;;  %2093 = vmatprep.mubr.msk.bf16.mxu0 %vm2898_vm0, %v1207_v28  ;;  %vm2910_vm0 = vmmov %vm2908_vm2 }
  0x54   : > { %2111 = vmatprep.mubr.msk.bf16.mxu1 %vm2904_vm7, %v2373_v41  ;;  %v1203_v41 = vsel %vm2906_vm5, %v2427_v60, 0.0  ;;  %v1205_v60 = vsel %vm2467_vm9, %v2607_v25, 0.0  ;;  %vm2912_vm5 = vmmov %vm2904_vm7  ;;  %v1347_v25 = vpack.c.bf16 %v1343_v5, %v2693_v40 }
  0x55   : > { %2090 = vmatpush3.bf16.msra.mxu0 %v2202_v54  ;;  %v1209_v4 = vpack.c.bf16 %v1204_v35, %v1203_v41  ;;  %vm2913_vm4 = vmmov %vm2912_vm5 }
  0x56   : > { %2108 = vmatpush3.bf16.msra.mxu1 %v2203_v20  ;;  %2091 = vmatprep.subr.bf16.mxu0 %v2204_v29  ;;  %vm2914_vm6 = vmmov %vm2913_vm4 }
  0x57   : > { %2109 = vmatprep.subr.bf16.mxu1 %v2205_v30  ;;  %vm2915_vm9 = vmmov %vm2913_vm4 }
  0x58   : > { %vm2916_vm10 = vmmov %vm2913_vm4 }
  0x59   : > { %2092 = vmatpush3.bf16.msra.mxu0 %v2204_v29  ;;  %vm2917_vm11 = vmmov %vm2913_vm4 }
  0x5a   : > { %2110 = vmatpush3.bf16.msra.mxu1 %v2205_v30  ;;  %2155 = vmatprep.subr.msk.bf16.mxu0 %vm2908_vm2, %v2206_v61  ;;  %vm2919_vm12 = vmmov %vm2913_vm4 }
  0x5b   : > { %2156 = vmatprep.subr.msk.bf16.mxu1 %vm2910_vm0, %v2206_v61 }
  0x5c   : > { %2094 = vmatmul.mubr.msk.bf16.vlgmr.msra.gmra.mxu0 %vm2904_vm7, %v1208_v62 }
  0x5d   : > { %2112 = vmatmul.mubr.msk.bf16.vlgmr.msra.gmra.mxu1 %vm2911_vm13, %v2406_v53  ;;  %2120 = vmatpush3.bf16.msra.mxu0 %v1543_v36  ;;  %v1210_v53 = vpack.c.bf16 %v1206_v63, %v1205_v60 }
  0x5e   : > { %2142 = vmatpush3.bf16.msra.mxu1 %v1543_v36  ;;  %2121 = vmatprep.subr.bf16.mxu0 %v2207_v49 }
  0x5f   : > { %2138 = vmatprep.subr.bf16.mxu1 %v2207_v49  ;;  %2097 = vmatprep.mubr.msk.bf16.mxu0 %vm2912_vm5, %v1209_v4 }
  0x60   : > { %2115 = vmatprep.mubr.msk.bf16.mxu1 %vm2913_vm4, %v2454_v6  ;;  %v1486_v6 = vsel %vm2546_vm15, %v2602_v19, 0.0  ;;  %v1487_v19 = vsel %vm2587_vm1, %v2681_v43, 0.0  ;;  %vm2920_vm15 = vmmov %vm2913_vm4  ;;  %vm1664_vm1 = vcmask 523264  }
  0x61   : > { %2122 = vmatpush3.bf16.msra.mxu0 %v2207_v49  ;;  %v1491_v24 = vpack.c.bf16 %v1486_v6, %v1485_v0  ;;  %v1492_v32 = vpack.c.bf16 %v1488_v3, %v1487_v19 }
  0x62   : > { %2143 = vmatpush3.bf16.msra.mxu1 %v2207_v49  ;;  %2123 = vmatprep.subr.bf16.mxu0 %v2208_v38 }
  0x63   : > { %2139 = vmatprep.subr.bf16.mxu1 %v2208_v38 }
  0x64   : > { %2098 = vmatmul.mubr.msk.bf16.gmra.mxu0 %vm2914_vm6, %v1210_v53 }
  0x65   : > { %2116 = vmatmul.mubr.msk.bf16.gmra.mxu1 %vm2915_vm9, %v1347_v25  ;;  %2124 = vmatpush3.bf16.msra.mxu0 %v2208_v38 }
  0x66   : > { %2144 = vmatpush3.bf16.msra.mxu1 %v2208_v38  ;;  %2125 = vmatprep.subr.bf16.mxu0 %v2209_v44 }
  0x67   : > { %2140 = vmatprep.subr.bf16.mxu1 %v2209_v44  ;;  %2129 = vmatprep.mubr.msk.bf16.mxu0 %vm2916_vm10, %v1489_v21 }
  0x68   : > { %2133 = vmatprep.mubr.msk.bf16.mxu1 %vm2917_vm11, %v1491_v24 }
  0x69   : > { %2126 = vmatpush3.bf16.msra.mxu0 %v2209_v44 }
  0x6a   : > { %2145 = vmatpush3.bf16.msra.mxu1 %v2209_v44  ;;  %2127 = vmatprep.subr.bf16.mxu0 %v2210_v34 }
  0x6b   : > { %2141 = vmatprep.subr.bf16.mxu1 %v2210_v34 }
  0x6d   : > { %2128 = vmatpush3.bf16.msra.mxu0 %v2210_v34 }
  0x6e   : > { %2146 = vmatpush3.bf16.msra.mxu1 %v2210_v34 }
  0x70   : > { %2130 = vmatmul.mubr.msk.bf16.vlgmr.msra.gmra.mxu0 %vm2919_vm12, %v1490_v18 }
  0x71   : > { %2134 = vmatmul.mubr.msk.bf16.vlgmr.msra.gmra.mxu1 %vm2920_vm15, %v1492_v32 }
  0xe0   : > { %v1987_v31 = vpop.f32.mrf.mxu0 }
  0xe1   : > { %v2005_v37 = vpop.f32.mrf.mxu1 }
  0xe2   : > { %v465_v14 = vpop.f32.mrf.mxu0  ;;  %v581_v11 = vadd.f32 %v2005_v37, %v1987_v31 }
  0xe3   : > { %v572_v26 = vpop.f32.mrf.mxu1 }
  0xe4   : > { %v1988_v22 = vpop.f32.mrf.mxu0  ;;  %v573_v44 = vadd.f32 %v572_v26, %v465_v14 }
  0xe5   : > { %v2006_v7 = vpop.f32.mrf.mxu1 }
  0xe6   : > { %v468_v8 = vpop.f32.mrf.mxu0  ;;  %v584_v23 = vadd.f32 %v2006_v7, %v1988_v22 }
  0xe7   : > { %v575_v12 = vpop.f32.mrf.mxu1 }
  0xe8   : > { %v1991_v9 = vpop.f32.mrf.mxu0  ;;  %v576_v19 = vadd.f32 %v575_v12, %v468_v8 }
  0xe9   : > { %v2009_v13 = vpop.f32.mrf.mxu1 }
  0xea   : > { %v481_v16 = vpop.f32.mrf.mxu0  ;;  %v597_v0 = vadd.f32 %v2009_v13, %v1991_v9 }
  0xeb   : > { %v588_v17 = vpop.f32.mrf.mxu1 }
  0xec   : > { %v1992_v58 = vpop.f32.mrf.mxu0  ;;  %v589_v34 = vadd.f32 %v588_v17, %v481_v16 }
  0xed   : > { %v2010_v33 = vpop.f32.mrf.mxu1 }
  0xee   : > { %v484_v43 = vpop.f32.mrf.mxu0  ;;  %v600_v32 = vadd.f32 %v2010_v33, %v1992_v58 }
  0xef   : > { %v591_v1 = vpop.f32.mrf.mxu1 }
  0xf4   : > { %v2023_v39 = vpop.f32.mrf.mxu0 }
  0xf5   : > { %v2041_v59 = vpop.f32.mrf.mxu1  ;;  %v758_v21 = vadd.f32 %v2023_v39, %v581_v11 }
  0xf6   : > { %v725_v2 = vpop.f32.mrf.mxu0 }
  0xf7   : > { %v870_v40 = vpop.f32.mrf.mxu1  ;;  %v756_v3 = vadd.f32 %v725_v2, %v573_v44  ;;  %v903_v9 = vadd.f32 %v2041_v59, %v758_v21 }
  0xf8   : > { %v2024_v42 = vpop.f32.mrf.mxu0 }
  0xf9   : > { %v2042_v15 = vpop.f32.mrf.mxu1  ;;  %v759_v13 = vadd.f32 %v2024_v42, %v584_v23 }
  0xfa   : > { %v728_v48 = vpop.f32.mrf.mxu0 }
  0xfb   : > { %v873_v56 = vpop.f32.mrf.mxu1  ;;  %v757_v14 = vadd.f32 %v728_v48, %v576_v19  ;;  %v904_v2 = vadd.f32 %v2042_v15, %v759_v13 }
  0xfc   : > { %v2027_v27 = vpop.f32.mrf.mxu0 }
  0xfd   : > { %v2045_v46 = vpop.f32.mrf.mxu1  ;;  %v762_v45 = vadd.f32 %v2027_v27, %v597_v0  ;;  %v901_v0 = vadd.f32 %v870_v40, %v756_v3  ;;  %v902_v44 = vadd.f32 %v873_v56, %v757_v14 }
  0xfe   : > { %v741_v51 = vpop.f32.mrf.mxu0 }
  0xff   : > { %v886_v52 = vpop.f32.mrf.mxu1  ;;  %v760_v31 = vadd.f32 %v741_v51, %v589_v34  ;;  %v907_v11 = vadd.f32 %v2045_v46, %v762_v45 }
 0x100   : > { %v2028_v54 = vpop.f32.mrf.mxu0 }
 0x101   : > { %v2046_v20 = vpop.f32.mrf.mxu1  ;;  %v763_v39 = vadd.f32 %v2028_v54, %v600_v32  ;;  %v905_v22 = vadd.f32 %v886_v52, %v760_v31 }
 0x102   : > { %v744_v28 = vpop.f32.mrf.mxu0 }
 0x103   : > { %v889_v29 = vpop.f32.mrf.mxu1 }
 0x108   : > { %v2059_v30 = vpop.f32.mrf.mxu0 }
 0x109   : > { %v2077_v57 = vpop.f32.mrf.mxu1  ;;  %v1040_v27 = vadd.f32 %v2059_v30, %v903_v9 }
 0x10a   : > { %v1007_v55 = vpop.f32.mrf.mxu0 }
 0x10b   : > { %v1152_v61 = vpop.f32.mrf.mxu1  ;;  %v1038_v58 = vadd.f32 %v1007_v55, %v901_v0  ;;  %v1185_v42 = vadd.f32 %v2077_v57, %v1040_v27 }
 0x10c   : > { %v2060_v62 = vpop.f32.mrf.mxu0 }
 0x10d   : > { %v2808_v41 = vpop.f32.mrf.mxu1  ;;  %v1041_v48 = vadd.f32 %v2060_v62, %v904_v2  ;;  %v1183_v40 = vadd.f32 %v1152_v61, %v1038_v58 }
 0x10e   : > { %2921 = vst [vmem:[#allocation2_spill] sm:$0xff] %v2808_v41  ;;  %v1010_v35 = vpop.f32.mrf.mxu0  ;;  %v592_v41 = vadd.f32 %v591_v1, %v484_v43  ;;  %v908_v43 = vadd.f32 %v2046_v20, %v763_v39 }
 0x10f   : > { %v1155_v36 = vpop.f32.mrf.mxu1  ;;  %v1039_v51 = vadd.f32 %v1010_v35, %v902_v44 }
 0x110   : > { %v2063_v49 = vpop.f32.mrf.mxu0  ;;  %v761_v16 = vadd.f32 %v744_v28, %v592_v41 }
 0x111   : > { %v2081_v50 = vpop.f32.mrf.mxu1  ;;  %v1044_v8 = vadd.f32 %v2063_v49, %v907_v11  ;;  %v1184_v56 = vadd.f32 %v1155_v36, %v1039_v51 }
 0x112   : > { %v1023_v4 = vpop.f32.mrf.mxu0  ;;  %v906_v1 = vadd.f32 %v889_v29, %v761_v16 }
 0x113   : > { %v1168_v60 = vpop.f32.mrf.mxu1  ;;  %v1042_v59 = vadd.f32 %v1023_v4, %v905_v22  ;;  %v1189_v54 = vadd.f32 %v2081_v50, %v1044_v8 }
 0x114   : > { %v2064_v63 = vpop.f32.mrf.mxu0 }
 0x115   : > { %v2082_v5 = vpop.f32.mrf.mxu1  ;;  %v1045_v28 = vadd.f32 %v2064_v63, %v908_v43  ;;  %v1187_v52 = vadd.f32 %v1168_v60, %v1042_v59  ;;  %v2922_v34 = vld [vmem:[#allocation2_spill] sm:$0xff] }
 0x116   : > { %v1026_v38 = vpop.f32.mrf.mxu0  ;;  %v1186_v15 = vadd.f32 %v2922_v34, %v1041_v48  ;;  %v1889_v60 = vld [vmem:[%s2847_s2] ss:$0 sm:$0xff] }
 0x117   : > { %v1171_v53 = vpop.f32.mrf.mxu1  ;;  %v1043_v41 = vadd.f32 %v1026_v38, %v906_v1  ;;  %v1190_v20 = vadd.f32 %v2082_v5, %v1045_v28  ;;  %v1890_v5 = vld [vmem:[%s2848_s3] ss:$0 sm:$0xff] }
 0x119   : > { %v1188_v29 = vadd.f32 %v1171_v53, %v1043_v41 }
 0x11c   : > { %v2095_v10 = vpop.f32.mrf.mxu0 }
 0x11d   : > { %v2113_v25 = vpop.f32.mrf.mxu1  ;;  %v1330_v30 = vadd.f32 %v2095_v10, %v1185_v42 }
 0x11e   : > { %v1297_v6 = vpop.f32.mrf.mxu0 }
 0x11f   : > { %v1434_v24 = vpop.f32.mrf.mxu1  ;;  %v1328_v55 = vadd.f32 %v1297_v6, %v1183_v40  ;;  %v1467_v62 = vadd.f32 %v2113_v25, %v1330_v30 }
 0x120   : > { %v2096_v47 = vpop.f32.mrf.mxu0 }
 0x121   : > { %v2810_v18 = vpop.f32.mrf.mxu1  ;;  %v1331_v35 = vadd.f32 %v2096_v47, %v1186_v15  ;;  %v1465_v23 = vadd.f32 %v1434_v24, %v1328_v55 }
 0x122   : > { %v1300_v37 = vpop.f32.mrf.mxu0 }
 0x123   : > { %v1437_v26 = vpop.f32.mrf.mxu1  ;;  %v1329_v4 = vadd.f32 %v1300_v37, %v1184_v56  ;;  %v1468_v47 = vadd.f32 %v2810_v18, %v1331_v35 }
 0x124   : > { %v2099_v17 = vpop.f32.mrf.mxu0 }
 0x125   : > { %v2117_v7 = vpop.f32.mrf.mxu1  ;;  %v1334_v49 = vadd.f32 %v2099_v17, %v1189_v54  ;;  %v1466_v3 = vadd.f32 %v1437_v26, %v1329_v4 }
 0x126   : > { %v1313_v12 = vpop.f32.mrf.mxu0 }
 0x127   : > { %v1450_v33 = vpop.f32.mrf.mxu1  ;;  %v1332_v57 = vadd.f32 %v1313_v12, %v1187_v52  ;;  %v1471_v63 = vadd.f32 %v2117_v7, %v1334_v49 }
 0x128   : > { %v2100_v46 = vpop.f32.mrf.mxu0 }
 0x129   : > { %v2118_v21 = vpop.f32.mrf.mxu1  ;;  %v1335_v38 = vadd.f32 %v2100_v46, %v1190_v20  ;;  %v1469_v19 = vadd.f32 %v1450_v33, %v1332_v57 }
 0x12a   : > { %v1316_v45 = vpop.f32.mrf.mxu0 }
 0x12b   : > { %v1453_v50 = vpop.f32.mrf.mxu1  ;;  %v1333_v61 = vadd.f32 %v1316_v45, %v1188_v29  ;;  %v1472_v9 = vadd.f32 %v2118_v21, %v1335_v38 }
 0x12d   : > { %v1470_v13 = vadd.f32 %v1453_v50, %v1333_v61 }
 0x130   : > { %v2131_v10 = vpop.f32.mrf.mxu0 }
 0x131   : > { %v1612_v36 = vadd.f32 %v2131_v10, %v1467_v62  ;;  %v2135_v6 = vpop.f32.mrf.mxu1 }
 0x132   : > { %v1616_v53 = vadd.f32 %v2135_v6, %v1471_v63  ;;  %v1579_v25 = vpop.f32.mrf.mxu0 }
 0x133   : > { %v1627_v32 = vadd.f32 %v1889_v60, %v1612_v36  ;;  %v1610_v31 = vadd.f32 %v1579_v25, %v1465_v23  ;;  %v1595_v37 = vpop.f32.mrf.mxu1 }
 0x134   : > { %v1631_v24 = vadd.f32 %v1889_v60, %v1616_v53  ;;  %v1614_v14 = vadd.f32 %v1595_v37, %v1469_v19  ;;  %v2132_v11 = vpop.f32.mrf.mxu0 }
 0x135   : > { %vm1635_vm8 = vcmp.ge.f32.partialorder %v1627_v32, 0.0  ;;  %v1650_v39 = vmul.f32 %v1890_v5, %v1627_v32  ;;  %v1625_v16 = vadd.f32 %v1889_v60, %v1610_v31  ;;  %v1613_v17 = vadd.f32 %v2132_v11, %v1468_v47  ;;  %v2136_v18 = vpop.f32.mrf.mxu1 }
 0x136   : > { %vm1639_vm2 = vcmp.ge.f32.partialorder %v1631_v24, 0.0  ;;  %v1654_v26 = vmul.f32 %v1890_v5, %v1631_v24  ;;  %v1629_v0 = vadd.f32 %v1889_v60, %v1614_v14  ;;  %v1617_v27 = vadd.f32 %v2136_v18, %v1472_v9  ;;  %v1582_v7 = vpop.f32.mrf.mxu0 }
 0x137   : > { %v1658_v22 = vsel %vm1635_vm8, %v1627_v32, %v1650_v39  ;;  %vm1633_vm3 = vcmp.ge.f32.partialorder %v1625_v16, 0.0  ;;  %v1648_v8 = vmul.f32 %v1890_v5, %v1625_v16  ;;  %v1628_v12 = vadd.f32 %v1889_v60, %v1613_v17  ;;  %v1598_v2 = vpop.f32.mrf.mxu1 }
 0x138   : > { %1667 = vst.msk [vmem:[%s2824_s23 + $0x10] sm:$0xff] %vm1664_vm1, %v1658_v22  ;;  %v1662_v44 = vsel %vm1639_vm2, %v1631_v24, %v1654_v26  ;;  %vm1637_vm0 = vcmp.ge.f32.partialorder %v1629_v0, 0.0  ;;  %v1652_v58 = vmul.f32 %v1890_v5, %v1629_v0  ;;  %v1632_v33 = vadd.f32 %v1889_v60, %v1617_v27 }
 0x139   : > { %1671 = vst.msk [vmem:[%s2824_s23 + $0x30] sm:$0xff] %vm1664_vm1, %v1662_v44  ;;  %v1656_v43 = vsel %vm1633_vm3, %v1625_v16, %v1648_v8  ;;  %vm1636_vm7 = vcmp.ge.f32.partialorder %v1628_v12, 0.0  ;;  %v1651_v1 = vmul.f32 %v1890_v5, %v1628_v12  ;;  %v1611_v59 = vadd.f32 %v1582_v7, %v1466_v3 }
 0x13a   : > { %1665 = vst.msk [vmem:[%s2824_s23] sm:$0xff] %vm1664_vm1, %v1656_v43  ;;  %v1660_v42 = vsel %vm1637_vm0, %v1629_v0, %v1652_v58  ;;  %vm1640_vm13 = vcmp.ge.f32.partialorder %v1632_v33, 0.0  ;;  %v1655_v48 = vmul.f32 %v1890_v5, %v1632_v33  ;;  %v1615_v51 = vadd.f32 %v1598_v2, %v1470_v13 }
 0x13b   : > { %1669 = vst.msk [vmem:[%s2824_s23 + $0x20] sm:$0xff] %vm1664_vm1, %v1660_v42  ;;  %v1659_v46 = vsel %vm1636_vm7, %v1628_v12, %v1651_v1  ;;  %v1626_v54 = vadd.f32 %v1889_v60, %v1611_v59 }
 0x13c   : > { %1668 = vst.msk [vmem:[%s2824_s23 + $0x18] sm:$0xff] %vm1664_vm1, %v1659_v46  ;;  %v1663_v28 = vsel %vm1640_vm13, %v1632_v33, %v1655_v48  ;;  %v1630_v41 = vadd.f32 %v1889_v60, %v1615_v51 }
 0x13d   : > { %1672 = vst.msk [vmem:[%s2824_s23 + $0x38] sm:$0xff] %vm1664_vm1, %v1663_v28  ;;  %vm1634_vm5 = vcmp.ge.f32.partialorder %v1626_v54, 0.0  ;;  %v1649_v40 = vmul.f32 %v1890_v5, %v1626_v54 }
 0x13e   : > { %vm1638_vm4 = vcmp.ge.f32.partialorder %v1630_v41, 0.0  ;;  %v1653_v30 = vmul.f32 %v1890_v5, %v1630_v41 }
 0x13f   : > { %v1657_v21 = vsel %vm1634_vm5, %v1626_v54, %v1649_v40 }
 0x140   : > { %1666 = vst.msk [vmem:[%s2824_s23 + $0x8] sm:$0xff] %vm1664_vm1, %v1657_v21  ;;  %v1661_v52 = vsel %vm1638_vm4, %v1630_v41, %v1653_v30 }
 0x141   : > { %1670 = vst.msk [vmem:[%s2824_s23 + $0x28] sm:$0xff] %vm1664_vm1, %v1661_v52 }
 0x142 PF: > { %s14_s15 = sadd.s32 1, %s2217_s15  }
 0x143   : > { %p11_p4 = scmp.ge.s32.totalorder %s14_s15, 6  }
 0x145   :  { %13 = sbr.rel (!%p11_p4) target bundleno = 1 (0x1), region = 74 }

// kernel: decoder1v1_forward.8
= control target key start
LH: loop header
LB: loop body
LE: loop exit
PB: predicated region body
PF: predicated region fallthrough
CT: control target
= control target key end

     0   :  { %s2114_s15 = smov 0   ;;  %s2634_s0 = inlined_call_operand.vmem [shape: f32[4,82,64], index: 0, kind: input, shape index: {}]   ;;  %s2635_s1 = inlined_call_operand.vmem [shape: bf16[9,64,64], index: 1, kind: input, shape index: {}]   ;;  %s2636_s2 = inlined_call_operand.vmem [shape: f32[1,64], index: 2, kind: input, shape index: {}]   ;;  %s2637_s3 = inlined_call_operand.vmem [shape: f32[1,64], index: 3, kind: input, shape index: {}]   ;;  %s2638_s4 = inlined_call_operand.vmem [shape: f32[4,64,64], index: 4, kind: output, shape index: {}]  }
   0x1 LB: > { %s1663_s16 = sadd.s32 4294967295, %s2087_s15   ;;  %p1667_p0 = scmp.ge.s32.totalorder %s2087_s15, 1  ;;  %s2087_s15 = sphi %s2114_s15, %s14_s15  }
   0x2   : > { %p162_p1 = scmp.lt.s32.totalorder %s2087_s15, 5 }
   0x4   : > { %p163_p2 = pnand %p1667_p0, %p162_p1 }
   0x5   : > { %p188_p3 = scmp.lt.s32.totalorder (!%p163_p2), %s1663_s16, 3 }
   0x6   : > { %166 = sbr.rel (%p163_p2) target bundleno = 303 (0x12f), region = 36 }
   0xb   : > { %v2045_v0 = vld [vmem:[%s2635_s1 + $0x38] sm:$0xff]   ;;  %v199_v1 = vlaneseq  ;;  %v2047_v3 = vld [vmem:[%s2635_s1 + $0x30] sm:$0xff]   ;;  %s2709_s16 = smov (!%p188_p3, %s1663_s16), 3  ;;  %v2049_v6 = vld [vmem:[%s2635_s1 + $0x28] sm:$0xff]   ;;  %vm2639_vm0 = vcmask 523264   ;;  %v2649_v35 = vmov 0 }
   0xc   : > { %v2046_v2 = vld [vmem:[%s2635_s1 + $0x18] sm:$0xff]   ;;  %1884 = vmatprep.subr.bf16.mxu0 %v2045_v0  ;;  %v2048_v4 = vld [vmem:[%s2635_s1 + $0x10] sm:$0xff]   ;;  %s2036_s27 = smul.u32 88, %s2709_s16  ;;  %v2050_v7 = vld [vmem:[%s2635_s1 + $0x8] sm:$0xff]   ;;  %s1811_s24 = sshll.u32 %s2709_s16, 6 }
   0xd   : > { %1900 = vmatprep.subr.bf16.mxu1 %v2046_v2  ;;  %1885 = vmatpush3.bf16.msra.mxu0 %v2045_v0  ;;  %v2136_v5 = vshrl.u32 %v199_v1, 7  ;;  %v2051_v10 = vld [vmem:[%s2635_s1 + $0x20] sm:$0xff]   ;;  %v2053_v31 = vld [vmem:[%s2635_s1 + $0x58] sm:$0xff]   ;;  %v2055_v45 = vld [vmem:[%s2635_s1 + $0x50] sm:$0xff]   ;;  %s2613_s29 = scalar_lea.vmem %s2638_s4, %s1811_s24 }
   0xe   : > { %1901 = vmatpush3.bf16.msra.mxu1 %v2046_v2  ;;  %1886 = vmatprep.subr.bf16.mxu0 %v2047_v3  ;;  %s2149_s6 = scalar_lea.vmem %s2634_s0, %s2036_s27  ;;  %v2052_v17 = vld [vmem:[%s2635_s1] sm:$0xff]   ;;  %v2054_v39 = vld [vmem:[%s2635_s1 + $0x78] sm:$0xff]   ;;  %v2056_v53 = vld [vmem:[%s2635_s1 + $0x70] sm:$0xff]   ;;  %v2659_v2 = vmov 0 }
   0xf   : > { %1902 = vmatprep.subr.bf16.mxu1 %v2048_v4  ;;  %v201_v8 = vadd.s32 8, %v2136_v5  ;;  %v212_v9 = vand.u32 7, %v2136_v5  ;;  %v364_v12 = vld [vmem:[%s2149_s6 + $0x1] sm:$0xff]  ;;  %v2157_v13 = vld [vmem:[%s2149_s6 + $0x9] sm:$0xff]  ;;  %v202_v16 = vadd.s32 16, %v2136_v5  ;;  %v2183_v24 = vld [vmem:[%s2149_s6 + $0x11] sm:$0xff] }
  0x10   : > { %v320_v15 = vld [vmem:[%s2149_s6] sm:$0xff]  ;;  %v372_v18 = vpack.c.bf16 %v2157_v13, %v364_v12  ;;  %v2174_v20 = vld [vmem:[%s2149_s6 + $0x8] sm:$0xff]  ;;  %v203_v26 = vadd.s32 24, %v2136_v5  ;;  %v2190_v27 = vld [vmem:[%s2149_s6 + $0x10] sm:$0xff]  ;;  %v2208_v34 = vadd.s32 32, %v2136_v5  ;;  %v2228_v40 = vadd.s32 40, %v2136_v5 }
  0x11   : > { %1887 = vmatpush3.bf16.msra.mxu0 %v2047_v3  ;;  %v219_v11 = vand.u32 7, %v201_v8  ;;  %vm2159_vm1 = vcmp.gt.s32.totalorder %v212_v9, 0  ;;  %v2186_v25 = vld [vmem:[%s2149_s6 + $0x19] sm:$0xff]  ;;  %v226_v29 = vand.u32 7, %v202_v16  ;;  %vm2230_vm6 = vcmp.lt.s32.totalorder %v212_v9, 7  ;;  %v2266_v52 = vld [vmem:[%s2149_s6 + $0x28] sm:$0xff] }
  0x12   : > { %1903 = vmatpush3.bf16.msra.mxu1 %v2048_v4  ;;  %1888 = vmatprep.subr.bf16.mxu0 %v2049_v6  ;;  %v344_v21 = vsel %vm2159_vm1, %v320_v15, 0.0  ;;  %v2193_v28 = vld [vmem:[%s2149_s6 + $0x18] sm:$0xff]  ;;  %v233_v30 = vand.u32 7, %v203_v26  ;;  %v2201_v32 = vpack.c.bf16 %v2186_v25, %v2183_v24  ;;  %v750_v43 = vsel %vm2159_vm1, %v2174_v20, 0.0  ;;  %v2263_v51 = vld [vmem:[%s2149_s6 + $0x20] sm:$0xff]  ;;  %v2276_v55 = vld [vmem:[%s2149_s6 + $0x29] sm:$0xff] }
  0x13   : > { %1904 = vmatprep.subr.bf16.mxu1 %v2050_v7  ;;  %vm2169_vm2 = vcmp.gt.s32.totalorder %v219_v11, 0  ;;  %1892 = vmatprep.mubr.msk.bf16.mxu0 %vm2639_vm0, %v372_v18  ;;  %vm2203_vm3 = vcmp.gt.s32.totalorder %v226_v29, 0  ;;  %vm2214_vm5 = vcmp.lt.s32.totalorder %v226_v29, 7  ;;  %v2222_v38 = vld [vmem:[%s2149_s6 + $0x12] sm:$0xff]  ;;  %vm2234_vm7 = vcmp.lt.s32.totalorder %v219_v11, 7  ;;  %v2252_v48 = vld [vmem:[%s2149_s6 + $0x1a] sm:$0xff] }
  0x14   : > { %v345_v22 = vsel %vm2169_vm2, %v2174_v20, 0.0  ;;  %vm2210_vm4 = vcmp.gt.s32.totalorder %v233_v30, 0  ;;  %v346_v37 = vsel %vm2203_vm3, %v2190_v27, 0.0  ;;  %vm2247_vm8 = vcmp.lt.s32.totalorder %v233_v30, 7  ;;  %v2273_v54 = vld [vmem:[%s2149_s6 + $0x21] sm:$0xff]  ;;  %v2294_v62 = vld [vmem:[%s2149_s6 + $0x31] sm:$0xff] }
  0x15   : > { %1889 = vmatpush3.bf16.msra.mxu0 %v2049_v6  ;;  %v352_v23 = vpack.c.bf16 %v345_v22, %v344_v21  ;;  %v2650_v35 = vsel %vm2210_vm4, 4294967295, %v2649_v35  ;;  %v347_v44 = vsel %vm2210_vm4, %v2193_v28, 0.0  ;;  %v751_v49 = vsel %vm2169_vm2, %v2190_v27, 0.0  ;;  %v2297_v63 = vld [vmem:[%s2149_s6 + $0x39] sm:$0xff]  ;;  %v2301_v1 = vld [vmem:[%s2149_s6 + $0x30] sm:$0xff]  ;;  %v2331_v11 = vld [vmem:[%s2149_s6 + $0x22] sm:$0xff] }
  0x16   : > { %1905 = vmatpush3.bf16.msra.mxu1 %v2050_v7  ;;  %1890 = vmatprep.subr.bf16.mxu0 %v2051_v10  ;;  %v353_v47 = vpack.c.bf16 %v347_v44, %v346_v37  ;;  %v614_v50 = vsel %vm2214_vm5, %v2222_v38, 0.0  ;;  %v240_v56 = vand.u32 7, %v2208_v34  ;;  %v247_v57 = vand.u32 7, %v2228_v40  ;;  %v2313_v6 = vld [vmem:[%s2149_s6 + $0x38] sm:$0xff]  ;;  %v2058_v16 = vld [vmem:[%s2635_s1 + $0x68] sm:$0xff]   ;;  %v2059_v22 = vld [vmem:[%s2635_s1 + $0x40] sm:$0xff]  }
  0x17   : > { %1906 = vmatprep.subr.bf16.mxu1 %v2052_v17  ;;  %1908 = vmatprep.mubr.msk.bf16.mxu1 %vm2639_vm0, %v352_v23  ;;  %v2281_v58 = vadd.s32 48, %v2136_v5  ;;  %v615_v59 = vsel %vm2247_vm8, %v2252_v48, 0.0  ;;  %v752_v60 = vsel %vm2203_vm3, %v2193_v28, 0.0  ;;  %v2291_v61 = vpack.c.bf16 %v2276_v55, %v2273_v54  ;;  %v2060_v30 = vld [vmem:[%s2635_s1 + $0x60] sm:$0xff]   ;;  %v589_v34 = vld [vmem:[%s2149_s6 + $0xa] sm:$0xff] }
  0x18   : > { %v207_v0 = vadd.s32 56, %v2136_v5  ;;  %vm2303_vm9 = vcmp.gt.s32.totalorder %v240_v56, 0  ;;  %vm2307_vm10 = vcmp.gt.s32.totalorder %v247_v57, 0  ;;  %v2661_v3 = vmov 0  ;;  %v1293_v18 = vld [vmem:[%s2149_s6 + $0x49] sm:$0xff] }
  0x19   : > { %1891 = vmatpush3.bf16.msra.mxu0 %v2051_v10  ;;  %v2660_v2 = vsel %vm2303_vm9, 4294967295, %v2659_v2  ;;  %v2662_v3 = vsel %vm2307_vm10, 4294967295, %v2661_v3  ;;  %v254_v4 = vand.u32 7, %v2281_v58  ;;  %v348_v5 = vsel %vm2303_vm9, %v2263_v51, 0.0  ;;  %v2057_v10 = vld [vmem:[%s2635_s1 + $0x48] sm:$0xff]  }
  0x1a   : > { %1907 = vmatpush3.bf16.msra.mxu1 %v2052_v17  ;;  %1916 = vmatprep.subr.bf16.mxu0 %v2053_v31  ;;  %v349_v7 = vsel %vm2307_vm10, %v2266_v52, 0.0  ;;  %v2325_v8 = vpack.c.bf16 %v2297_v63, %v2294_v62  ;;  %v261_v9 = vand.u32 7, %v207_v0  ;;  %v2341_v17 = vld [vmem:[%s2149_s6 + $0x2a] sm:$0xff]  ;;  %v758_v23 = vpack.c.bf16 %v751_v49, %v750_v43 }
  0x1b   : > { %1932 = vmatprep.subr.bf16.mxu1 %v2054_v39  ;;  %v354_v12 = vpack.c.bf16 %v349_v7, %v348_v5  ;;  %vm2333_vm11 = vcmp.gt.s32.totalorder %v254_v4, 0  ;;  %v753_v26 = vsel %vm2210_vm4, %v2263_v51, 0.0  ;;  %vm2367_vm13 = vcmp.lt.s32.totalorder %v240_v56, 7  ;;  %v2063_v7 = vld [vmem:[%s2635_s1 + $0x90] sm:$0xff]  }
  0x1c   : > { %1893 = vmatmul.mubr.msk.bf16.vlgmr.msra.gmra.mxu0 %vm2639_vm0, %v2201_v32  ;;  %vm2343_vm12 = vcmp.gt.s32.totalorder %v261_v9, 0  ;;  %v350_v20 = vsel %vm2333_vm11, %v2301_v1, 0.0  ;;  %vm2371_vm14 = vcmp.lt.s32.totalorder %v247_v57, 7  ;;  %v613_v43 = vsel %vm2234_vm7, %v589_v34, 0.0  ;;  %v2062_v57 = vld [vmem:[%s2635_s1 + $0xb8] sm:$0xff]  }
  0x1d   : > { %1909 = vmatmul.mubr.msk.bf16.vlgmr.msra.gmra.mxu1 %vm2639_vm0, %v353_v47  ;;  %1917 = vmatpush3.bf16.msra.mxu0 %v2053_v31  ;;  %v351_v21 = vsel %vm2343_vm12, %v2313_v6, 0.0  ;;  %v588_v31 = vld [vmem:[%s2149_s6 + $0x2] sm:$0xff]  ;;  %v616_v47 = vsel %vm2367_vm13, %v2331_v11, 0.0  ;;  %v617_v49 = vsel %vm2371_vm14, %v2341_v17, 0.0  ;;  %v621_v56 = vpack.c.bf16 %v615_v59, %v614_v50  ;;  %v2416_v59 = vld [vmem:[%s2149_s6 + $0x32] sm:$0xff] }
  0x1e   : > { %1933 = vmatpush3.bf16.msra.mxu1 %v2054_v39  ;;  %1918 = vmatprep.subr.bf16.mxu0 %v2055_v45  ;;  %v355_v29 = vpack.c.bf16 %v351_v21, %v350_v20  ;;  %v612_v40 = vsel %vm2230_vm6, %v588_v31, 0.0  ;;  %v755_v58 = vsel %vm2307_vm10, %v2301_v1, 0.0  ;;  %v622_v0 = vpack.c.bf16 %v617_v49, %v616_v47  ;;  %v2425_v20 = vld [vmem:[%s2149_s6 + $0x40] sm:$0xff]  ;;  %v2065_v21 = vld [vmem:[%s2635_s1 + $0x88] sm:$0xff]  }
  0x1f   : > { %1934 = vmatprep.subr.bf16.mxu1 %v2056_v53  ;;  %1896 = vmatprep.mubr.msk.bf16.mxu0 %vm2639_vm0, %v2291_v61  ;;  %v620_v44 = vpack.c.bf16 %v613_v43, %v612_v40  ;;  %v759_v5 = vpack.c.bf16 %v753_v26, %v752_v60  ;;  %vm2407_vm15 = vcmp.lt.s32.totalorder %v254_v4, 7  ;;  %v2064_v60 = vld [vmem:[%s2635_s1 + $0xb0] sm:$0xff]   ;;  %vm2675_vm10 = vcmask 523264   ;;  %v2068_v47 = vld [vmem:[%s2635_s1 + $0xa0] sm:$0xff]  }
  0x20   : > { %1912 = vmatprep.mubr.msk.bf16.mxu1 %vm2639_vm0, %v354_v12  ;;  %v2419_v12 = vld [vmem:[%s2149_s6 + $0x3a] sm:$0xff]  ;;  %v618_v4 = vsel %vm2407_vm15, %v2416_v59, 0.0  ;;  %v757_v26 = vsel %vm2343_vm12, %v2425_v20, 0.0  ;;  %v1018_v31 = vsel %vm2230_vm6, %v589_v34, 0.0  ;;  %v888_v40 = vpack.c.bf16 %v2183_v24, %v2157_v13 }
  0x21   : > { %1919 = vmatpush3.bf16.msra.mxu0 %v2055_v45  ;;  %v2061_v45 = vld [vmem:[%s2635_s1 + $0x98] sm:$0xff]   ;;  %v1020_v13 = vsel %vm2214_vm5, %v2252_v48, 0.0  ;;  %v1021_v34 = vsel %vm2247_vm8, %v2331_v11, 0.0  ;;  %v1022_v49 = vsel %vm2367_vm13, %v2341_v17, 0.0  ;;  %v1425_v15 = vsel %vm2234_vm7, %v2252_v48, 0.0  ;;  %v2080_v48 = vld [vmem:[%s2635_s1 + $0x100] sm:$0xff]  }
  0x22   : > { %1935 = vmatpush3.bf16.msra.mxu1 %v2056_v53  ;;  %1920 = vmatprep.subr.bf16.mxu0 %v2057_v10  ;;  %v754_v53 = vsel %vm2303_vm9, %v2266_v52, 0.0  ;;  %vm2676_vm9 = vmmov %vm2675_vm10  ;;  %v2069_v24 = vld [vmem:[%s2635_s1 + $0xd8] sm:$0xff]   ;;  %v1426_v37 = vsel %vm2214_vm5, %v2331_v11, 0.0  ;;  %v1427_v39 = vsel %vm2247_vm8, %v2341_v17, 0.0 }
  0x23   : > { %1936 = vmatprep.subr.bf16.mxu1 %v2058_v16  ;;  %vm2677_vm4 = vmmov %vm2676_vm9  ;;  %v1433_v36 = vpack.c.bf16 %v1427_v39, %v1426_v37 }
  0x24   : > { %1897 = vmatmul.mubr.msk.bf16.gmra.mxu0 %vm2639_vm0, %v2325_v8 }
  0x25   : > { %1921 = vmatpush3.bf16.msra.mxu0 %v2057_v10  ;;  %1913 = vmatmul.mubr.msk.bf16.gmra.mxu1 %vm2639_vm0, %v355_v29 }
  0x26   : > { %1922 = vmatprep.subr.bf16.mxu0 %v2059_v22  ;;  %1937 = vmatpush3.bf16.msra.mxu1 %v2058_v16  ;;  %v760_v16 = vpack.c.bf16 %v755_v58, %v754_v53  ;;  %v889_v53 = vpack.c.bf16 %v2273_v54, %v2186_v25  ;;  %v890_v58 = vpack.c.bf16 %v2294_v62, %v2276_v55  ;;  %v2492_v54 = vld [vmem:[%s2149_s6 + $0x42] sm:$0xff]  ;;  %v1156_v62 = vsel %vm2159_vm1, %v2190_v27, 0.0  ;;  %vm2684_vm1 = vmmov %vm2677_vm4 }
  0x27   : > { %1940 = vmatprep.mubr.msk.bf16.mxu1 %vm2639_vm0, %v758_v23  ;;  %1938 = vmatprep.subr.bf16.mxu1 %v2060_v30  ;;  %v756_v23 = vsel %vm2333_vm11, %v2313_v6, 0.0  ;;  %v2500_v55 = vld [vmem:[%s2149_s6 + $0x41] sm:$0xff]  ;;  %vm2698_vm5 = vmmov %vm2684_vm1 }
  0x28   : > { %1924 = vmatprep.mubr.msk.bf16.mxu0 %vm2639_vm0, %v620_v44  ;;  %vm2411_vm0 = vcmp.lt.s32.totalorder %v261_v9, 7  ;;  %v761_v43 = vpack.c.bf16 %v757_v26, %v756_v23  ;;  %v2067_v44 = vld [vmem:[%s2635_s1 + $0x80] sm:$0xff]   ;;  %v891_v19 = vpack.c.bf16 %v2500_v55, %v2297_v63  ;;  %v2074_v27 = vld [vmem:[%s2635_s1 + $0xe8] sm:$0xff]   ;;  %v2077_v26 = vld [vmem:[%s2635_s1 + $0x118] sm:$0xff]   ;;  %v1297_v42 = vpack.c.bf16 %v1293_v18, %v2500_v55 }
  0x29   : > { %1923 = vmatpush3.bf16.msra.mxu0 %v2059_v22  ;;  %v619_v9 = vsel %vm2411_vm0, %v2419_v12, 0.0  ;;  %v1019_v22 = vsel %vm2234_vm7, %v2222_v38, 0.0  ;;  %v1025_v14 = vsel %vm2411_vm0, %v2492_v54, 0.0  ;;  %v2076_v63 = vld [vmem:[%s2635_s1 + $0xe0] sm:$0xff]   ;;  %vm2695_vm7 = vmmov %vm2684_vm1 }
  0x2a   : > { %1948 = vmatprep.subr.bf16.mxu0 %v2061_v45  ;;  %1939 = vmatpush3.bf16.msra.mxu1 %v2060_v30  ;;  %v623_v29 = vpack.c.bf16 %v619_v9, %v618_v4  ;;  %v2066_v30 = vld [vmem:[%s2635_s1 + $0xa8] sm:$0xff]   ;;  %v1024_v4 = vsel %vm2407_vm15, %v2419_v12, 0.0  ;;  %vm2699_vm8 = vmmov %vm2684_vm1 }
  0x2b   : > { %1964 = vmatprep.subr.bf16.mxu1 %v2062_v57  ;;  %v1029_v9 = vpack.c.bf16 %v1025_v14, %v1024_v4 }
  0x2c   : > { %1925 = vmatmul.mubr.msk.bf16.vlgmr.msra.gmra.mxu0 %vm2675_vm10, %v621_v56  ;;  %vm2679_vm10 = vmmov %vm2677_vm4  ;;  %v2070_v56 = vld [vmem:[%s2635_s1 + $0xf8] sm:$0xff]  }
  0x2d   : > { %1949 = vmatpush3.bf16.msra.mxu0 %v2061_v45  ;;  %1928 = vmatprep.mubr.msk.bf16.mxu0 %vm2676_vm9, %v622_v0  ;;  %vm2678_vm9 = vmmov %vm2677_vm4  ;;  %v1026_v45 = vpack.c.bf16 %v1019_v22, %v1018_v31  ;;  %v1027_v0 = vpack.c.bf16 %v1021_v34, %v1020_v13  ;;  %v1158_v22 = vsel %vm2203_vm3, %v2263_v51, 0.0  ;;  %vm2689_vm3 = vnez %v2662_v3  ;;  %v2079_v3 = vld [vmem:[%s2635_s1 + $0x108] sm:$0xff]  }
  0x2e   : > { %1941 = vmatmul.mubr.msk.bf16.vlgmr.msra.gmra.mxu1 %vm2677_vm4, %v759_v5  ;;  %1950 = vmatprep.subr.bf16.mxu0 %v2063_v7  ;;  %v2071_v5 = vld [vmem:[%s2635_s1 + $0xd0] sm:$0xff]  }
  0x2f   : > { %1965 = vmatpush3.bf16.msra.mxu1 %v2062_v57  ;;  %1944 = vmatprep.mubr.msk.bf16.mxu1 %vm2678_vm9, %v760_v16  ;;  %vm2680_vm9 = vmmov %vm2677_vm4  ;;  %v1023_v57 = vsel %vm2371_vm14, %v2416_v59, 0.0  ;;  %v2073_v16 = vld [vmem:[%s2635_s1 + $0xc8] sm:$0xff]  }
  0x30   : > { %1966 = vmatprep.subr.bf16.mxu1 %v2064_v60  ;;  %v1028_v25 = vpack.c.bf16 %v1023_v57, %v1022_v49 }
  0x31   : > { %1951 = vmatpush3.bf16.msra.mxu0 %v2063_v7  ;;  %v2072_v7 = vld [vmem:[%s2635_s1 + $0xf0] sm:$0xff]  }
  0x32   : > { %1952 = vmatprep.subr.bf16.mxu0 %v2065_v21 }
  0x33   : > { %1967 = vmatpush3.bf16.msra.mxu1 %v2064_v60  ;;  %v1157_v60 = vsel %vm2169_vm2, %v2193_v28, 0.0  ;;  %vm2685_vm2 = vnez %v2650_v35  ;;  %v1161_v35 = vsel %vm2689_vm3, %v2313_v6, 0.0  ;;  %v1424_v6 = vsel %vm2230_vm6, %v2222_v38, 0.0  ;;  %vm2694_vm6 = vmmov %vm2684_vm1 }
  0x34   : > { %1929 = vmatmul.mubr.msk.bf16.gmra.mxu0 %vm2677_vm4, %v623_v29  ;;  %1968 = vmatprep.subr.bf16.mxu1 %v2066_v30  ;;  %v1164_v28 = vpack.c.bf16 %v1157_v60, %v1156_v62  ;;  %v1159_v23 = vsel %vm2685_vm2, %v2266_v52, 0.0  ;;  %v2078_v29 = vld [vmem:[%s2635_s1 + $0x110] sm:$0xff]   ;;  %vm2690_vm2 = vmmov %vm2684_vm1  ;;  %v1429_v38 = vsel %vm2371_vm14, %v2419_v12, 0.0  ;;  %v1432_v41 = vpack.c.bf16 %v1425_v15, %v1424_v6 }
  0x35   : > { %1953 = vmatpush3.bf16.msra.mxu0 %v2065_v21  ;;  %1956 = vmatprep.mubr.msk.bf16.mxu0 %vm2679_vm10, %v888_v40  ;;  %vm2681_vm10 = vmmov %vm2677_vm4  ;;  %v2075_v21 = vld [vmem:[%s2635_s1 + $0xc0] sm:$0xff]   ;;  %v1165_v51 = vpack.c.bf16 %v1159_v23, %v1158_v22 }
  0x36   : > { %1945 = vmatmul.mubr.msk.bf16.gmra.mxu1 %vm2680_vm9, %v761_v43  ;;  %1954 = vmatprep.subr.bf16.mxu0 %v2067_v44  ;;  %vm2682_vm9 = vmmov %vm2677_vm4 }
  0x37   : > { %1969 = vmatpush3.bf16.msra.mxu1 %v2066_v30  ;;  %1972 = vmatprep.mubr.msk.bf16.mxu1 %vm2677_vm4, %v1026_v45  ;;  %v1423_v30 = vld [vmem:[%s2149_s6 + $0x4a] sm:$0xff]  ;;  %vm2701_vm3 = vmmov %vm2684_vm1 }
  0x38   : > { %1970 = vmatprep.subr.bf16.mxu1 %v2068_v47  ;;  %v1431_v12 = vsel %vm2411_vm0, %v1423_v30, 0.0 }
  0x39   : > { %1955 = vmatpush3.bf16.msra.mxu0 %v2067_v44 }
  0x3a   : > { %1980 = vmatprep.subr.bf16.mxu0 %v2069_v24 }
  0x3b   : > { %1971 = vmatpush3.bf16.msra.mxu1 %v2068_v47 }
  0x3c   : > { %1957 = vmatmul.mubr.msk.bf16.vlgmr.msra.gmra.mxu0 %vm2681_vm10, %v889_v53  ;;  %1996 = vmatprep.subr.bf16.mxu1 %v2070_v56  ;;  %vm2683_vm10 = vmmov %vm2677_vm4 }
  0x3d   : > { %1981 = vmatpush3.bf16.msra.mxu0 %v2069_v24  ;;  %1960 = vmatprep.mubr.msk.bf16.mxu0 %vm2682_vm9, %v890_v58  ;;  %vm2686_vm9 = vmmov %vm2684_vm1 }
  0x3e   : > { %1973 = vmatmul.mubr.msk.bf16.vlgmr.msra.gmra.mxu1 %vm2677_vm4, %v1027_v0  ;;  %1982 = vmatprep.subr.bf16.mxu0 %v2071_v5  ;;  %vm2687_vm4 = vmmov %vm2684_vm1 }
  0x3f   : > { %1997 = vmatpush3.bf16.msra.mxu1 %v2070_v56  ;;  %1976 = vmatprep.mubr.msk.bf16.mxu1 %vm2683_vm10, %v1028_v25  ;;  %vm2688_vm10 = vnez %v2660_v2  ;;  %v1155_v2 = vld [vmem:[%s2149_s6 + $0x48] sm:$0xff] }
  0x40   : > { %1998 = vmatprep.subr.bf16.mxu1 %v2072_v7  ;;  %v1160_v33 = vsel %vm2688_vm10, %v2301_v1, 0.0  ;;  %v1163_v1 = vsel %vm2343_vm12, %v1155_v2, 0.0  ;;  %vm2696_vm12 = vmmov %vm2684_vm1 }
  0x41   : > { %1983 = vmatpush3.bf16.msra.mxu0 %v2071_v5  ;;  %v1166_v52 = vpack.c.bf16 %v1161_v35, %v1160_v33  ;;  %vm2700_vm10 = vmmov %vm2684_vm1 }
  0x42   : > { %1984 = vmatprep.subr.bf16.mxu0 %v2073_v16 }
  0x43   : > { %1999 = vmatpush3.bf16.msra.mxu1 %v2072_v7 }
  0x44   : > { %1961 = vmatmul.mubr.msk.bf16.gmra.mxu0 %vm2684_vm1, %v891_v19  ;;  %2000 = vmatprep.subr.bf16.mxu1 %v2074_v27 }
  0x45   : > { %1985 = vmatpush3.bf16.msra.mxu0 %v2073_v16  ;;  %1988 = vmatprep.mubr.msk.bf16.mxu0 %vm2686_vm9, %v1164_v28  ;;  %vm2691_vm9 = vmmov %vm2684_vm1 }
  0x46   : > { %1977 = vmatmul.mubr.msk.bf16.gmra.mxu1 %vm2687_vm4, %v1029_v9  ;;  %1986 = vmatprep.subr.bf16.mxu0 %v2075_v21  ;;  %vm2692_vm4 = vmmov %vm2684_vm1 }
  0x47   : > { %2001 = vmatpush3.bf16.msra.mxu1 %v2074_v27  ;;  %2004 = vmatprep.mubr.msk.bf16.mxu1 %vm2684_vm1, %v2201_v32  ;;  %v1162_v32 = vsel %vm2333_vm11, %v2425_v20, 0.0  ;;  %vm2693_vm11 = vmmov %vm2684_vm1  ;;  %v1428_v20 = vsel %vm2367_vm13, %v2416_v59, 0.0  ;;  %v1430_v59 = vsel %vm2407_vm15, %v2492_v54, 0.0 }
  0x48   : > { %2002 = vmatprep.subr.bf16.mxu1 %v2076_v63  ;;  %vm2697_vm13 = vmmov %vm2684_vm1  ;;  %v1435_v46 = vpack.c.bf16 %v1431_v12, %v1430_v59 }
  0x49   : > { %1987 = vmatpush3.bf16.msra.mxu0 %v2075_v21 }
  0x4a   : > { %2012 = vmatprep.subr.bf16.mxu0 %v2077_v26 }
  0x4b   : > { %2003 = vmatpush3.bf16.msra.mxu1 %v2076_v63 }
  0x4c   : > { %1989 = vmatmul.mubr.msk.bf16.vlgmr.msra.gmra.mxu0 %vm2690_vm2, %v1165_v51  ;;  %2028 = vmatprep.subr.bf16.mxu1 %v2077_v26 }
  0x4d   : > { %2013 = vmatpush3.bf16.msra.mxu0 %v2077_v26  ;;  %1992 = vmatprep.mubr.msk.bf16.mxu0 %vm2691_vm9, %v1166_v52  ;;  %vm2702_vm9 = vmmov %vm2701_vm3 }
  0x4e   : > { %2005 = vmatmul.mubr.msk.bf16.vlgmr.msra.gmra.mxu1 %vm2692_vm4, %v2291_v61  ;;  %2014 = vmatprep.subr.bf16.mxu0 %v2078_v29  ;;  %v1167_v61 = vpack.c.bf16 %v1163_v1, %v1162_v32  ;;  %vm2703_vm4 = vmmov %vm2701_vm3 }
  0x4f   : > { %2032 = vmatpush3.bf16.msra.mxu1 %v2077_v26  ;;  %2008 = vmatprep.mubr.msk.bf16.mxu1 %vm2693_vm11, %v2325_v8  ;;  %v1434_v8 = vpack.c.bf16 %v1429_v38, %v1428_v20 }
  0x50   : > { %2029 = vmatprep.subr.bf16.mxu1 %v2078_v29 }
  0x51   : > { %2015 = vmatpush3.bf16.msra.mxu0 %v2078_v29 }
  0x52   : > { %2016 = vmatprep.subr.bf16.mxu0 %v2079_v3 }
  0x53   : > { %2033 = vmatpush3.bf16.msra.mxu1 %v2078_v29 }
  0x54   : > { %1993 = vmatmul.mubr.msk.bf16.gmra.mxu0 %vm2694_vm6, %v1167_v61  ;;  %2030 = vmatprep.subr.bf16.mxu1 %v2079_v3 }
  0x55   : > { %2017 = vmatpush3.bf16.msra.mxu0 %v2079_v3  ;;  %2020 = vmatprep.mubr.msk.bf16.mxu0 %vm2695_vm7, %v1432_v41  ;;  %vm2704_vm7 = vmmov %vm2701_vm3 }
  0x56   : > { %2009 = vmatmul.mubr.msk.bf16.gmra.mxu1 %vm2696_vm12, %v1297_v42  ;;  %2018 = vmatprep.subr.bf16.mxu0 %v2080_v48 }
  0x57   : > { %2034 = vmatpush3.bf16.msra.mxu1 %v2079_v3  ;;  %2024 = vmatprep.mubr.msk.bf16.mxu1 %vm2697_vm13, %v1434_v8  ;;  %vm2705_vm13 = vmmov %vm2701_vm3 }
  0x58   : > { %2031 = vmatprep.subr.bf16.mxu1 %v2080_v48 }
  0x59   : > { %2019 = vmatpush3.bf16.msra.mxu0 %v2080_v48 }
  0x5b   : > { %2035 = vmatpush3.bf16.msra.mxu1 %v2080_v48 }
  0x5c   : > { %2021 = vmatmul.mubr.msk.bf16.vlgmr.msra.gmra.mxu0 %vm2698_vm5, %v1433_v36  ;;  %vm2706_vm5 = vmmov %vm2701_vm3 }
  0x5e   : > { %2025 = vmatmul.mubr.msk.bf16.vlgmr.msra.gmra.mxu1 %vm2699_vm8, %v1435_v46  ;;  %vm2707_vm8 = vmmov %vm2701_vm3 }
  0xdc   : > { %v1894_v11 = vpop.f32.mrf.mxu0 }
  0xdd   : > { %v1910_v17 = vpop.f32.mrf.mxu1 }
  0xde   : > { %v456_v31 = vpop.f32.mrf.mxu0  ;;  %v566_v1 = vadd.f32 %v1910_v17, %v1894_v11 }
  0xdf   : > { %v557_v10 = vpop.f32.mrf.mxu1 }
  0xe0   : > { %v1895_v40 = vpop.f32.mrf.mxu0  ;;  %v558_v15 = vadd.f32 %v557_v10, %v456_v31 }
  0xe1   : > { %v1911_v43 = vpop.f32.mrf.mxu1 }
  0xe2   : > { %v459_v50 = vpop.f32.mrf.mxu0  ;;  %v569_v48 = vadd.f32 %v1911_v43, %v1895_v40 }
  0xe3   : > { %v560_v44 = vpop.f32.mrf.mxu1 }
  0xe4   : > { %v1898_v45 = vpop.f32.mrf.mxu0  ;;  %v561_v8 = vadd.f32 %v560_v44, %v459_v50 }
  0xe5   : > { %v1914_v47 = vpop.f32.mrf.mxu1 }
  0xe6   : > { %v472_v13 = vpop.f32.mrf.mxu0  ;;  %v582_v18 = vadd.f32 %v1914_v47, %v1898_v45 }
  0xe7   : > { %v573_v24 = vpop.f32.mrf.mxu1 }
  0xe8   : > { %v1899_v34 = vpop.f32.mrf.mxu0  ;;  %v574_v30 = vadd.f32 %v573_v24, %v472_v13 }
  0xe9   : > { %v1915_v49 = vpop.f32.mrf.mxu1 }
  0xea   : > { %v475_v53 = vpop.f32.mrf.mxu0  ;;  %v585_v59 = vadd.f32 %v1915_v49, %v1899_v34 }
  0xeb   : > { %v576_v56 = vpop.f32.mrf.mxu1 }
  0xec   : > { %v1926_v57 = vpop.f32.mrf.mxu0  ;;  %v577_v36 = vadd.f32 %v576_v56, %v475_v53 }
  0xed   : > { %v736_v61 = vadd.f32 %v1926_v57, %v566_v1 }
  0xee   : > { %v1942_v58 = vpop.f32.mrf.mxu1  ;;  %v703_v0 = vpop.f32.mrf.mxu0 }
  0xef   : > { %v734_v41 = vadd.f32 %v703_v0, %v558_v15  ;;  %v874_v12 = vadd.f32 %v1942_v58, %v736_v61 }
  0xf0   : > { %v841_v5 = vpop.f32.mrf.mxu1  ;;  %v1927_v25 = vpop.f32.mrf.mxu0 }
  0xf1   : > { %v737_v46 = vadd.f32 %v1927_v25, %v569_v48  ;;  %v872_v45 = vadd.f32 %v841_v5, %v734_v41 }
  0xf2   : > { %v1943_v54 = vpop.f32.mrf.mxu1  ;;  %v706_v7 = vpop.f32.mrf.mxu0 }
  0xf3   : > { %v735_v11 = vadd.f32 %v706_v7, %v561_v8  ;;  %v875_v50 = vadd.f32 %v1943_v54, %v737_v46 }
  0xf4   : > { %v844_v55 = vpop.f32.mrf.mxu1  ;;  %v1930_v62 = vpop.f32.mrf.mxu0 }
  0xf5   : > { %v740_v42 = vadd.f32 %v1930_v62, %v582_v18  ;;  %v873_v44 = vadd.f32 %v844_v55, %v735_v11 }
  0xf6   : > { %v1946_v60 = vpop.f32.mrf.mxu1  ;;  %v719_v16 = vpop.f32.mrf.mxu0 }
  0xf7   : > { %v738_v17 = vadd.f32 %v719_v16, %v574_v30  ;;  %v878_v47 = vadd.f32 %v1946_v60, %v740_v42 }
  0xf8   : > { %v857_v4 = vpop.f32.mrf.mxu1  ;;  %v1931_v14 = vpop.f32.mrf.mxu0 }
  0xf9   : > { %v741_v57 = vadd.f32 %v1931_v14, %v585_v59  ;;  %v876_v13 = vadd.f32 %v857_v4, %v738_v17 }
  0xfa   : > { %v1947_v19 = vpop.f32.mrf.mxu1  ;;  %v722_v27 = vpop.f32.mrf.mxu0 }
  0xfb   : > { %v739_v0 = vadd.f32 %v722_v27, %v577_v36  ;;  %v879_v49 = vadd.f32 %v1947_v19, %v741_v57 }
  0xfc   : > { %v860_v28 = vpop.f32.mrf.mxu1  ;;  %v1958_v9 = vpop.f32.mrf.mxu0 }
  0xfd   : > { %v1004_v1 = vadd.f32 %v1958_v9, %v874_v12  ;;  %v877_v56 = vadd.f32 %v860_v28, %v739_v0 }
  0xfe   : > { %v1974_v21 = vpop.f32.mrf.mxu1  ;;  %v971_v63 = vpop.f32.mrf.mxu0 }
  0xff   : > { %v1002_v40 = vadd.f32 %v971_v63, %v872_v45  ;;  %v1142_v53 = vadd.f32 %v1974_v21, %v1004_v1 }
 0x100   : > { %v1109_v22 = vpop.f32.mrf.mxu1  ;;  %v1959_v23 = vpop.f32.mrf.mxu0 }
 0x101   : > { %v1005_v58 = vadd.f32 %v1959_v23, %v875_v50  ;;  %v1140_v16 = vadd.f32 %v1109_v22, %v1002_v40 }
 0x102   : > { %v1975_v26 = vpop.f32.mrf.mxu1  ;;  %v974_v33 = vpop.f32.mrf.mxu0 }
 0x103   : > { %v1003_v25 = vadd.f32 %v974_v33, %v873_v44  ;;  %v1143_v4 = vadd.f32 %v1975_v26, %v1005_v58 }
 0x104   : > { %v1112_v35 = vpop.f32.mrf.mxu1  ;;  %v1962_v51 = vpop.f32.mrf.mxu0 }
 0x105   : > { %v1008_v43 = vadd.f32 %v1962_v51, %v878_v47  ;;  %v1141_v61 = vadd.f32 %v1112_v35, %v1003_v25 }
 0x106   : > { %v1978_v52 = vpop.f32.mrf.mxu1  ;;  %v987_v29 = vpop.f32.mrf.mxu0 }
 0x107   : > { %v1006_v7 = vadd.f32 %v987_v29, %v876_v13  ;;  %v1146_v14 = vadd.f32 %v1978_v52, %v1008_v43 }
 0x108   : > { %v1125_v2 = vpop.f32.mrf.mxu1  ;;  %v1963_v32 = vpop.f32.mrf.mxu0 }
 0x109   : > { %v1009_v27 = vadd.f32 %v1963_v32, %v879_v49  ;;  %v1144_v41 = vadd.f32 %v1125_v2, %v1006_v7 }
 0x10a   : > { %v1979_v3 = vpop.f32.mrf.mxu1  ;;  %v990_v6 = vpop.f32.mrf.mxu0 }
 0x10b   : > { %v1007_v18 = vadd.f32 %v990_v6, %v877_v56  ;;  %v1147_v21 = vadd.f32 %v1979_v3, %v1009_v27  ;;  %v1807_v6 = vld [vmem:[%s2636_s2] ss:$0 sm:$0xff] }
 0x10c   : > { %v1128_v20 = vpop.f32.mrf.mxu1  ;;  %v1990_v38 = vpop.f32.mrf.mxu0  ;;  %v1808_v3 = vld [vmem:[%s2637_s3] ss:$0 sm:$0xff] }
 0x10d   : > { %v1280_v9 = vadd.f32 %v1990_v38, %v1142_v53  ;;  %v1145_v33 = vadd.f32 %v1128_v20, %v1007_v18 }
 0x10e   : > { %v2006_v37 = vpop.f32.mrf.mxu1  ;;  %v1247_v39 = vpop.f32.mrf.mxu0 }
 0x10f   : > { %v1278_v54 = vadd.f32 %v1247_v39, %v1140_v16  ;;  %v1410_v23 = vadd.f32 %v2006_v37, %v1280_v9 }
 0x110   : > { %v1377_v10 = vpop.f32.mrf.mxu1  ;;  %v1991_v31 = vpop.f32.mrf.mxu0 }
 0x111   : > { %v1281_v29 = vadd.f32 %v1991_v31, %v1143_v4  ;;  %v1408_v38 = vadd.f32 %v1377_v10, %v1278_v54 }
 0x112   : > { %v2007_v15 = vpop.f32.mrf.mxu1  ;;  %v1250_v62 = vpop.f32.mrf.mxu0 }
 0x113   : > { %v1279_v42 = vadd.f32 %v1250_v62, %v1141_v61  ;;  %v1411_v59 = vadd.f32 %v2007_v15, %v1281_v29 }
 0x114   : > { %v1380_v24 = vpop.f32.mrf.mxu1  ;;  %v1994_v34 = vpop.f32.mrf.mxu0 }
 0x115   : > { %v1284_v55 = vadd.f32 %v1994_v34, %v1146_v14  ;;  %v1409_v12 = vadd.f32 %v1380_v24, %v1279_v42 }
 0x116   : > { %v2010_v5 = vpop.f32.mrf.mxu1  ;;  %v1263_v60 = vpop.f32.mrf.mxu0 }
 0x117   : > { %v1282_v22 = vadd.f32 %v1263_v60, %v1144_v41  ;;  %v1414_v48 = vadd.f32 %v2010_v5, %v1284_v55 }
 0x118   : > { %v1393_v63 = vpop.f32.mrf.mxu1  ;;  %v1995_v51 = vpop.f32.mrf.mxu0 }
 0x119   : > { %v1285_v35 = vadd.f32 %v1995_v51, %v1147_v21  ;;  %v1412_v36 = vadd.f32 %v1393_v63, %v1282_v22 }
 0x11a   : > { %v2011_v19 = vpop.f32.mrf.mxu1  ;;  %v1266_v28 = vpop.f32.mrf.mxu0 }
 0x11b   : > { %v1283_v2 = vadd.f32 %v1266_v28, %v1145_v33  ;;  %v1415_v45 = vadd.f32 %v2011_v19, %v1285_v35 }
 0x11c   : > { %v1396_v52 = vpop.f32.mrf.mxu1  ;;  %v2022_v32 = vpop.f32.mrf.mxu0 }
 0x11d   : > { %v1548_v26 = vadd.f32 %v2022_v32, %v1410_v23  ;;  %v1413_v47 = vadd.f32 %v1396_v52, %v1283_v2 }
 0x11e   : > { %v2026_v20 = vpop.f32.mrf.mxu1  ;;  %v1515_v8 = vpop.f32.mrf.mxu0 }
 0x11f   : > { %v1563_v30 = vadd.f32 %v1807_v6, %v1548_v26  ;;  %v1552_v37 = vadd.f32 %v2026_v20, %v1414_v48  ;;  %v1546_v39 = vadd.f32 %v1515_v8, %v1408_v38 }
 0x120   : > { %v1531_v46 = vpop.f32.mrf.mxu1  ;;  %v2023_v11 = vpop.f32.mrf.mxu0 }
 0x121   : > { %vm1571_vm0 = vcmp.ge.f32.partialorder %v1563_v30, 0.0  ;;  %v1586_v17 = vmul.f32 %v1808_v3, %v1563_v30  ;;  %v1567_v10 = vadd.f32 %v1807_v6, %v1552_v37  ;;  %v1561_v31 = vadd.f32 %v1807_v6, %v1546_v39 }
 0x122   : > { %v1550_v57 = vadd.f32 %v1531_v46, %v1412_v36  ;;  %v1549_v1 = vadd.f32 %v2023_v11, %v1411_v59  ;;  %v2027_v0 = vpop.f32.mrf.mxu1  ;;  %v1518_v15 = vpop.f32.mrf.mxu0 }
 0x123   : > { %v1594_v62 = vsel %vm1571_vm0, %v1563_v30, %v1586_v17  ;;  %vm1575_vm14 = vcmp.ge.f32.partialorder %v1567_v10, 0.0  ;;  %v1590_v40 = vmul.f32 %v1808_v3, %v1567_v10  ;;  %vm1569_vm15 = vcmp.ge.f32.partialorder %v1561_v31, 0.0 }
 0x124   : > { %1602 = vst.msk [vmem:[%s2613_s29 + $0x10] sm:$0xff] %vm2700_vm10, %v1594_v62  ;;  %v1584_v43 = vmul.f32 %v1808_v3, %v1561_v31  ;;  %v1565_v50 = vadd.f32 %v1807_v6, %v1550_v57  ;;  %v1564_v44 = vadd.f32 %v1807_v6, %v1549_v1  ;;  %v1553_v13 = vadd.f32 %v2027_v0, %v1415_v45  ;;  %v1534_v24 = vpop.f32.mrf.mxu1 }
 0x125   : > { %v1598_v34 = vsel %vm1575_vm14, %v1567_v10, %v1590_v40  ;;  %v1547_v49 = vadd.f32 %v1518_v15, %v1409_v12  ;;  %v1551_v53 = vadd.f32 %v1534_v24, %v1413_v47 }
 0x126   : > { %1606 = vst.msk [vmem:[%s2613_s29 + $0x30] sm:$0xff] %vm2701_vm3, %v1598_v34  ;;  %v1592_v56 = vsel %vm1569_vm15, %v1561_v31, %v1584_v43  ;;  %vm1573_vm1 = vcmp.ge.f32.partialorder %v1565_v50, 0.0  ;;  %v1588_v58 = vmul.f32 %v1808_v3, %v1565_v50  ;;  %vm1572_vm2 = vcmp.ge.f32.partialorder %v1564_v44, 0.0 }
 0x127   : > { %1600 = vst.msk [vmem:[%s2613_s29] sm:$0xff] %vm2702_vm9, %v1592_v56  ;;  %v1587_v25 = vmul.f32 %v1808_v3, %v1564_v44  ;;  %v1568_v7 = vadd.f32 %v1807_v6, %v1553_v13  ;;  %v1562_v5 = vadd.f32 %v1807_v6, %v1547_v49  ;;  %v1566_v60 = vadd.f32 %v1807_v6, %v1551_v53 }
 0x128   : > { %v1596_v16 = vsel %vm1573_vm1, %v1565_v50, %v1588_v58 }
 0x129   : > { %1604 = vst.msk [vmem:[%s2613_s29 + $0x20] sm:$0xff] %vm2703_vm4, %v1596_v16  ;;  %v1595_v14 = vsel %vm1572_vm2, %v1564_v44, %v1587_v25  ;;  %vm1576_vm11 = vcmp.ge.f32.partialorder %v1568_v7, 0.0  ;;  %v1591_v27 = vmul.f32 %v1808_v3, %v1568_v7  ;;  %vm1570_vm6 = vcmp.ge.f32.partialorder %v1562_v5, 0.0 }
 0x12a   : > { %1603 = vst.msk [vmem:[%s2613_s29 + $0x18] sm:$0xff] %vm2704_vm7, %v1595_v14  ;;  %v1585_v9 = vmul.f32 %v1808_v3, %v1562_v5  ;;  %vm1574_vm12 = vcmp.ge.f32.partialorder %v1566_v60, 0.0  ;;  %v1589_v18 = vmul.f32 %v1808_v3, %v1566_v60 }
 0x12b   : > { %v1599_v63 = vsel %vm1576_vm11, %v1568_v7, %v1591_v27 }
 0x12c   : > { %1607 = vst.msk [vmem:[%s2613_s29 + $0x38] sm:$0xff] %vm2705_vm13, %v1599_v63  ;;  %v1593_v51 = vsel %vm1570_vm6, %v1562_v5, %v1585_v9  ;;  %v1597_v54 = vsel %vm1574_vm12, %v1566_v60, %v1589_v18 }
 0x12d   : > { %1601 = vst.msk [vmem:[%s2613_s29 + $0x8] sm:$0xff] %vm2706_vm5, %v1593_v51 }
 0x12e   : > { %1605 = vst.msk [vmem:[%s2613_s29 + $0x28] sm:$0xff] %vm2707_vm8, %v1597_v54 }
 0x12f PF: > { %s14_s15 = sadd.s32 1, %s2087_s15  }
 0x130   : > { %p11_p4 = scmp.ge.s32.totalorder %s14_s15, 6  }
 0x132   :  { %13 = sbr.rel (!%p11_p4) target bundleno = 1 (0x1), region = 74 }

// kernel: decoder1v1_forward.9
= control target key start
LH: loop header
LB: loop body
LE: loop exit
PB: predicated region body
PF: predicated region fallthrough
CT: control target
= control target key end

     0   :  { %s1844_s15 = smov 0   ;;  %s2334_s0 = inlined_call_operand.vmem [shape: f32[4,82,32], index: 0, kind: input, shape index: {}]   ;;  %s2335_s1 = inlined_call_operand.vmem [shape: bf16[9,32,32], index: 1, kind: input, shape index: {}]   ;;  %s2336_s2 = inlined_call_operand.vmem [shape: f32[1,32], index: 2, kind: input, shape index: {}]   ;;  %s2337_s3 = inlined_call_operand.vmem [shape: f32[1,32], index: 3, kind: input, shape index: {}]   ;;  %s2338_s4 = inlined_call_operand.vmem [shape: f32[4,64,32], index: 4, kind: output, shape index: {}]  }
   0x1 LB: > { %s1519_s16 = sadd.s32 4294967295, %s1817_s15   ;;  %p1523_p0 = scmp.ge.s32.totalorder %s1817_s15, 1  ;;  %s1817_s15 = sphi %s1844_s15, %s14_s15  }
   0x2   : > { %p162_p1 = scmp.lt.s32.totalorder %s1817_s15, 5 }
   0x4   : > { %p163_p2 = pnand %p1523_p0, %p162_p1 }
   0x5   : > { %p188_p3 = scmp.lt.s32.totalorder (!%p163_p2), %s1519_s16, 3 }
   0x6   : > { %166 = sbr.rel (%p163_p2) target bundleno = 294 (0x126), region = 36 }
   0xb   : > { %v1793_v0 = vld [vmem:[%s2335_s1 + $0x18] sm:$0xff]   ;;  %v199_v1 = vlaneseq  ;;  %v1794_v2 = vld [vmem:[%s2335_s1 + $0x10] sm:$0xff]   ;;  %s2416_s16 = smov (!%p188_p3, %s1519_s16), 3  ;;  %v1795_v3 = vld [vmem:[%s2335_s1 + $0x8] sm:$0xff]   ;;  %vm2339_vm0 = vcmask 261120  }
   0xc   : > { %1672 = vmatprep.subr.bf16.mxu0 %v1793_v0  ;;  %1780 = vmatprep.subr.bf16.mxu1 %v1793_v0  ;;  %s1784_s23 = smul.u32 88, %s2416_s16  ;;  %v1796_v5 = vld [vmem:[%s2335_s1 + $0x28] sm:$0xff]   ;;  %v1798_v13 = vld [vmem:[%s2335_s1 + $0x20] sm:$0xff]   ;;  %v1799_v53 = vld [vmem:[%s2335_s1 + $0x38] sm:$0xff]   ;;  %s1617_s9 = sshll.u32 %s2416_s16, 6 }
   0xd   : > { %1673 = vmatpush3.bf16.msra.mxu0 %v1793_v0  ;;  %1782 = vmatpush3.bf16.msra.mxu1 %v1793_v0  ;;  %v1863_v4 = vshrl.u32 %v199_v1, 7  ;;  %v1797_v19 = vld [vmem:[%s2335_s1] sm:$0xff]   ;;  %v1800_v54 = vld [vmem:[%s2335_s1 + $0x48] sm:$0xff]   ;;  %v1807_v27 = vld [vmem:[%s2335_s1 + $0x78] sm:$0xff]   ;;  %s2295_s16 = scalar_lea.vmem %s2338_s4, %s1617_s9 }
   0xe   : > { %1674 = vmatprep.subr.bf16.mxu0 %v1794_v2  ;;  %1781 = vmatprep.subr.bf16.mxu1 %v1794_v2  ;;  %s1873_s28 = scalar_lea.vmem %s2334_s0, %s1784_s23 }
   0xf   : > { %v201_v6 = vadd.s32 8, %v1863_v4  ;;  %v212_v7 = vand.u32 7, %v1863_v4  ;;  %v202_v8 = vadd.s32 16, %v1863_v4  ;;  %v203_v9 = vadd.s32 24, %v1863_v4  ;;  %v360_v10 = vld [vmem:[%s1873_s28 + $0x1] sm:$0xff]  ;;  %v1880_v11 = vld [vmem:[%s1873_s28 + $0x9] sm:$0xff] }
  0x10   : > { %v1883_v12 = vld [vmem:[%s1873_s28 + $0x21] sm:$0xff]  ;;  %v368_v15 = vpack.c.bf16 %v1880_v11, %v360_v10  ;;  %v1890_v16 = vld [vmem:[%s1873_s28 + $0x29] sm:$0xff]  ;;  %v1893_v17 = vld [vmem:[%s1873_s28 + $0x11] sm:$0xff]  ;;  %v204_v47 = vadd.s32 32, %v1863_v4  ;;  %v205_v50 = vadd.s32 40, %v1863_v4  ;;  %v206_v1 = vadd.s32 48, %v1863_v4 }
  0x11   : > { %1675 = vmatpush3.bf16.msra.mxu0 %v1794_v2  ;;  %1783 = vmatpush3.bf16.msra.mxu1 %v1794_v2  ;;  %v219_v14 = vand.u32 7, %v201_v6  ;;  %v1896_v18 = vld [vmem:[%s1873_s28 + $0x19] sm:$0xff]  ;;  %vm1901_vm1 = vcmp.gt.s32.totalorder %v212_v7, 0  ;;  %vm1905_vm2 = vcmp.lt.s32.totalorder %v212_v7, 7  ;;  %v226_v22 = vand.u32 7, %v202_v8  ;;  %v1918_v25 = vld [vmem:[%s1873_s28 + $0x31] sm:$0xff] }
  0x12   : > { %1684 = vmatprep.subr.bf16.mxu1 %v1795_v3  ;;  %1696 = vmatprep.subr.bf16.mxu0 %v1796_v5  ;;  %v1911_v23 = vpack.c.bf16 %v1890_v16, %v1883_v12  ;;  %v1915_v24 = vpack.c.bf16 %v1896_v18, %v1893_v17  ;;  %v1921_v26 = vld [vmem:[%s1873_s28 + $0x39] sm:$0xff]  ;;  %v1938_v31 = vld [vmem:[%s1873_s28 + $0x8] sm:$0xff]  ;;  %v233_v35 = vand.u32 7, %v203_v9  ;;  %v1963_v40 = vld [vmem:[%s1873_s28 + $0x10] sm:$0xff]  ;;  %v240_v61 = vand.u32 7, %v204_v47 }
  0x13   : > { %vm1923_vm3 = vcmp.gt.s32.totalorder %v219_v14, 0  ;;  %v320_v28 = vld [vmem:[%s1873_s28] sm:$0xff]  ;;  %vm1928_vm4 = vcmp.lt.s32.totalorder %v219_v14, 7  ;;  %1676 = vmatprep.mubr.msk.bf16.mxu0 %vm2339_vm0, %v368_v15  ;;  %v1935_v30 = vpack.c.bf16 %v1921_v26, %v1918_v25  ;;  %v1944_v34 = vld [vmem:[%s1873_s28 + $0xa] sm:$0xff]  ;;  %vm1946_vm5 = vcmp.gt.s32.totalorder %v226_v22, 0  ;;  %v1966_v41 = vld [vmem:[%s1873_s28 + $0x18] sm:$0xff] }
  0x14   : > { %v344_v32 = vsel %vm1901_vm1, %v320_v28, 0.0  ;;  %v556_v33 = vld [vmem:[%s1873_s28 + $0x2] sm:$0xff]  ;;  %1680 = vmatprep.mubr.msk.bf16.mxu1 %vm2339_vm0, %v1911_v23  ;;  %1677 = vmatmul.mubr.msk.bf16.vlgmr.msra.gmra.mxu0 %vm2339_vm0, %v1915_v24  ;;  %v345_v37 = vsel %vm1923_vm3, %v1938_v31, 0.0  ;;  %v581_v39 = vsel %vm1928_vm4, %v1944_v34, 0.0  ;;  %vm1970_vm6 = vcmp.gt.s32.totalorder %v233_v35, 0  ;;  %v1975_v45 = vld [vmem:[%s1873_s28 + $0x12] sm:$0xff] }
  0x15   : > { %v580_v38 = vsel %vm1905_vm2, %v556_v33, 0.0  ;;  %1681 = vmatmul.mubr.msk.bf16.vlgmr.msra.gmra.mxu1 %vm2339_vm0, %v1935_v30  ;;  %1697 = vmatpush3.bf16.msra.mxu0 %v1796_v5  ;;  %v352_v42 = vpack.c.bf16 %v345_v37, %v344_v32  ;;  %v1978_v46 = vld [vmem:[%s1873_s28 + $0x1a] sm:$0xff]  ;;  %v346_v48 = vsel %vm1946_vm5, %v1963_v40, 0.0  ;;  %v347_v49 = vsel %vm1970_vm6, %v1966_v41, 0.0  ;;  %v2014_v60 = vld [vmem:[%s1873_s28 + $0x22] sm:$0xff]  ;;  %v2020_v63 = vld [vmem:[%s1873_s28 + $0x2a] sm:$0xff] }
  0x16   : > { %v588_v43 = vpack.c.bf16 %v581_v39, %v580_v38  ;;  %1685 = vmatpush3.bf16.msra.mxu1 %v1795_v3  ;;  %1698 = vmatprep.subr.bf16.mxu0 %v1798_v13  ;;  %vm1989_vm7 = vcmp.lt.s32.totalorder %v226_v22, 7  ;;  %vm1993_vm8 = vcmp.lt.s32.totalorder %v233_v35, 7  ;;  %v353_v57 = vpack.c.bf16 %v347_v49, %v346_v48  ;;  %v2011_v58 = vld [vmem:[%s1873_s28 + $0x20] sm:$0xff]  ;;  %v2017_v62 = vld [vmem:[%s1873_s28 + $0x28] sm:$0xff]  ;;  %v2033_v6 = vld [vmem:[%s1873_s28 + $0x30] sm:$0xff] }
  0x17   : > { %1686 = vmatprep.subr.bf16.mxu1 %v1797_v19  ;;  %1688 = vmatprep.mubr.msk.bf16.mxu1 %vm2339_vm0, %v352_v42  ;;  %v582_v55 = vsel %vm1989_vm7, %v1975_v45, 0.0  ;;  %v583_v56 = vsel %vm1993_vm8, %v1978_v46, 0.0  ;;  %v247_v0 = vand.u32 7, %v205_v50  ;;  %v207_v2 = vadd.s32 56, %v1863_v4  ;;  %v2036_v7 = vld [vmem:[%s1873_s28 + $0x38] sm:$0xff]  ;;  %v1801_v15 = vld [vmem:[%s2335_s1 + $0x30] sm:$0xff]  }
  0x18   : > { %1700 = vmatprep.mubr.msk.bf16.mxu0 %vm2339_vm0, %v588_v43  ;;  %v589_v59 = vpack.c.bf16 %v583_v56, %v582_v55  ;;  %vm2024_vm9 = vcmp.gt.s32.totalorder %v240_v61, 0  ;;  %vm2028_vm10 = vcmp.lt.s32.totalorder %v240_v61, 7  ;;  %v2366_v5 = vmov 0  ;;  %v2039_v8 = vld [vmem:[%s1873_s28 + $0x32] sm:$0xff]  ;;  %v2042_v9 = vld [vmem:[%s1873_s28 + $0x3a] sm:$0xff]  ;;  %v1804_v55 = vld [vmem:[%s2335_s1 + $0x68] sm:$0xff]  }
  0x19   : > { %1699 = vmatpush3.bf16.msra.mxu0 %v1798_v13  ;;  %v2367_v5 = vsel %vm2028_vm10, 4294967295, %v2366_v5  ;;  %vm2045_vm11 = vcmp.gt.s32.totalorder %v247_v0, 0  ;;  %v348_v10 = vsel %vm2024_vm9, %v2011_v58, 0.0  ;;  %vm2052_vm12 = vcmp.lt.s32.totalorder %v247_v0, 7  ;;  %v1810_v3 = vld [vmem:[%s2335_s1 + $0x80] sm:$0xff]   ;;  %v1295_v52 = vld [vmem:[%s1873_s28 + $0x4a] sm:$0xff] }
  0x1a   : > { %1687 = vmatpush3.bf16.msra.mxu1 %v1797_v19  ;;  %1720 = vmatprep.subr.bf16.mxu0 %v1800_v54  ;;  %v2370_v13 = vmov 0  ;;  %v584_v14 = vsel %vm2028_vm10, %v2014_v60, 0.0  ;;  %v1802_v19 = vld [vmem:[%s2335_s1 + $0x40] sm:$0xff]   ;;  %v349_v22 = vsel %vm2045_vm11, %v2017_v62, 0.0  ;;  %v585_v28 = vsel %vm2052_vm12, %v2020_v63, 0.0 }
  0x1b   : > { %1708 = vmatprep.subr.bf16.mxu1 %v1799_v53  ;;  %v2371_v13 = vsel %vm2052_vm12, 4294967295, %v2370_v13  ;;  %v254_v32 = vand.u32 7, %v206_v1  ;;  %v261_v33 = vand.u32 7, %v207_v2  ;;  %v354_v35 = vpack.c.bf16 %v349_v22, %v348_v10  ;;  %v1805_v22 = vld [vmem:[%s2335_s1 + $0x50] sm:$0xff]  }
  0x1c   : > { %1701 = vmatmul.mubr.msk.bf16.vlgmr.msra.gmra.mxu0 %vm2339_vm0, %v589_v59  ;;  %v590_v37 = vpack.c.bf16 %v585_v28, %v584_v14  ;;  %v702_v38 = vsel %vm1901_vm1, %v1938_v31, 0.0  ;;  %v703_v39 = vsel %vm1923_vm3, %v1963_v40, 0.0  ;;  %v2376_v47 = vmov 0  ;;  %v1806_v28 = vld [vmem:[%s2335_s1 + $0x60] sm:$0xff]  }
  0x1d   : > { %1689 = vmatmul.mubr.msk.bf16.vlgmr.msra.gmra.mxu1 %vm2339_vm0, %v353_v57  ;;  %1721 = vmatpush3.bf16.msra.mxu0 %v1800_v54  ;;  %vm2078_vm13 = vcmp.gt.s32.totalorder %v254_v32, 0  ;;  %vm2082_vm14 = vcmp.gt.s32.totalorder %v261_v33, 0  ;;  %vm2086_vm15 = vcmp.lt.s32.totalorder %v254_v32, 7  ;;  %vm2090_vm0 = vcmp.lt.s32.totalorder %v261_v33, 7  ;;  %v1803_v54 = vld [vmem:[%s2335_s1 + $0x58] sm:$0xff]   ;;  %v1808_v33 = vld [vmem:[%s2335_s1 + $0x88] sm:$0xff]  }
  0x1e   : > { %1709 = vmatpush3.bf16.msra.mxu1 %v1799_v53  ;;  %1722 = vmatprep.subr.bf16.mxu0 %v1802_v19  ;;  %v2377_v47 = vsel %vm2086_vm15, 4294967295, %v2376_v47  ;;  %v2378_v48 = vmov 0  ;;  %vm2380_vm12 = vcmask 261120   ;;  %v350_v31 = vsel %vm2078_vm13, %v2033_v6, 0.0 }
  0x1f   : > { %v2379_v48 = vsel %vm2090_vm0, 4294967295, %v2378_v48  ;;  %1710 = vmatprep.subr.bf16.mxu1 %v1801_v15  ;;  %1692 = vmatprep.mubr.msk.bf16.mxu1 %vm2380_vm12, %v354_v35  ;;  %vm2381_vm10 = vmmov %vm2380_vm12  ;;  %v351_v49 = vsel %vm2082_vm14, %v2036_v7, 0.0  ;;  %v586_v50 = vsel %vm2086_vm15, %v2039_v8, 0.0  ;;  %v587_v53 = vsel %vm2090_vm0, %v2042_v9, 0.0 }
  0x20   : > { %1704 = vmatprep.mubr.msk.bf16.mxu0 %vm2381_vm10, %v590_v37  ;;  %v355_v56 = vpack.c.bf16 %v351_v49, %v350_v31  ;;  %v591_v57 = vpack.c.bf16 %v587_v53, %v586_v50  ;;  %v824_v59 = vpack.c.bf16 %v1893_v17, %v1880_v11  ;;  %v710_v61 = vpack.c.bf16 %v703_v39, %v702_v38  ;;  %vm2382_vm12 = vmmov %vm2381_vm10 }
  0x21   : > { %1723 = vmatpush3.bf16.msra.mxu0 %v1802_v19  ;;  %vm2383_vm0 = vmmov %vm2381_vm10  ;;  %v704_v0 = vsel %vm1946_vm5, %v1966_v41, 0.0  ;;  %v705_v11 = vsel %vm1970_vm6, %v2011_v58, 0.0  ;;  %v706_v17 = vsel %vm2024_vm9, %v2017_v62, 0.0  ;;  %v707_v1 = vsel %vm2045_vm11, %v2033_v6, 0.0  ;;  %v701_v19 = vld [vmem:[%s1873_s28 + $0x40] sm:$0xff] }
  0x22   : > { %1711 = vmatpush3.bf16.msra.mxu1 %v1801_v15  ;;  %1744 = vmatprep.subr.bf16.mxu0 %v1804_v55  ;;  %vm2384_vm15 = vmmov %vm2383_vm0  ;;  %v825_v2 = vpack.c.bf16 %v1883_v12, %v1896_v18  ;;  %v711_v10 = vpack.c.bf16 %v705_v11, %v704_v0  ;;  %v712_v14 = vpack.c.bf16 %v707_v1, %v706_v17  ;;  %v2146_v12 = vld [vmem:[%s1873_s28 + $0x41] sm:$0xff]  ;;  %v709_v18 = vsel %vm2082_vm14, %v701_v19, 0.0 }
  0x23   : > { %1732 = vmatprep.subr.bf16.mxu1 %v1803_v54  ;;  %v826_v15 = vpack.c.bf16 %v1918_v25, %v1890_v16  ;;  %v708_v16 = vsel %vm2078_vm13, %v2036_v7, 0.0  ;;  %v1060_v25 = vsel %vm1901_vm1, %v1963_v40, 0.0  ;;  %v1061_v32 = vsel %vm1923_vm3, %v1966_v41, 0.0  ;;  %vm2388_vm1 = vmmov %vm2383_vm0 }
  0x24   : > { %1705 = vmatmul.mubr.msk.bf16.gmra.mxu0 %vm2381_vm10, %v591_v57  ;;  %vm2386_vm10 = vmmov %vm2383_vm0  ;;  %v938_v35 = vsel %vm1905_vm2, %v1944_v34, 0.0  ;;  %v939_v20 = vsel %vm1928_vm4, %v1975_v45, 0.0  ;;  %v827_v40 = vpack.c.bf16 %v2146_v12, %v1921_v26  ;;  %v713_v41 = vpack.c.bf16 %v709_v18, %v708_v16  ;;  %v1809_v57 = vld [vmem:[%s2335_s1 + $0x70] sm:$0xff]  }
  0x25   : > { %1693 = vmatmul.mubr.msk.bf16.gmra.mxu1 %vm2382_vm12, %v355_v56  ;;  %1724 = vmatprep.mubr.msk.bf16.mxu0 %vm2383_vm0, %v824_v59  ;;  %vm2387_vm12 = vmmov %vm2383_vm0  ;;  %v1068_v37 = vpack.c.bf16 %v1061_v32, %v1060_v25  ;;  %v946_v38 = vpack.c.bf16 %v939_v20, %v938_v35  ;;  %v1062_v34 = vsel %vm1946_vm5, %v2011_v58, 0.0  ;;  %v1063_v26 = vsel %vm1970_vm6, %v2017_v62, 0.0  ;;  %v937_v56 = vld [vmem:[%s1873_s28 + $0x42] sm:$0xff] }
  0x26   : > { %1712 = vmatprep.mubr.msk.bf16.mxu1 %vm2384_vm15, %v710_v61  ;;  %vm2385_vm15 = vmmov %vm2383_vm0  ;;  %v940_v39 = vsel %vm1989_vm7, %v1978_v46, 0.0  ;;  %v941_v31 = vsel %vm1993_vm8, %v2014_v60, 0.0  ;;  %vm2391_vm5 = vnez %v2367_v5  ;;  %vm2392_vm6 = vnez %v2371_v13  ;;  %v1181_v5 = vld [vmem:[%s1873_s28 + $0x49] sm:$0xff] }
  0x27   : > { %vm2389_vm3 = vmmov %vm2383_vm0  ;;  %v942_v36 = vsel %vm2391_vm5, %v2020_v63, 0.0  ;;  %v943_v44 = vsel %vm2392_vm6, %v2039_v8, 0.0  ;;  %v1069_v58 = vpack.c.bf16 %v1063_v26, %v1062_v34  ;;  %v1064_v62 = vsel %vm2024_vm9, %v2033_v6, 0.0 }
  0x28   : > { %v1065_v49 = vsel %vm2045_vm11, %v2036_v7, 0.0  ;;  %v947_v50 = vpack.c.bf16 %v941_v31, %v940_v39  ;;  %v948_v53 = vpack.c.bf16 %v943_v44, %v942_v36  ;;  %vm2394_vm9 = vmmov %vm2383_vm0  ;;  %v1066_v6 = vsel %vm2078_vm13, %v701_v19, 0.0 }
  0x29   : > { %vm2395_vm11 = vmmov %vm2383_vm0  ;;  %v1296_v61 = vsel %vm1905_vm2, %v1975_v45, 0.0  ;;  %v1297_v42 = vsel %vm1928_vm4, %v1978_v46, 0.0  ;;  %v1298_v21 = vsel %vm1989_vm7, %v2014_v60, 0.0  ;;  %v1299_v29 = vsel %vm1993_vm8, %v2020_v63, 0.0 }
  0x2a   : > { %vm2398_vm13 = vmmov %vm2383_vm0  ;;  %v1304_v11 = vpack.c.bf16 %v1297_v42, %v1296_v61  ;;  %v1300_v45 = vsel %vm2391_vm5, %v2039_v8, 0.0  ;;  %v1301_v46 = vsel %vm2392_vm6, %v2042_v9, 0.0  ;;  %v1305_v51 = vpack.c.bf16 %v1299_v29, %v1298_v21 }
  0x2b   : > { %vm2400_vm2 = vmmov %vm2383_vm0  ;;  %v1306_v60 = vpack.c.bf16 %v1301_v46, %v1300_v45 }
  0x2c   : > { %1725 = vmatmul.mubr.msk.bf16.vlgmr.msra.gmra.mxu0 %vm2383_vm0, %v825_v2  ;;  %vm2401_vm4 = vmmov %vm2383_vm0 }
  0x2d   : > { %1713 = vmatmul.mubr.msk.bf16.vlgmr.msra.gmra.mxu1 %vm2385_vm15, %v711_v10  ;;  %1745 = vmatpush3.bf16.msra.mxu0 %v1804_v55  ;;  %vm2390_vm15 = vmmov %vm2383_vm0  ;;  %v1070_v55 = vpack.c.bf16 %v1065_v49, %v1064_v62 }
  0x2e   : > { %1733 = vmatpush3.bf16.msra.mxu1 %v1803_v54  ;;  %1716 = vmatprep.mubr.msk.bf16.mxu1 %vm2386_vm10, %v712_v14  ;;  %v1059_v54 = vld [vmem:[%s1873_s28 + $0x48] sm:$0xff]  ;;  %vm2393_vm10 = vmmov %vm2383_vm0 }
  0x2f   : > { %1728 = vmatprep.mubr.msk.bf16.mxu0 %vm2387_vm12, %v826_v15  ;;  %1734 = vmatprep.subr.bf16.mxu1 %v1805_v22  ;;  %v1067_v7 = vsel %vm2082_vm14, %v1059_v54, 0.0  ;;  %vm2396_vm12 = vnez %v2377_v47  ;;  %vm2399_vm14 = vmmov %vm2383_vm0 }
  0x30   : > { %1746 = vmatprep.subr.bf16.mxu0 %v1806_v28  ;;  %v944_v4 = vsel %vm2396_vm12, %v2042_v9, 0.0  ;;  %v1071_v43 = vpack.c.bf16 %v1067_v7, %v1066_v6  ;;  %vm2403_vm7 = vmmov %vm2383_vm0  ;;  %v1185_v9 = vpack.c.bf16 %v1181_v5, %v2146_v12 }
  0x31   : > { %1747 = vmatpush3.bf16.msra.mxu0 %v1806_v28  ;;  %vm2404_vm8 = vmmov %vm2383_vm0 }
  0x32   : > { %1735 = vmatpush3.bf16.msra.mxu1 %v1805_v22  ;;  %1768 = vmatprep.subr.bf16.mxu0 %v1808_v33  ;;  %vm2406_vm5 = vmmov %vm2383_vm0 }
  0x33   : > { %1756 = vmatprep.subr.bf16.mxu1 %v1807_v27  ;;  %vm2407_vm6 = vmmov %vm2383_vm0 }
  0x34   : > { %1729 = vmatmul.mubr.msk.bf16.gmra.mxu0 %vm2388_vm1, %v827_v40  ;;  %vm2397_vm1 = vnez %v2379_v48 }
  0x35   : > { %1717 = vmatmul.mubr.msk.bf16.gmra.mxu1 %vm2389_vm3, %v713_v41  ;;  %1748 = vmatprep.mubr.msk.bf16.mxu0 %vm2383_vm0, %v1068_v37  ;;  %v945_v59 = vsel %vm2397_vm1, %v937_v56, 0.0  ;;  %vm2402_vm3 = vmmov %vm2383_vm0  ;;  %v1303_v63 = vsel %vm2397_vm1, %v1295_v52, 0.0 }
  0x36   : > { %1736 = vmatprep.mubr.msk.bf16.mxu1 %vm2390_vm15, %v946_v38  ;;  %v949_v0 = vpack.c.bf16 %v945_v59, %v944_v4  ;;  %vm2405_vm15 = vmmov %vm2383_vm0 }
  0x37   : > { %vm2409_vm1 = vmmov %vm2383_vm0 }
  0x3c   : > { %1749 = vmatmul.mubr.msk.bf16.vlgmr.msra.gmra.mxu0 %vm2393_vm10, %v1069_v58 }
  0x3d   : > { %1737 = vmatmul.mubr.msk.bf16.vlgmr.msra.gmra.mxu1 %vm2394_vm9, %v947_v50  ;;  %1769 = vmatpush3.bf16.msra.mxu0 %v1808_v33 }
  0x3e   : > { %1757 = vmatpush3.bf16.msra.mxu1 %v1807_v27  ;;  %1740 = vmatprep.mubr.msk.bf16.mxu1 %vm2395_vm11, %v948_v53  ;;  %vm2408_vm11 = vmmov %vm2383_vm0 }
  0x3f   : > { %1752 = vmatprep.mubr.msk.bf16.mxu0 %vm2398_vm13, %v1070_v55  ;;  %1758 = vmatprep.subr.bf16.mxu1 %v1809_v57  ;;  %vm2410_vm13 = vmmov %vm2383_vm0 }
  0x40   : > { %1770 = vmatprep.subr.bf16.mxu0 %v1810_v3 }
  0x41   : > { %1771 = vmatpush3.bf16.msra.mxu0 %v1810_v3 }
  0x42   : > { %1759 = vmatpush3.bf16.msra.mxu1 %v1809_v57 }
  0x44   : > { %1753 = vmatmul.mubr.msk.bf16.gmra.mxu0 %vm2399_vm14, %v1071_v43 }
  0x45   : > { %1741 = vmatmul.mubr.msk.bf16.gmra.mxu1 %vm2400_vm2, %v949_v0  ;;  %1772 = vmatprep.mubr.msk.bf16.mxu0 %vm2401_vm4, %v1304_v11  ;;  %vm2411_vm4 = vmmov %vm2383_vm0 }
  0x46   : > { %1760 = vmatprep.mubr.msk.bf16.mxu1 %vm2402_vm3, %v1915_v24  ;;  %v1302_v24 = vsel %vm2396_vm12, %v937_v56, 0.0 }
  0x47   : > { %v1307_v8 = vpack.c.bf16 %v1303_v63, %v1302_v24 }
  0x4c   : > { %1773 = vmatmul.mubr.msk.bf16.vlgmr.msra.gmra.mxu0 %vm2403_vm7, %v1305_v51  ;;  %vm2412_vm7 = vmmov %vm2383_vm0 }
  0x4d   : > { %1761 = vmatmul.mubr.msk.bf16.vlgmr.msra.gmra.mxu1 %vm2404_vm8, %v1911_v23  ;;  %1776 = vmatprep.mubr.msk.bf16.mxu0 %vm2383_vm0, %v1306_v60 }
  0x4e   : > { %1764 = vmatprep.mubr.msk.bf16.mxu1 %vm2405_vm15, %v1935_v30 }
  0x54   : > { %1777 = vmatmul.mubr.msk.bf16.gmra.mxu0 %vm2406_vm5, %v1307_v8  ;;  %vm2413_vm5 = vmmov %vm2383_vm0 }
  0x55   : > { %1765 = vmatmul.mubr.msk.bf16.gmra.mxu1 %vm2407_vm6, %v1185_v9  ;;  %vm2414_vm6 = vmmov %vm2383_vm0 }
  0xd4   : > { %v1678_v23 = vpop.f32.mrf.mxu0 }
  0xd5   : > { %v1682_v13 = vpop.f32.mrf.mxu1 }
  0xd6   : > { %v436_v17 = vpop.f32.mrf.mxu0 }
  0xd7   : > { %v452_v1 = vpop.f32.mrf.mxu1 }
  0xd8   : > { %v1679_v47 = vpop.f32.mrf.mxu0 }
  0xd9   : > { %v1683_v2 = vpop.f32.mrf.mxu1 }
  0xda   : > { %v439_v10 = vpop.f32.mrf.mxu0 }
  0xdb   : > { %v2262_v48 = vpop.f32.mrf.mxu1 }
  0xdc   : > { %v1702_v14 = vpop.f32.mrf.mxu0 }
  0xdd   : > { %v1690_v15 = vpop.f32.mrf.mxu1 }
  0xde   : > { %v655_v30 = vpop.f32.mrf.mxu0  ;;  %v534_v56 = vadd.f32 %v1690_v15, %v1678_v23 }
  0xdf   : > { %v525_v19 = vpop.f32.mrf.mxu1 }
  0xe0   : > { %v1703_v22 = vpop.f32.mrf.mxu0  ;;  %v526_v6 = vadd.f32 %v525_v19, %v436_v17  ;;  %v688_v59 = vadd.f32 %v1702_v14, %v534_v56 }
  0xe1   : > { %v1691_v28 = vpop.f32.mrf.mxu1 }
  0xe2   : > { %v658_v12 = vpop.f32.mrf.mxu0  ;;  %v537_v61 = vadd.f32 %v1691_v28, %v1679_v47  ;;  %v686_v0 = vadd.f32 %v655_v30, %v526_v6 }
  0xe3   : > { %v528_v16 = vpop.f32.mrf.mxu1 }
  0xe4   : > { %v1706_v18 = vpop.f32.mrf.mxu0  ;;  %v529_v29 = vadd.f32 %v528_v16, %v439_v10  ;;  %v689_v46 = vadd.f32 %v1703_v22, %v537_v61 }
  0xe5   : > { %v1694_v25 = vpop.f32.mrf.mxu1 }
  0xe6   : > { %v671_v32 = vpop.f32.mrf.mxu0  ;;  %v550_v52 = vadd.f32 %v1694_v25, %v1682_v13  ;;  %v687_v23 = vadd.f32 %v658_v12, %v529_v29 }
  0xe7   : > { %v541_v33 = vpop.f32.mrf.mxu1 }
  0xe8   : > { %v1707_v35 = vpop.f32.mrf.mxu0  ;;  %v542_v24 = vadd.f32 %v541_v33, %v452_v1  ;;  %v692_v19 = vadd.f32 %v1706_v18, %v550_v52 }
  0xe9   : > { %v1695_v20 = vpop.f32.mrf.mxu1 }
  0xea   : > { %v2264_v27 = vpop.f32.mrf.mxu0  ;;  %v553_v17 = vadd.f32 %v1695_v20, %v1683_v2  ;;  %v690_v10 = vadd.f32 %v671_v32, %v542_v24 }
  0xeb   : > { %v544_v40 = vpop.f32.mrf.mxu1 }
  0xec   : > { %v1726_v41 = vpop.f32.mrf.mxu0  ;;  %v545_v22 = vadd.f32 %v544_v40, %v2262_v48  ;;  %v693_v25 = vadd.f32 %v1707_v35, %v553_v17  ;;  %v2281_v35 = vld [vmem:[%s2336_s2] ss:$0 sm:$0xff] }
  0xed   : > { %v1714_v37 = vpop.f32.mrf.mxu1 }
  0xee   : > { %v891_v38 = vpop.f32.mrf.mxu0  ;;  %v810_v11 = vadd.f32 %v1714_v37, %v688_v59 }
  0xef   : > { %v777_v34 = vpop.f32.mrf.mxu1 }
  0xf0   : > { %v1727_v26 = vpop.f32.mrf.mxu0  ;;  %v808_v51 = vadd.f32 %v777_v34, %v686_v0  ;;  %v924_v5 = vadd.f32 %v1726_v41, %v810_v11  ;;  %v691_v34 = vadd.f32 %v2264_v27, %v545_v22 }
  0xf1   : > { %v1715_v39 = vpop.f32.mrf.mxu1 }
  0xf2   : > { %v894_v31 = vpop.f32.mrf.mxu0  ;;  %v811_v8 = vadd.f32 %v1715_v39, %v689_v46  ;;  %v922_v14 = vadd.f32 %v891_v38, %v808_v51 }
  0xf3   : > { %v780_v36 = vpop.f32.mrf.mxu1 }
  0xf4   : > { %v1730_v44 = vpop.f32.mrf.mxu0  ;;  %v809_v28 = vadd.f32 %v780_v36, %v687_v23  ;;  %v925_v37 = vadd.f32 %v1727_v26, %v811_v8 }
  0xf5   : > { %v1718_v58 = vpop.f32.mrf.mxu1 }
  0xf6   : > { %v907_v62 = vpop.f32.mrf.mxu0  ;;  %v814_v33 = vadd.f32 %v1718_v58, %v692_v19  ;;  %v923_v39 = vadd.f32 %v894_v31, %v809_v28 }
  0xf7   : > { %v793_v49 = vpop.f32.mrf.mxu1 }
  0xf8   : > { %v2266_v50 = vpop.f32.mrf.mxu0  ;;  %v812_v41 = vadd.f32 %v793_v49, %v690_v10  ;;  %v928_v26 = vadd.f32 %v1730_v44, %v814_v33  ;;  %v2288_v44 = vld [vmem:[%s2337_s3] ss:$0 sm:$0xff] }
  0xf9   : > { %v1719_v53 = vpop.f32.mrf.mxu1 }
  0xfa   : > { %v2268_v54 = vpop.f32.mrf.mxu0  ;;  %v815_v18 = vadd.f32 %v1719_v53, %v693_v25  ;;  %v926_v36 = vadd.f32 %v907_v62, %v812_v41 }
  0xfb   : > { %v796_v55 = vpop.f32.mrf.mxu1 }
  0xfc   : > { %v1750_v57 = vpop.f32.mrf.mxu0  ;;  %v929_v53 = vadd.f32 %v2266_v50, %v815_v18 }
  0xfd   : > { %v1738_v3 = vpop.f32.mrf.mxu1 }
  0xfe   : > { %v1135_v7 = vpop.f32.mrf.mxu0  ;;  %v1046_v15 = vadd.f32 %v1738_v3, %v924_v5  ;;  %v813_v3 = vadd.f32 %v796_v55, %v691_v34 }
  0xff   : > { %v1013_v4 = vpop.f32.mrf.mxu1 }
 0x100   : > { %v1751_v42 = vpop.f32.mrf.mxu0  ;;  %v1044_v13 = vadd.f32 %v1013_v4, %v922_v14  ;;  %v1168_v2 = vadd.f32 %v1750_v57, %v1046_v15 }
 0x101   : > { %v1739_v43 = vpop.f32.mrf.mxu1 }
 0x102   : > { %v1138_v21 = vpop.f32.mrf.mxu0  ;;  %v1047_v20 = vadd.f32 %v1739_v43, %v925_v37  ;;  %v1166_v56 = vadd.f32 %v1135_v7, %v1044_v13 }
 0x103   : > { %v1016_v45 = vpop.f32.mrf.mxu1 }
 0x104   : > { %v2270_v60 = vpop.f32.mrf.mxu0  ;;  %v1045_v6 = vadd.f32 %v1016_v45, %v923_v39  ;;  %v1169_v49 = vadd.f32 %v1751_v42, %v1047_v20  ;;  %v927_v42 = vadd.f32 %v2268_v54, %v813_v3 }
 0x105   : > { %v1742_v63 = vpop.f32.mrf.mxu1 }
 0x106   : > { %v1151_v9 = vpop.f32.mrf.mxu0  ;;  %v1050_v7 = vadd.f32 %v1742_v63, %v928_v26  ;;  %v1167_v0 = vadd.f32 %v1138_v21, %v1045_v6 }
 0x107   : > { %v1029_v47 = vpop.f32.mrf.mxu1 }
 0x108   : > { %v2272_v30 = vpop.f32.mrf.mxu0  ;;  %v1048_v4 = vadd.f32 %v1029_v47, %v926_v36  ;;  %v1172_v52 = vadd.f32 %v2270_v60, %v1050_v7 }
 0x109   : > { %v1743_v16 = vpop.f32.mrf.mxu1 }
 0x10a   : > { %v2275_v1 = vpop.f32.mrf.mxu0  ;;  %v1051_v11 = vadd.f32 %v1743_v16, %v929_v53  ;;  %v1170_v24 = vadd.f32 %v1151_v9, %v1048_v4 }
 0x10b   : > { %v1032_v12 = vpop.f32.mrf.mxu1 }
 0x10c   : > { %v1774_v38 = vpop.f32.mrf.mxu0  ;;  %v1049_v54 = vadd.f32 %v1032_v12, %v927_v42  ;;  %v1173_v47 = vadd.f32 %v2272_v30, %v1051_v11 }
 0x10d   : > { %v1762_v32 = vpop.f32.mrf.mxu1 }
 0x10e   : > { %v1282_v48 = vadd.f32 %v1762_v32, %v1168_v2  ;;  %v1371_v40 = vpop.f32.mrf.mxu0  ;;  %v1171_v30 = vadd.f32 %v2275_v1, %v1049_v54 }
 0x10f   : > { %v1249_v58 = vpop.f32.mrf.mxu1 }
 0x110   : > { %v1404_v57 = vadd.f32 %v1774_v38, %v1282_v48  ;;  %v1280_v27 = vadd.f32 %v1249_v58, %v1166_v56  ;;  %v1775_v31 = vpop.f32.mrf.mxu0 }
 0x111   : > { %v1763_v62 = vpop.f32.mrf.mxu1 }
 0x112   : > { %v1419_v55 = vadd.f32 %v2281_v35, %v1404_v57  ;;  %v1402_v59 = vadd.f32 %v1371_v40, %v1280_v27  ;;  %v1283_v61 = vadd.f32 %v1763_v62, %v1169_v49  ;;  %v1374_v43 = vpop.f32.mrf.mxu0 }
 0x113   : > { %v1252_v29 = vpop.f32.mrf.mxu1 }
 0x114   : > { %vm1427_vm10 = vcmp.ge.f32.partialorder %v1419_v55, 0.0  ;;  %v1442_v50 = vmul.f32 %v2288_v44, %v1419_v55  ;;  %v1417_v45 = vadd.f32 %v2281_v35, %v1402_v59  ;;  %v1405_v46 = vadd.f32 %v1775_v31, %v1283_v61  ;;  %v1778_v51 = vpop.f32.mrf.mxu0 }
 0x115   : > { %v1281_v21 = vadd.f32 %v1252_v29, %v1167_v0  ;;  %v1766_v63 = vpop.f32.mrf.mxu1 }
 0x116   : > { %v1450_v5 = vsel %vm1427_vm10, %v1419_v55, %v1442_v50  ;;  %vm1425_vm9 = vcmp.ge.f32.partialorder %v1417_v45, 0.0  ;;  %v1440_v8 = vmul.f32 %v2288_v44, %v1417_v45  ;;  %v1420_v23 = vadd.f32 %v2281_v35, %v1405_v46  ;;  %v1387_v17 = vpop.f32.mrf.mxu0 }
 0x117   : > { %1458 = vst.msk [vmem:[%s2295_s16 + $0x10] sm:$0xff] %vm2408_vm11, %v1450_v5  ;;  %v1403_v14 = vadd.f32 %v1374_v43, %v1281_v21  ;;  %v1286_v15 = vadd.f32 %v1766_v63, %v1172_v52  ;;  %v1265_v60 = vpop.f32.mrf.mxu1 }
 0x118   : > { %v1448_v9 = vsel %vm1425_vm9, %v1417_v45, %v1440_v8  ;;  %vm1428_vm12 = vcmp.ge.f32.partialorder %v1420_v23, 0.0  ;;  %v1443_v19 = vmul.f32 %v2288_v44, %v1420_v23  ;;  %v1284_v10 = vadd.f32 %v1265_v60, %v1170_v24  ;;  %v1779_v37 = vpop.f32.mrf.mxu0 }
 0x119   : > { %1456 = vst.msk [vmem:[%s2295_s16] sm:$0xff] %vm2409_vm1, %v1448_v9  ;;  %v1418_v22 = vadd.f32 %v2281_v35, %v1403_v14  ;;  %v1408_v28 = vadd.f32 %v1778_v51, %v1286_v15  ;;  %v1767_v16 = vpop.f32.mrf.mxu1 }
 0x11a   : > { %v1451_v13 = vsel %vm1428_vm12, %v1420_v23, %v1443_v19  ;;  %v1406_v25 = vadd.f32 %v1387_v17, %v1284_v10  ;;  %v1287_v33 = vadd.f32 %v1767_v16, %v1173_v47  ;;  %v1390_v18 = vpop.f32.mrf.mxu0 }
 0x11b   : > { %1459 = vst.msk [vmem:[%s2295_s16 + $0x18] sm:$0xff] %vm2410_vm13, %v1451_v13  ;;  %vm1426_vm14 = vcmp.ge.f32.partialorder %v1418_v22, 0.0  ;;  %v1441_v41 = vmul.f32 %v2288_v44, %v1418_v22  ;;  %v1423_v12 = vadd.f32 %v2281_v35, %v1408_v28  ;;  %v1268_v2 = vpop.f32.mrf.mxu1 }
 0x11c   : > { %v1421_v20 = vadd.f32 %v2281_v35, %v1406_v25  ;;  %v1409_v38 = vadd.f32 %v1779_v37, %v1287_v33  ;;  %v1285_v34 = vadd.f32 %v1268_v2, %v1171_v30 }
 0x11d   : > { %v1449_v39 = vsel %vm1426_vm14, %v1418_v22, %v1441_v41  ;;  %vm1431_vm2 = vcmp.ge.f32.partialorder %v1423_v12, 0.0  ;;  %v1446_v1 = vmul.f32 %v2288_v44, %v1423_v12 }
 0x11e   : > { %1457 = vst.msk [vmem:[%s2295_s16 + $0x8] sm:$0xff] %vm2411_vm4, %v1449_v39  ;;  %vm1429_vm3 = vcmp.ge.f32.partialorder %v1421_v20, 0.0  ;;  %v1444_v32 = vmul.f32 %v2288_v44, %v1421_v20  ;;  %v1424_v56 = vadd.f32 %v2281_v35, %v1409_v38  ;;  %v1407_v48 = vadd.f32 %v1390_v18, %v1285_v34 }
 0x11f   : > { %v1454_v40 = vsel %vm1431_vm2, %v1423_v12, %v1446_v1 }
 0x120   : > { %1462 = vst.msk [vmem:[%s2295_s16 + $0x30] sm:$0xff] %vm2412_vm7, %v1454_v40  ;;  %v1452_v26 = vsel %vm1429_vm3, %v1421_v20, %v1444_v32  ;;  %vm1432_vm8 = vcmp.ge.f32.partialorder %v1424_v56, 0.0  ;;  %v1447_v36 = vmul.f32 %v2288_v44, %v1424_v56  ;;  %v1422_v3 = vadd.f32 %v2281_v35, %v1407_v48 }
 0x121   : > { %1460 = vst.msk [vmem:[%s2295_s16 + $0x20] sm:$0xff] %vm2383_vm0, %v1452_v26 }
 0x122   : > { %v1455_v6 = vsel %vm1432_vm8, %v1424_v56, %v1447_v36  ;;  %vm1430_vm15 = vcmp.ge.f32.partialorder %v1422_v3, 0.0  ;;  %v1445_v58 = vmul.f32 %v2288_v44, %v1422_v3 }
 0x123   : > { %1463 = vst.msk [vmem:[%s2295_s16 + $0x38] sm:$0xff] %vm2413_vm5, %v1455_v6 }
 0x124   : > { %v1453_v49 = vsel %vm1430_vm15, %v1422_v3, %v1445_v58 }
 0x125   : > { %1461 = vst.msk [vmem:[%s2295_s16 + $0x28] sm:$0xff] %vm2414_vm6, %v1453_v49 }
 0x126 PF: > { %s14_s15 = sadd.s32 1, %s1817_s15  }
 0x127   : > { %p11_p4 = scmp.ge.s32.totalorder %s14_s15, 6  }
 0x129   :  { %13 = sbr.rel (!%p11_p4) target bundleno = 1 (0x1), region = 74 }

// kernel: decoder1v1_forward.12
= control target key start
LH: loop header
LB: loop body
LE: loop exit
PB: predicated region body
PF: predicated region fallthrough
CT: control target
= control target key end

     0   :  { %s2197_s18 = smov 0   ;;  %s2760_s0 = inlined_call_operand.vmem [shape: f32[4,82,64], index: 0, kind: input, shape index: {}]   ;;  %s2761_s1 = inlined_call_operand.vmem [shape: bf16[9,64,64], index: 1, kind: input, shape index: {}]   ;;  %s2762_s2 = inlined_call_operand.vmem [shape: f32[1,64], index: 2, kind: input, shape index: {}]   ;;  %s2763_s3 = inlined_call_operand.vmem [shape: f32[1,64], index: 3, kind: input, shape index: {}]   ;;  %s2764_s4 = inlined_call_operand.vmem [shape: f32[4,64,64], index: 4, kind: input, shape index: {}]   ;;  %s2765_s5 = inlined_call_operand.vmem [shape: f32[4,64,64], index: 5, kind: output, shape index: {}]  }
   0x1 LB: > { %s1738_s19 = sadd.s32 4294967295, %s2165_s18   ;;  %p1742_p0 = scmp.ge.s32.totalorder %s2165_s18, 1  ;;  %s2165_s18 = sphi %s2197_s18, %s15_s18  }
   0x2   : > { %p197_p1 = scmp.lt.s32.totalorder %s2165_s18, 5 }
   0x4   : > { %p198_p2 = pnand %p1742_p0, %p197_p1 }
   0x6   : > { %201 = sbr.rel (%p198_p2) target bundleno = 306 (0x132), region = 40 }
   0xb   : > { %v2123_v0 = vld [vmem:[%s2761_s1 + $0x38] sm:$0xff]   ;;  %p230_p3 = scmp.lt.s32.totalorder %s1738_s19, 3  ;;  %v246_v1 = vlaneseq  ;;  %v2125_v3 = vld [vmem:[%s2761_s1 + $0x30] sm:$0xff]   ;;  %v2127_v6 = vld [vmem:[%s2761_s1 + $0x28] sm:$0xff]   ;;  %vm2766_vm0 = vcmask 523264   ;;  %v2776_v35 = vmov 0 }
   0xc   : > { %v2124_v2 = vld [vmem:[%s2761_s1 + $0x18] sm:$0xff]   ;;  %1962 = vmatprep.subr.bf16.mxu0 %v2123_v0  ;;  %v2126_v4 = vld [vmem:[%s2761_s1 + $0x10] sm:$0xff]   ;;  %v2128_v7 = vld [vmem:[%s2761_s1 + $0x8] sm:$0xff]  }
   0xd   : > { %s2840_s19 = smov (!%p230_p3, %s1738_s19), 3  ;;  %1978 = vmatprep.subr.bf16.mxu1 %v2124_v2  ;;  %1963 = vmatpush3.bf16.msra.mxu0 %v2123_v0  ;;  %v2219_v5 = vshrl.u32 %v246_v1, 7  ;;  %v2129_v10 = vld [vmem:[%s2761_s1 + $0x20] sm:$0xff]   ;;  %v2131_v31 = vld [vmem:[%s2761_s1 + $0x58] sm:$0xff]   ;;  %v2133_v45 = vld [vmem:[%s2761_s1 + $0x50] sm:$0xff]  }
   0xe   : > { %1979 = vmatpush3.bf16.msra.mxu1 %v2124_v2  ;;  %1964 = vmatprep.subr.bf16.mxu0 %v2125_v3  ;;  %s2114_s30 = smul.u32 88, %s2840_s19  ;;  %v2130_v17 = vld [vmem:[%s2761_s1] sm:$0xff]   ;;  %v2132_v39 = vld [vmem:[%s2761_s1 + $0x78] sm:$0xff]   ;;  %v2134_v53 = vld [vmem:[%s2761_s1 + $0x70] sm:$0xff]   ;;  %v2786_v2 = vmov 0 }
   0xf   : > { %1980 = vmatprep.subr.bf16.mxu1 %v2126_v4  ;;  %v248_v8 = vadd.s32 8, %v2219_v5  ;;  %v259_v9 = vand.u32 7, %v2219_v5  ;;  %v249_v16 = vadd.s32 16, %v2219_v5  ;;  %v250_v26 = vadd.s32 24, %v2219_v5 }
  0x10   : > { %s2232_s10 = scalar_lea.vmem %s2760_s0, %s2114_s30  ;;  %v2291_v34 = vadd.s32 32, %v2219_v5  ;;  %v2311_v40 = vadd.s32 40, %v2219_v5  ;;  %v2364_v58 = vadd.s32 48, %v2219_v5  ;;  %v254_v0 = vadd.s32 56, %v2219_v5 }
  0x11   : > { %1965 = vmatpush3.bf16.msra.mxu0 %v2125_v3  ;;  %v266_v11 = vand.u32 7, %v248_v8  ;;  %v411_v12 = vld [vmem:[%s2232_s10 + $0x1] sm:$0xff]  ;;  %v2240_v13 = vld [vmem:[%s2232_s10 + $0x9] sm:$0xff]  ;;  %vm2242_vm1 = vcmp.gt.s32.totalorder %v259_v9, 0  ;;  %v2266_v24 = vld [vmem:[%s2232_s10 + $0x11] sm:$0xff]  ;;  %v273_v29 = vand.u32 7, %v249_v16 }
  0x12   : > { %1981 = vmatpush3.bf16.msra.mxu1 %v2126_v4  ;;  %1966 = vmatprep.subr.bf16.mxu0 %v2127_v6  ;;  %v367_v15 = vld [vmem:[%s2232_s10] sm:$0xff]  ;;  %v419_v18 = vpack.c.bf16 %v2240_v13, %v411_v12  ;;  %v2257_v20 = vld [vmem:[%s2232_s10 + $0x8] sm:$0xff]  ;;  %v2273_v27 = vld [vmem:[%s2232_s10 + $0x10] sm:$0xff]  ;;  %v280_v30 = vand.u32 7, %v250_v26  ;;  %vm2313_vm6 = vcmp.lt.s32.totalorder %v259_v9, 7  ;;  %v287_v56 = vand.u32 7, %v2291_v34 }
  0x13   : > { %1982 = vmatprep.subr.bf16.mxu1 %v2128_v7  ;;  %vm2252_vm2 = vcmp.gt.s32.totalorder %v266_v11, 0  ;;  %v391_v21 = vsel %vm2242_vm1, %v367_v15, 0.0  ;;  %v2269_v25 = vld [vmem:[%s2232_s10 + $0x19] sm:$0xff]  ;;  %vm2286_vm3 = vcmp.gt.s32.totalorder %v273_v29, 0  ;;  %vm2297_vm5 = vcmp.lt.s32.totalorder %v273_v29, 7  ;;  %v2349_v52 = vld [vmem:[%s2232_s10 + $0x28] sm:$0xff] }
  0x14   : > { %v392_v22 = vsel %vm2252_vm2, %v2257_v20, 0.0  ;;  %1970 = vmatprep.mubr.msk.bf16.mxu0 %vm2766_vm0, %v419_v18  ;;  %v2276_v28 = vld [vmem:[%s2232_s10 + $0x18] sm:$0xff]  ;;  %v2284_v32 = vpack.c.bf16 %v2269_v25, %v2266_v24  ;;  %vm2293_vm4 = vcmp.gt.s32.totalorder %v280_v30, 0  ;;  %v393_v37 = vsel %vm2286_vm3, %v2273_v27, 0.0  ;;  %v2346_v51 = vld [vmem:[%s2232_s10 + $0x20] sm:$0xff]  ;;  %v2359_v55 = vld [vmem:[%s2232_s10 + $0x29] sm:$0xff] }
  0x15   : > { %1967 = vmatpush3.bf16.msra.mxu0 %v2127_v6  ;;  %v399_v23 = vpack.c.bf16 %v392_v22, %v391_v21  ;;  %v2777_v35 = vsel %vm2293_vm4, 4294967295, %v2776_v35  ;;  %v2305_v38 = vld [vmem:[%s2232_s10 + $0x12] sm:$0xff]  ;;  %vm2317_vm7 = vcmp.lt.s32.totalorder %v266_v11, 7  ;;  %v797_v43 = vsel %vm2242_vm1, %v2257_v20, 0.0  ;;  %v2335_v48 = vld [vmem:[%s2232_s10 + $0x1a] sm:$0xff]  ;;  %v2414_v11 = vld [vmem:[%s2232_s10 + $0x22] sm:$0xff] }
  0x16   : > { %1983 = vmatpush3.bf16.msra.mxu1 %v2128_v7  ;;  %1968 = vmatprep.subr.bf16.mxu0 %v2129_v10  ;;  %v394_v44 = vsel %vm2293_vm4, %v2276_v28, 0.0  ;;  %vm2330_vm8 = vcmp.lt.s32.totalorder %v280_v30, 7  ;;  %v798_v49 = vsel %vm2252_vm2, %v2273_v27, 0.0  ;;  %v661_v50 = vsel %vm2297_vm5, %v2305_v38, 0.0  ;;  %v2356_v54 = vld [vmem:[%s2232_s10 + $0x21] sm:$0xff]  ;;  %v2377_v62 = vld [vmem:[%s2232_s10 + $0x31] sm:$0xff] }
  0x17   : > { %1984 = vmatprep.subr.bf16.mxu1 %v2130_v17  ;;  %1986 = vmatprep.mubr.msk.bf16.mxu1 %vm2766_vm0, %v399_v23  ;;  %v400_v47 = vpack.c.bf16 %v394_v44, %v393_v37  ;;  %v294_v57 = vand.u32 7, %v2311_v40  ;;  %v662_v59 = vsel %vm2330_vm8, %v2335_v48, 0.0  ;;  %v799_v60 = vsel %vm2286_vm3, %v2276_v28, 0.0  ;;  %v2380_v63 = vld [vmem:[%s2232_s10 + $0x39] sm:$0xff]  ;;  %v2384_v1 = vld [vmem:[%s2232_s10 + $0x30] sm:$0xff]  ;;  %v2136_v16 = vld [vmem:[%s2761_s1 + $0x68] sm:$0xff]  }
  0x18   : > { %v2374_v61 = vpack.c.bf16 %v2359_v55, %v2356_v54  ;;  %vm2386_vm9 = vcmp.gt.s32.totalorder %v287_v56, 0  ;;  %v2788_v3 = vmov 0  ;;  %v301_v4 = vand.u32 7, %v2364_v58  ;;  %v2396_v6 = vld [vmem:[%s2232_s10 + $0x38] sm:$0xff]  ;;  %v2137_v22 = vld [vmem:[%s2761_s1 + $0x40] sm:$0xff]   ;;  %v636_v34 = vld [vmem:[%s2232_s10 + $0xa] sm:$0xff] }
  0x19   : > { %1969 = vmatpush3.bf16.msra.mxu0 %v2129_v10  ;;  %v2787_v2 = vsel %vm2386_vm9, 4294967295, %v2786_v2  ;;  %vm2390_vm10 = vcmp.gt.s32.totalorder %v294_v57, 0  ;;  %v395_v5 = vsel %vm2386_vm9, %v2346_v51, 0.0  ;;  %v2408_v8 = vpack.c.bf16 %v2380_v63, %v2377_v62  ;;  %v2135_v10 = vld [vmem:[%s2761_s1 + $0x48] sm:$0xff]   ;;  %v2138_v30 = vld [vmem:[%s2761_s1 + $0x60] sm:$0xff]  }
  0x1a   : > { %1985 = vmatpush3.bf16.msra.mxu1 %v2130_v17  ;;  %1994 = vmatprep.subr.bf16.mxu0 %v2131_v31  ;;  %v2789_v3 = vsel %vm2390_vm10, 4294967295, %v2788_v3  ;;  %v396_v7 = vsel %vm2390_vm10, %v2349_v52, 0.0  ;;  %v308_v9 = vand.u32 7, %v254_v0  ;;  %vm2416_vm11 = vcmp.gt.s32.totalorder %v301_v4, 0  ;;  %v2424_v17 = vld [vmem:[%s2232_s10 + $0x2a] sm:$0xff] }
  0x1b   : > { %2010 = vmatprep.subr.bf16.mxu1 %v2132_v39  ;;  %v401_v12 = vpack.c.bf16 %v396_v7, %v395_v5  ;;  %v397_v20 = vsel %vm2416_vm11, %v2384_v1, 0.0  ;;  %v805_v23 = vpack.c.bf16 %v798_v49, %v797_v43  ;;  %v800_v26 = vsel %vm2293_vm4, %v2346_v51, 0.0  ;;  %v2141_v7 = vld [vmem:[%s2761_s1 + $0x90] sm:$0xff]  }
  0x1c   : > { %1971 = vmatmul.mubr.msk.bf16.vlgmr.msra.gmra.mxu0 %vm2766_vm0, %v2284_v32  ;;  %vm2426_vm12 = vcmp.gt.s32.totalorder %v308_v9, 0  ;;  %vm2450_vm13 = vcmp.lt.s32.totalorder %v287_v56, 7  ;;  %vm2454_vm14 = vcmp.lt.s32.totalorder %v294_v57, 7  ;;  %v660_v43 = vsel %vm2317_vm7, %v636_v34, 0.0  ;;  %v2140_v57 = vld [vmem:[%s2761_s1 + $0xb8] sm:$0xff]   ;;  %v1340_v18 = vld [vmem:[%s2232_s10 + $0x49] sm:$0xff] }
  0x1d   : > { %1987 = vmatmul.mubr.msk.bf16.vlgmr.msra.gmra.mxu1 %vm2766_vm0, %v400_v47  ;;  %1995 = vmatpush3.bf16.msra.mxu0 %v2131_v31  ;;  %v398_v21 = vsel %vm2426_vm12, %v2396_v6, 0.0  ;;  %v635_v31 = vld [vmem:[%s2232_s10 + $0x2] sm:$0xff]  ;;  %v663_v47 = vsel %vm2450_vm13, %v2414_v11, 0.0  ;;  %v664_v49 = vsel %vm2454_vm14, %v2424_v17, 0.0  ;;  %v668_v56 = vpack.c.bf16 %v662_v59, %v661_v50  ;;  %v2499_v59 = vld [vmem:[%s2232_s10 + $0x32] sm:$0xff] }
  0x1e   : > { %2011 = vmatpush3.bf16.msra.mxu1 %v2132_v39  ;;  %1996 = vmatprep.subr.bf16.mxu0 %v2133_v45  ;;  %v402_v29 = vpack.c.bf16 %v398_v21, %v397_v20  ;;  %v659_v40 = vsel %vm2313_vm6, %v635_v31, 0.0  ;;  %v802_v58 = vsel %vm2390_vm10, %v2384_v1, 0.0  ;;  %v669_v0 = vpack.c.bf16 %v664_v49, %v663_v47  ;;  %v2508_v20 = vld [vmem:[%s2232_s10 + $0x40] sm:$0xff]  ;;  %v2143_v21 = vld [vmem:[%s2761_s1 + $0x88] sm:$0xff]  }
  0x1f   : > { %2012 = vmatprep.subr.bf16.mxu1 %v2134_v53  ;;  %1974 = vmatprep.mubr.msk.bf16.mxu0 %vm2766_vm0, %v2374_v61  ;;  %v667_v44 = vpack.c.bf16 %v660_v43, %v659_v40  ;;  %v806_v5 = vpack.c.bf16 %v800_v26, %v799_v60  ;;  %vm2490_vm15 = vcmp.lt.s32.totalorder %v301_v4, 7  ;;  %v2142_v60 = vld [vmem:[%s2761_s1 + $0xb0] sm:$0xff]   ;;  %vm2802_vm10 = vcmask 523264   ;;  %v2146_v47 = vld [vmem:[%s2761_s1 + $0xa0] sm:$0xff]  }
  0x20   : > { %1990 = vmatprep.mubr.msk.bf16.mxu1 %vm2766_vm0, %v401_v12  ;;  %v2502_v12 = vld [vmem:[%s2232_s10 + $0x3a] sm:$0xff]  ;;  %v665_v4 = vsel %vm2490_vm15, %v2499_v59, 0.0  ;;  %v804_v26 = vsel %vm2426_vm12, %v2508_v20, 0.0  ;;  %v1065_v31 = vsel %vm2313_vm6, %v636_v34, 0.0  ;;  %v935_v40 = vpack.c.bf16 %v2266_v24, %v2240_v13 }
  0x21   : > { %1997 = vmatpush3.bf16.msra.mxu0 %v2133_v45  ;;  %v2139_v45 = vld [vmem:[%s2761_s1 + $0x98] sm:$0xff]   ;;  %v1067_v13 = vsel %vm2297_vm5, %v2335_v48, 0.0  ;;  %v1068_v34 = vsel %vm2330_vm8, %v2414_v11, 0.0  ;;  %v1069_v49 = vsel %vm2450_vm13, %v2424_v17, 0.0  ;;  %v1472_v15 = vsel %vm2317_vm7, %v2335_v48, 0.0  ;;  %v2158_v48 = vld [vmem:[%s2761_s1 + $0x100] sm:$0xff]  }
  0x22   : > { %2013 = vmatpush3.bf16.msra.mxu1 %v2134_v53  ;;  %1998 = vmatprep.subr.bf16.mxu0 %v2135_v10  ;;  %v801_v53 = vsel %vm2386_vm9, %v2349_v52, 0.0  ;;  %vm2803_vm9 = vmmov %vm2802_vm10  ;;  %v2147_v24 = vld [vmem:[%s2761_s1 + $0xd8] sm:$0xff]   ;;  %v1473_v37 = vsel %vm2297_vm5, %v2414_v11, 0.0  ;;  %v1474_v39 = vsel %vm2330_vm8, %v2424_v17, 0.0 }
  0x23   : > { %2014 = vmatprep.subr.bf16.mxu1 %v2136_v16  ;;  %vm2804_vm4 = vmmov %vm2803_vm9  ;;  %v1480_v36 = vpack.c.bf16 %v1474_v39, %v1473_v37 }
  0x24   : > { %1975 = vmatmul.mubr.msk.bf16.gmra.mxu0 %vm2766_vm0, %v2408_v8 }
  0x25   : > { %1999 = vmatpush3.bf16.msra.mxu0 %v2135_v10  ;;  %1991 = vmatmul.mubr.msk.bf16.gmra.mxu1 %vm2766_vm0, %v402_v29 }
  0x26   : > { %2000 = vmatprep.subr.bf16.mxu0 %v2137_v22  ;;  %2015 = vmatpush3.bf16.msra.mxu1 %v2136_v16  ;;  %v807_v16 = vpack.c.bf16 %v802_v58, %v801_v53  ;;  %v936_v53 = vpack.c.bf16 %v2356_v54, %v2269_v25  ;;  %v937_v58 = vpack.c.bf16 %v2377_v62, %v2359_v55  ;;  %v2575_v54 = vld [vmem:[%s2232_s10 + $0x42] sm:$0xff]  ;;  %v1203_v62 = vsel %vm2242_vm1, %v2273_v27, 0.0  ;;  %vm2811_vm1 = vmmov %vm2804_vm4 }
  0x27   : > { %2018 = vmatprep.mubr.msk.bf16.mxu1 %vm2766_vm0, %v805_v23  ;;  %2016 = vmatprep.subr.bf16.mxu1 %v2138_v30  ;;  %v803_v23 = vsel %vm2416_vm11, %v2396_v6, 0.0  ;;  %v2583_v55 = vld [vmem:[%s2232_s10 + $0x41] sm:$0xff]  ;;  %vm2825_vm5 = vmmov %vm2811_vm1 }
  0x28   : > { %2002 = vmatprep.mubr.msk.bf16.mxu0 %vm2766_vm0, %v667_v44  ;;  %vm2494_vm0 = vcmp.lt.s32.totalorder %v308_v9, 7  ;;  %v808_v43 = vpack.c.bf16 %v804_v26, %v803_v23  ;;  %v2145_v44 = vld [vmem:[%s2761_s1 + $0x80] sm:$0xff]   ;;  %v938_v19 = vpack.c.bf16 %v2583_v55, %v2380_v63  ;;  %v2152_v27 = vld [vmem:[%s2761_s1 + $0xe8] sm:$0xff]   ;;  %v2155_v26 = vld [vmem:[%s2761_s1 + $0x118] sm:$0xff]   ;;  %v1344_v42 = vpack.c.bf16 %v1340_v18, %v2583_v55 }
  0x29   : > { %2001 = vmatpush3.bf16.msra.mxu0 %v2137_v22  ;;  %v666_v9 = vsel %vm2494_vm0, %v2502_v12, 0.0  ;;  %v1066_v22 = vsel %vm2317_vm7, %v2305_v38, 0.0  ;;  %v1072_v14 = vsel %vm2494_vm0, %v2575_v54, 0.0  ;;  %v2154_v63 = vld [vmem:[%s2761_s1 + $0xe0] sm:$0xff]   ;;  %vm2822_vm7 = vmmov %vm2811_vm1 }
  0x2a   : > { %2026 = vmatprep.subr.bf16.mxu0 %v2139_v45  ;;  %2017 = vmatpush3.bf16.msra.mxu1 %v2138_v30  ;;  %v670_v29 = vpack.c.bf16 %v666_v9, %v665_v4  ;;  %v2144_v30 = vld [vmem:[%s2761_s1 + $0xa8] sm:$0xff]   ;;  %v1071_v4 = vsel %vm2490_vm15, %v2502_v12, 0.0  ;;  %vm2826_vm8 = vmmov %vm2811_vm1 }
  0x2b   : > { %2042 = vmatprep.subr.bf16.mxu1 %v2140_v57  ;;  %v1076_v9 = vpack.c.bf16 %v1072_v14, %v1071_v4 }
  0x2c   : > { %2003 = vmatmul.mubr.msk.bf16.vlgmr.msra.gmra.mxu0 %vm2802_vm10, %v668_v56  ;;  %vm2806_vm10 = vmmov %vm2804_vm4  ;;  %v2148_v56 = vld [vmem:[%s2761_s1 + $0xf8] sm:$0xff]  }
  0x2d   : > { %2027 = vmatpush3.bf16.msra.mxu0 %v2139_v45  ;;  %2006 = vmatprep.mubr.msk.bf16.mxu0 %vm2803_vm9, %v669_v0  ;;  %vm2805_vm9 = vmmov %vm2804_vm4  ;;  %v1073_v45 = vpack.c.bf16 %v1066_v22, %v1065_v31  ;;  %v1074_v0 = vpack.c.bf16 %v1068_v34, %v1067_v13  ;;  %v1205_v22 = vsel %vm2286_vm3, %v2346_v51, 0.0  ;;  %vm2816_vm3 = vnez %v2789_v3  ;;  %v2157_v3 = vld [vmem:[%s2761_s1 + $0x108] sm:$0xff]  }
  0x2e   : > { %2019 = vmatmul.mubr.msk.bf16.vlgmr.msra.gmra.mxu1 %vm2804_vm4, %v806_v5  ;;  %2028 = vmatprep.subr.bf16.mxu0 %v2141_v7  ;;  %v2149_v5 = vld [vmem:[%s2761_s1 + $0xd0] sm:$0xff]  }
  0x2f   : > { %2043 = vmatpush3.bf16.msra.mxu1 %v2140_v57  ;;  %2022 = vmatprep.mubr.msk.bf16.mxu1 %vm2805_vm9, %v807_v16  ;;  %vm2807_vm9 = vmmov %vm2804_vm4  ;;  %v1070_v57 = vsel %vm2454_vm14, %v2499_v59, 0.0  ;;  %v2151_v16 = vld [vmem:[%s2761_s1 + $0xc8] sm:$0xff]  }
  0x30   : > { %2044 = vmatprep.subr.bf16.mxu1 %v2142_v60  ;;  %v1075_v25 = vpack.c.bf16 %v1070_v57, %v1069_v49 }
  0x31   : > { %2029 = vmatpush3.bf16.msra.mxu0 %v2141_v7  ;;  %v2150_v7 = vld [vmem:[%s2761_s1 + $0xf0] sm:$0xff]  }
  0x32   : > { %2030 = vmatprep.subr.bf16.mxu0 %v2143_v21 }
  0x33   : > { %2045 = vmatpush3.bf16.msra.mxu1 %v2142_v60  ;;  %v1204_v60 = vsel %vm2252_vm2, %v2276_v28, 0.0  ;;  %vm2812_vm2 = vnez %v2777_v35  ;;  %v1208_v35 = vsel %vm2816_vm3, %v2396_v6, 0.0  ;;  %v1471_v6 = vsel %vm2313_vm6, %v2305_v38, 0.0  ;;  %vm2821_vm6 = vmmov %vm2811_vm1 }
  0x34   : > { %2007 = vmatmul.mubr.msk.bf16.gmra.mxu0 %vm2804_vm4, %v670_v29  ;;  %2046 = vmatprep.subr.bf16.mxu1 %v2144_v30  ;;  %v1211_v28 = vpack.c.bf16 %v1204_v60, %v1203_v62  ;;  %v1206_v23 = vsel %vm2812_vm2, %v2349_v52, 0.0  ;;  %v2156_v29 = vld [vmem:[%s2761_s1 + $0x110] sm:$0xff]   ;;  %vm2817_vm2 = vmmov %vm2811_vm1  ;;  %v1476_v38 = vsel %vm2454_vm14, %v2502_v12, 0.0  ;;  %v1479_v41 = vpack.c.bf16 %v1472_v15, %v1471_v6 }
  0x35   : > { %2031 = vmatpush3.bf16.msra.mxu0 %v2143_v21  ;;  %2034 = vmatprep.mubr.msk.bf16.mxu0 %vm2806_vm10, %v935_v40  ;;  %vm2808_vm10 = vmmov %vm2804_vm4  ;;  %v2153_v21 = vld [vmem:[%s2761_s1 + $0xc0] sm:$0xff]   ;;  %v1212_v51 = vpack.c.bf16 %v1206_v23, %v1205_v22 }
  0x36   : > { %2023 = vmatmul.mubr.msk.bf16.gmra.mxu1 %vm2807_vm9, %v808_v43  ;;  %2032 = vmatprep.subr.bf16.mxu0 %v2145_v44  ;;  %vm2809_vm9 = vmmov %vm2804_vm4 }
  0x37   : > { %2047 = vmatpush3.bf16.msra.mxu1 %v2144_v30  ;;  %2050 = vmatprep.mubr.msk.bf16.mxu1 %vm2804_vm4, %v1073_v45  ;;  %v1470_v30 = vld [vmem:[%s2232_s10 + $0x4a] sm:$0xff]  ;;  %vm2832_vm3 = vmmov %vm2811_vm1 }
  0x38   : > { %2048 = vmatprep.subr.bf16.mxu1 %v2146_v47  ;;  %v1478_v12 = vsel %vm2494_vm0, %v1470_v30, 0.0 }
  0x39   : > { %2033 = vmatpush3.bf16.msra.mxu0 %v2145_v44 }
  0x3a   : > { %2058 = vmatprep.subr.bf16.mxu0 %v2147_v24 }
  0x3b   : > { %2049 = vmatpush3.bf16.msra.mxu1 %v2146_v47 }
  0x3c   : > { %2035 = vmatmul.mubr.msk.bf16.vlgmr.msra.gmra.mxu0 %vm2808_vm10, %v936_v53  ;;  %2074 = vmatprep.subr.bf16.mxu1 %v2148_v56  ;;  %vm2810_vm10 = vmmov %vm2804_vm4 }
  0x3d   : > { %2059 = vmatpush3.bf16.msra.mxu0 %v2147_v24  ;;  %2038 = vmatprep.mubr.msk.bf16.mxu0 %vm2809_vm9, %v937_v58  ;;  %vm2813_vm9 = vmmov %vm2811_vm1 }
  0x3e   : > { %2051 = vmatmul.mubr.msk.bf16.vlgmr.msra.gmra.mxu1 %vm2804_vm4, %v1074_v0  ;;  %2060 = vmatprep.subr.bf16.mxu0 %v2149_v5  ;;  %vm2814_vm4 = vmmov %vm2811_vm1 }
  0x3f   : > { %2075 = vmatpush3.bf16.msra.mxu1 %v2148_v56  ;;  %2054 = vmatprep.mubr.msk.bf16.mxu1 %vm2810_vm10, %v1075_v25  ;;  %vm2815_vm10 = vnez %v2787_v2  ;;  %v1202_v2 = vld [vmem:[%s2232_s10 + $0x48] sm:$0xff]  ;;  %s1888_s10 = sshll.u32 %s2840_s19, 6 }
  0x40   : > { %2076 = vmatprep.subr.bf16.mxu1 %v2150_v7  ;;  %v1207_v33 = vsel %vm2815_vm10, %v2384_v1, 0.0  ;;  %v1210_v1 = vsel %vm2426_vm12, %v1202_v2, 0.0  ;;  %vm2823_vm12 = vmmov %vm2811_vm1  ;;  %s2697_s6 = scalar_lea.vmem %s2764_s4, %s1888_s10  ;;  %s2721_s14 = scalar_lea.vmem %s2765_s5, %s1888_s10 }
  0x41   : > { %2061 = vmatpush3.bf16.msra.mxu0 %v2149_v5  ;;  %v1213_v52 = vpack.c.bf16 %v1208_v35, %v1207_v33  ;;  %vm2831_vm10 = vmmov %vm2811_vm1 }
  0x42   : > { %2062 = vmatprep.subr.bf16.mxu0 %v2151_v16 }
  0x43   : > { %2077 = vmatpush3.bf16.msra.mxu1 %v2150_v7 }
  0x44   : > { %2039 = vmatmul.mubr.msk.bf16.gmra.mxu0 %vm2811_vm1, %v938_v19  ;;  %2078 = vmatprep.subr.bf16.mxu1 %v2152_v27 }
  0x45   : > { %2063 = vmatpush3.bf16.msra.mxu0 %v2151_v16  ;;  %2066 = vmatprep.mubr.msk.bf16.mxu0 %vm2813_vm9, %v1211_v28  ;;  %vm2818_vm9 = vmmov %vm2811_vm1 }
  0x46   : > { %2055 = vmatmul.mubr.msk.bf16.gmra.mxu1 %vm2814_vm4, %v1076_v9  ;;  %2064 = vmatprep.subr.bf16.mxu0 %v2153_v21  ;;  %vm2819_vm4 = vmmov %vm2811_vm1 }
  0x47   : > { %2079 = vmatpush3.bf16.msra.mxu1 %v2152_v27  ;;  %2082 = vmatprep.mubr.msk.bf16.mxu1 %vm2811_vm1, %v2284_v32  ;;  %v1209_v32 = vsel %vm2416_vm11, %v2508_v20, 0.0  ;;  %vm2820_vm11 = vmmov %vm2811_vm1  ;;  %v1475_v20 = vsel %vm2450_vm13, %v2499_v59, 0.0  ;;  %v1477_v59 = vsel %vm2490_vm15, %v2575_v54, 0.0 }
  0x48   : > { %2080 = vmatprep.subr.bf16.mxu1 %v2154_v63  ;;  %vm2824_vm13 = vmmov %vm2811_vm1  ;;  %v1482_v46 = vpack.c.bf16 %v1478_v12, %v1477_v59 }
  0x49   : > { %2065 = vmatpush3.bf16.msra.mxu0 %v2153_v21 }
  0x4a   : > { %2090 = vmatprep.subr.bf16.mxu0 %v2155_v26 }
  0x4b   : > { %2081 = vmatpush3.bf16.msra.mxu1 %v2154_v63 }
  0x4c   : > { %2067 = vmatmul.mubr.msk.bf16.vlgmr.msra.gmra.mxu0 %vm2817_vm2, %v1212_v51  ;;  %2106 = vmatprep.subr.bf16.mxu1 %v2155_v26 }
  0x4d   : > { %2091 = vmatpush3.bf16.msra.mxu0 %v2155_v26  ;;  %2070 = vmatprep.mubr.msk.bf16.mxu0 %vm2818_vm9, %v1213_v52  ;;  %vm2833_vm9 = vmmov %vm2832_vm3 }
  0x4e   : > { %2083 = vmatmul.mubr.msk.bf16.vlgmr.msra.gmra.mxu1 %vm2819_vm4, %v2374_v61  ;;  %2092 = vmatprep.subr.bf16.mxu0 %v2156_v29  ;;  %v1214_v61 = vpack.c.bf16 %v1210_v1, %v1209_v32  ;;  %vm2834_vm4 = vmmov %vm2832_vm3 }
  0x4f   : > { %2110 = vmatpush3.bf16.msra.mxu1 %v2155_v26  ;;  %2086 = vmatprep.mubr.msk.bf16.mxu1 %vm2820_vm11, %v2408_v8  ;;  %v1481_v8 = vpack.c.bf16 %v1476_v38, %v1475_v20 }
  0x50   : > { %2107 = vmatprep.subr.bf16.mxu1 %v2156_v29 }
  0x51   : > { %2093 = vmatpush3.bf16.msra.mxu0 %v2156_v29 }
  0x52   : > { %2094 = vmatprep.subr.bf16.mxu0 %v2157_v3 }
  0x53   : > { %2111 = vmatpush3.bf16.msra.mxu1 %v2156_v29 }
  0x54   : > { %2071 = vmatmul.mubr.msk.bf16.gmra.mxu0 %vm2821_vm6, %v1214_v61  ;;  %2108 = vmatprep.subr.bf16.mxu1 %v2157_v3 }
  0x55   : > { %2095 = vmatpush3.bf16.msra.mxu0 %v2157_v3  ;;  %2098 = vmatprep.mubr.msk.bf16.mxu0 %vm2822_vm7, %v1479_v41  ;;  %vm2835_vm7 = vmmov %vm2832_vm3 }
  0x56   : > { %2087 = vmatmul.mubr.msk.bf16.gmra.mxu1 %vm2823_vm12, %v1344_v42  ;;  %2096 = vmatprep.subr.bf16.mxu0 %v2158_v48  ;;  %vm2836_vm12 = vmmov %vm2832_vm3 }
  0x57   : > { %2112 = vmatpush3.bf16.msra.mxu1 %v2157_v3  ;;  %2102 = vmatprep.mubr.msk.bf16.mxu1 %vm2824_vm13, %v1481_v8 }
  0x58   : > { %2109 = vmatprep.subr.bf16.mxu1 %v2158_v48 }
  0x59   : > { %2097 = vmatpush3.bf16.msra.mxu0 %v2158_v48 }
  0x5b   : > { %2113 = vmatpush3.bf16.msra.mxu1 %v2158_v48 }
  0x5c   : > { %2099 = vmatmul.mubr.msk.bf16.vlgmr.msra.gmra.mxu0 %vm2825_vm5, %v1480_v36  ;;  %vm2837_vm5 = vmmov %vm2832_vm3 }
  0x5e   : > { %2103 = vmatmul.mubr.msk.bf16.vlgmr.msra.gmra.mxu1 %vm2826_vm8, %v1482_v46  ;;  %vm2838_vm8 = vmmov %vm2832_vm3 }
  0xdc   : > { %v1972_v11 = vpop.f32.mrf.mxu0 }
  0xdd   : > { %v1988_v17 = vpop.f32.mrf.mxu1 }
  0xde   : > { %v503_v31 = vpop.f32.mrf.mxu0  ;;  %v613_v1 = vadd.f32 %v1988_v17, %v1972_v11 }
  0xdf   : > { %v604_v10 = vpop.f32.mrf.mxu1 }
  0xe0   : > { %v1973_v40 = vpop.f32.mrf.mxu0  ;;  %v605_v15 = vadd.f32 %v604_v10, %v503_v31 }
  0xe1   : > { %v1989_v43 = vpop.f32.mrf.mxu1 }
  0xe2   : > { %v506_v50 = vpop.f32.mrf.mxu0  ;;  %v616_v8 = vadd.f32 %v1989_v43, %v1973_v40 }
  0xe3   : > { %v607_v44 = vpop.f32.mrf.mxu1 }
  0xe4   : > { %v1976_v45 = vpop.f32.mrf.mxu0  ;;  %v608_v12 = vadd.f32 %v607_v44, %v506_v50 }
  0xe5   : > { %v1992_v47 = vpop.f32.mrf.mxu1 }
  0xe6   : > { %v519_v13 = vpop.f32.mrf.mxu0  ;;  %v629_v18 = vadd.f32 %v1992_v47, %v1976_v45 }
  0xe7   : > { %v620_v24 = vpop.f32.mrf.mxu1 }
  0xe8   : > { %v1977_v34 = vpop.f32.mrf.mxu0  ;;  %v621_v41 = vadd.f32 %v620_v24, %v519_v13 }
  0xe9   : > { %v1993_v49 = vpop.f32.mrf.mxu1 }
  0xea   : > { %v522_v53 = vpop.f32.mrf.mxu0  ;;  %v632_v36 = vadd.f32 %v1993_v49, %v1977_v34 }
  0xeb   : > { %v623_v56 = vpop.f32.mrf.mxu1 }
  0xec   : > { %v2004_v57 = vpop.f32.mrf.mxu0  ;;  %v624_v46 = vadd.f32 %v623_v56, %v522_v53 }
  0xed   : > { %v783_v61 = vadd.f32 %v2004_v57, %v613_v1 }
  0xee   : > { %v2020_v58 = vpop.f32.mrf.mxu1  ;;  %v750_v0 = vpop.f32.mrf.mxu0 }
  0xef   : > { %v781_v42 = vadd.f32 %v750_v0, %v605_v15  ;;  %v921_v39 = vadd.f32 %v2020_v58, %v783_v61  ;;  %v2703_v15 = vld [vmem:[%s2762_s2] ss:$0 sm:$0xff] }
  0xf0   : > { %v888_v5 = vpop.f32.mrf.mxu1  ;;  %v2005_v25 = vpop.f32.mrf.mxu0 }
  0xf2   : > { %v2021_v54 = vpop.f32.mrf.mxu1  ;;  %v753_v7 = vpop.f32.mrf.mxu0 }
  0xf3   : > { %v782_v45 = vadd.f32 %v753_v7, %v608_v12 }
  0xf4   : > { %v891_v55 = vpop.f32.mrf.mxu1  ;;  %v2008_v62 = vpop.f32.mrf.mxu0 }
  0xf5   : > { %v787_v48 = vadd.f32 %v2008_v62, %v629_v18  ;;  %v920_v34 = vadd.f32 %v891_v55, %v782_v45 }
  0xf6   : > { %v2024_v60 = vpop.f32.mrf.mxu1  ;;  %v766_v16 = vpop.f32.mrf.mxu0 }
  0xf7   : > { %v785_v59 = vadd.f32 %v766_v16, %v621_v41  ;;  %v925_v31 = vadd.f32 %v2024_v60, %v787_v48 }
  0xf8   : > { %v904_v4 = vpop.f32.mrf.mxu1  ;;  %v2009_v14 = vpop.f32.mrf.mxu0 }
  0xf9   : > { %v788_v47 = vadd.f32 %v2009_v14, %v632_v36  ;;  %v923_v0 = vadd.f32 %v904_v4, %v785_v59  ;;  %v2710_v36 = vld [vmem:[%s2763_s3] ss:$0 sm:$0xff] }
  0xfa   : > { %v2025_v19 = vpop.f32.mrf.mxu1  ;;  %v769_v27 = vpop.f32.mrf.mxu0 }
  0xfb   : > { %v786_v57 = vadd.f32 %v769_v27, %v624_v46  ;;  %v926_v49 = vadd.f32 %v2025_v19, %v788_v47  ;;  %v1622_v46 = vld [vmem:[%s2697_s6 + $0x30] sm:$0xff] }
  0xfc   : > { %v907_v28 = vpop.f32.mrf.mxu1  ;;  %v2036_v9 = vpop.f32.mrf.mxu0 }
  0xfd   : > { %v1051_v10 = vadd.f32 %v2036_v9, %v921_v39  ;;  %v924_v53 = vadd.f32 %v907_v28, %v786_v57 }
  0xfe   : > { %v2052_v21 = vpop.f32.mrf.mxu1  ;;  %v1018_v63 = vpop.f32.mrf.mxu0 }
  0xff   : > { %v1189_v50 = vadd.f32 %v2052_v21, %v1051_v10 }
 0x100   : > { %v1156_v22 = vpop.f32.mrf.mxu1  ;;  %v2037_v23 = vpop.f32.mrf.mxu0 }
 0x102   : > { %v2686_v26 = vpop.f32.mrf.mxu1  ;;  %v1021_v33 = vpop.f32.mrf.mxu0 }
 0x103   : > { %2827 = vst [vmem:[#allocation2_spill] sm:$0xff] %v2686_v26  ;;  %v919_v26 = vadd.f32 %v888_v5, %v781_v42  ;;  %v1050_v27 = vadd.f32 %v1021_v33, %v920_v34  ;;  %v1620_v34 = vld [vmem:[%s2697_s6 + $0x20] sm:$0xff] }
 0x104   : > { %v2688_v35 = vpop.f32.mrf.mxu1  ;;  %v2040_v51 = vpop.f32.mrf.mxu0 }
 0x105   : > { %2828 = vst [vmem:[#allocation3_spill] sm:$0xff] %v2688_v35  ;;  %v784_v35 = vadd.f32 %v2005_v25, %v616_v8  ;;  %v1049_v40 = vadd.f32 %v1018_v63, %v919_v26  ;;  %v1055_v43 = vadd.f32 %v2040_v51, %v925_v31  ;;  %v1618_v8 = vld [vmem:[%s2697_s6 + $0x10] sm:$0xff] }
 0x106   : > { %v2056_v52 = vpop.f32.mrf.mxu1  ;;  %v1034_v29 = vpop.f32.mrf.mxu0 }
 0x107   : > { %v922_v62 = vadd.f32 %v2021_v54, %v784_v35  ;;  %v1053_v44 = vadd.f32 %v1034_v29, %v923_v0  ;;  %v1187_v7 = vadd.f32 %v1156_v22, %v1049_v40  ;;  %v1193_v60 = vadd.f32 %v2056_v52, %v1055_v43 }
 0x108   : > { %v1172_v2 = vpop.f32.mrf.mxu1  ;;  %v2041_v32 = vpop.f32.mrf.mxu0 }
 0x109   : > { %v1052_v56 = vadd.f32 %v2037_v23, %v922_v62  ;;  %v1056_v4 = vadd.f32 %v2041_v32, %v926_v49  ;;  %v1191_v26 = vadd.f32 %v1172_v2, %v1053_v44 }
 0x10a   : > { %v2057_v3 = vpop.f32.mrf.mxu1  ;;  %v1037_v6 = vpop.f32.mrf.mxu0  ;;  %v2829_v51 = vld [vmem:[#allocation2_spill] sm:$0xff] }
 0x10b   : > { %v1054_v9 = vadd.f32 %v1037_v6, %v924_v53  ;;  %v1190_v55 = vadd.f32 %v2829_v51, %v1052_v56  ;;  %v1194_v52 = vadd.f32 %v2057_v3, %v1056_v4 }
 0x10c   : > { %v1175_v20 = vpop.f32.mrf.mxu1  ;;  %v2068_v38 = vpop.f32.mrf.mxu0  ;;  %v2830_v22 = vld [vmem:[#allocation3_spill] sm:$0xff] }
 0x10d   : > { %v1327_v14 = vadd.f32 %v2068_v38, %v1189_v50  ;;  %v1188_v33 = vadd.f32 %v2830_v22, %v1050_v27  ;;  %v1192_v32 = vadd.f32 %v1175_v20, %v1054_v9  ;;  %v1621_v22 = vld [vmem:[%s2697_s6 + $0x28] sm:$0xff] }
 0x10e   : > { %v2084_v30 = vpop.f32.mrf.mxu1  ;;  %v1294_v37 = vpop.f32.mrf.mxu0 }
 0x10f   : > { %v1325_v21 = vadd.f32 %v1294_v37, %v1187_v7  ;;  %v1457_v23 = vadd.f32 %v2084_v30, %v1327_v14 }
 0x110   : > { %v1424_v11 = vpop.f32.mrf.mxu1  ;;  %v2069_v17 = vpop.f32.mrf.mxu0 }
 0x111   : > { %v1328_v2 = vadd.f32 %v2069_v17, %v1190_v55  ;;  %v1455_v18 = vadd.f32 %v1424_v11, %v1325_v21  ;;  %v1616_v11 = vld [vmem:[%s2697_s6] sm:$0xff] }
 0x112   : > { %v2085_v13 = vpop.f32.mrf.mxu1  ;;  %v1297_v24 = vpop.f32.mrf.mxu0 }
 0x113   : > { %v1326_v41 = vadd.f32 %v1297_v24, %v1188_v33  ;;  %v1458_v12 = vadd.f32 %v2085_v13, %v1328_v2 }
 0x114   : > { %v1427_v58 = vpop.f32.mrf.mxu1  ;;  %v2072_v16 = vpop.f32.mrf.mxu0 }
 0x115   : > { %v1331_v35 = vadd.f32 %v2072_v16, %v1193_v60  ;;  %v1456_v24 = vadd.f32 %v1427_v58, %v1326_v41  ;;  %v1619_v58 = vld [vmem:[%s2697_s6 + $0x18] sm:$0xff] }
 0x116   : > { %v2088_v5 = vpop.f32.mrf.mxu1  ;;  %v1310_v25 = vpop.f32.mrf.mxu0 }
 0x117   : > { %v1329_v29 = vadd.f32 %v1310_v25, %v1191_v26  ;;  %v1461_v61 = vadd.f32 %v2088_v5, %v1331_v35 }
 0x118   : > { %v1440_v63 = vpop.f32.mrf.mxu1  ;;  %v2073_v54 = vpop.f32.mrf.mxu0 }
 0x119   : > { %v1332_v42 = vadd.f32 %v2073_v54, %v1194_v52  ;;  %v1459_v20 = vadd.f32 %v1440_v63, %v1329_v29  ;;  %v1623_v63 = vld [vmem:[%s2697_s6 + $0x38] sm:$0xff]  ;;  %v1617_v54 = vld [vmem:[%s2697_s6 + $0x8] sm:$0xff] }
 0x11a   : > { %v2089_v19 = vpop.f32.mrf.mxu1  ;;  %v1313_v28 = vpop.f32.mrf.mxu0 }
 0x11b   : > { %v1330_v48 = vadd.f32 %v1313_v28, %v1192_v32  ;;  %v1462_v13 = vadd.f32 %v2089_v19, %v1332_v42 }
 0x11c   : > { %v1443_v1 = vpop.f32.mrf.mxu1  ;;  %v2100_v6 = vpop.f32.mrf.mxu0 }
 0x11d   : > { %v1595_v38 = vadd.f32 %v2100_v6, %v1457_v23  ;;  %v1460_v0 = vadd.f32 %v1443_v1, %v1330_v48 }
 0x11e   : > { %v2104_v30 = vpop.f32.mrf.mxu1  ;;  %v1562_v3 = vpop.f32.mrf.mxu0 }
 0x11f   : > { %v1610_v37 = vadd.f32 %v2703_v15, %v1595_v38  ;;  %v1599_v39 = vadd.f32 %v2104_v30, %v1461_v61  ;;  %v1593_v59 = vadd.f32 %v1562_v3, %v1455_v18 }
 0x120   : > { %v1578_v17 = vpop.f32.mrf.mxu1  ;;  %v2101_v31 = vpop.f32.mrf.mxu0 }
 0x121   : > { %v1626_v10 = vadd.f32 %v1618_v8, %v1610_v37  ;;  %v1614_v45 = vadd.f32 %v2703_v15, %v1599_v39  ;;  %v1608_v47 = vadd.f32 %v2703_v15, %v1593_v59  ;;  %v1597_v57 = vadd.f32 %v1578_v17, %v1459_v20 }
 0x122   : > { %v1596_v40 = vadd.f32 %v2101_v31, %v1458_v12  ;;  %v2105_v43 = vpop.f32.mrf.mxu1  ;;  %v1565_v62 = vpop.f32.mrf.mxu0 }
 0x123   : > { %vm1634_vm0 = vcmp.ge.f32.partialorder %v1626_v10, 0.0  ;;  %v1649_v16 = vmul.f32 %v2710_v36, %v1626_v10  ;;  %v1630_v50 = vadd.f32 %v1622_v46, %v1614_v45  ;;  %v1624_v44 = vadd.f32 %v1616_v11, %v1608_v47 }
 0x124   : > { %v1612_v49 = vadd.f32 %v2703_v15, %v1597_v57  ;;  %v1611_v53 = vadd.f32 %v2703_v15, %v1596_v40  ;;  %v1600_v56 = vadd.f32 %v2105_v43, %v1462_v13  ;;  %v1594_v5 = vadd.f32 %v1565_v62, %v1456_v24  ;;  %v1581_v25 = vpop.f32.mrf.mxu1 }
 0x125   : > { %v1657_v7 = vsel %vm1634_vm0, %v1626_v10, %v1649_v16  ;;  %vm1638_vm14 = vcmp.ge.f32.partialorder %v1630_v50, 0.0  ;;  %v1653_v60 = vmul.f32 %v2710_v36, %v1630_v50  ;;  %vm1632_vm15 = vcmp.ge.f32.partialorder %v1624_v44, 0.0 }
 0x126   : > { %1665 = vst.msk [vmem:[%s2721_s14 + $0x10] sm:$0xff] %vm2831_vm10, %v1657_v7  ;;  %v1647_v14 = vmul.f32 %v2710_v36, %v1624_v44  ;;  %v1628_v27 = vadd.f32 %v1620_v34, %v1612_v49  ;;  %v1627_v4 = vadd.f32 %v1619_v58, %v1611_v53  ;;  %v1615_v9 = vadd.f32 %v2703_v15, %v1600_v56 }
 0x127   : > { %v1661_v26 = vsel %vm1638_vm14, %v1630_v50, %v1653_v60  ;;  %v1609_v21 = vadd.f32 %v2703_v15, %v1594_v5  ;;  %v1598_v35 = vadd.f32 %v1581_v25, %v1460_v0 }
 0x128   : > { %1669 = vst.msk [vmem:[%s2721_s14 + $0x30] sm:$0xff] %vm2832_vm3, %v1661_v26  ;;  %v1655_v51 = vsel %vm1632_vm15, %v1624_v44, %v1647_v14  ;;  %vm1636_vm1 = vcmp.ge.f32.partialorder %v1628_v27, 0.0  ;;  %v1651_v55 = vmul.f32 %v2710_v36, %v1628_v27  ;;  %vm1635_vm2 = vcmp.ge.f32.partialorder %v1627_v4, 0.0 }
 0x129   : > { %1663 = vst.msk [vmem:[%s2721_s14] sm:$0xff] %vm2833_vm9, %v1655_v51  ;;  %v1650_v19 = vmul.f32 %v2710_v36, %v1627_v4  ;;  %v1631_v28 = vadd.f32 %v1623_v63, %v1615_v9  ;;  %v1625_v23 = vadd.f32 %v1617_v54, %v1609_v21  ;;  %v1613_v29 = vadd.f32 %v2703_v15, %v1598_v35 }
 0x12a   : > { %v1659_v33 = vsel %vm1636_vm1, %v1628_v27, %v1651_v55 }
 0x12b   : > { %1667 = vst.msk [vmem:[%s2721_s14 + $0x20] sm:$0xff] %vm2834_vm4, %v1659_v33  ;;  %v1658_v52 = vsel %vm1635_vm2, %v1627_v4, %v1650_v19  ;;  %vm1639_vm11 = vcmp.ge.f32.partialorder %v1631_v28, 0.0  ;;  %v1654_v32 = vmul.f32 %v2710_v36, %v1631_v28  ;;  %vm1633_vm6 = vcmp.ge.f32.partialorder %v1625_v23, 0.0 }
 0x12c   : > { %1666 = vst.msk [vmem:[%s2721_s14 + $0x18] sm:$0xff] %vm2835_vm7, %v1658_v52  ;;  %v1648_v2 = vmul.f32 %v2710_v36, %v1625_v23  ;;  %v1629_v1 = vadd.f32 %v1621_v22, %v1613_v29 }
 0x12d   : > { %v1662_v6 = vsel %vm1639_vm11, %v1631_v28, %v1654_v32 }
 0x12e   : > { %1670 = vst.msk [vmem:[%s2721_s14 + $0x38] sm:$0xff] %vm2836_vm12, %v1662_v6  ;;  %v1656_v15 = vsel %vm1633_vm6, %v1625_v23, %v1648_v2  ;;  %vm1637_vm13 = vcmp.ge.f32.partialorder %v1629_v1, 0.0  ;;  %v1652_v18 = vmul.f32 %v2710_v36, %v1629_v1 }
 0x12f   : > { %1664 = vst.msk [vmem:[%s2721_s14 + $0x8] sm:$0xff] %vm2837_vm5, %v1656_v15 }
 0x130   : > { %v1660_v61 = vsel %vm1637_vm13, %v1629_v1, %v1652_v18 }
 0x131   : > { %1668 = vst.msk [vmem:[%s2721_s14 + $0x28] sm:$0xff] %vm2838_vm8, %v1660_v61 }
 0x132 PF: > { %s15_s18 = sadd.s32 1, %s2165_s18  }
 0x133   : > { %p12_p4 = scmp.ge.s32.totalorder %s15_s18, 6  }
 0x135   :  { %14 = sbr.rel (!%p12_p4) target bundleno = 1 (0x1), region = 81 }

// kernel: decoder1v1_forward.13
= control target key start
LH: loop header
LB: loop body
LE: loop exit
PB: predicated region body
PF: predicated region fallthrough
CT: control target
= control target key end

     0   :  { %s2051_s12 = smov 0   ;;  %s2568_s0 = inlined_call_operand.vmem [shape: f32[4,82,64], index: 0, kind: input, shape index: {}]   ;;  %s2569_s1 = inlined_call_operand.vmem [shape: bf16[9,64,76], index: 1, kind: input, shape index: {}]   ;;  %s2570_s2 = inlined_call_operand.vmem [shape: f32[1,76], index: 2, kind: input, shape index: {}]   ;;  %s2571_s3 = inlined_call_operand.vmem [shape: f32[4,64,76], index: 3, kind: output, shape index: {}]  }
   0x1 LB: > { %s1606_s13 = sadd.s32 4294967295, %s2029_s12   ;;  %p1610_p0 = scmp.ge.s32.totalorder %s2029_s12, 1  ;;  %s2029_s12 = sphi %s2051_s12, %s13_s12  }
   0x2   : > { %p137_p1 = scmp.lt.s32.totalorder %s2029_s12, 5 }
   0x4   : > { %p138_p2 = pnand %p1610_p0, %p137_p1 }
   0x5   : > { %p161_p3 = scmp.lt.s32.totalorder (!%p138_p2), %s1606_s13, 3 }
   0x6   : > { %141 = sbr.rel (%p138_p2) target bundleno = 298 (0x12a), region = 32 }
   0xb   : > { %v1987_v0 = vld [vmem:[%s2569_s1 + $0x38] sm:$0xff]   ;;  %v172_v1 = vlaneseq  ;;  %v1989_v3 = vld [vmem:[%s2569_s1 + $0x30] sm:$0xff]   ;;  %s2634_s13 = smov (!%p161_p3, %s1606_s13), 3  ;;  %v1991_v6 = vld [vmem:[%s2569_s1 + $0x28] sm:$0xff]   ;;  %vm2572_vm0 = vcmask 523264   ;;  %v2582_v35 = vmov 0 }
   0xc   : > { %v1988_v2 = vld [vmem:[%s2569_s1 + $0x18] sm:$0xff]   ;;  %1826 = vmatprep.subr.bf16.mxu0 %v1987_v0  ;;  %v1990_v4 = vld [vmem:[%s2569_s1 + $0x10] sm:$0xff]   ;;  %s1978_s24 = smul.u32 88, %s2634_s13  ;;  %v1992_v7 = vld [vmem:[%s2569_s1 + $0x8] sm:$0xff]  }
   0xd   : > { %1842 = vmatprep.subr.bf16.mxu1 %v1988_v2  ;;  %1827 = vmatpush3.bf16.msra.mxu0 %v1987_v0  ;;  %v2073_v5 = vshrl.u32 %v172_v1, 7  ;;  %v1993_v10 = vld [vmem:[%s2569_s1 + $0x20] sm:$0xff]   ;;  %v1995_v31 = vld [vmem:[%s2569_s1 + $0x58] sm:$0xff]   ;;  %v1997_v45 = vld [vmem:[%s2569_s1 + $0x50] sm:$0xff]  }
   0xe   : > { %1843 = vmatpush3.bf16.msra.mxu1 %v1988_v2  ;;  %1828 = vmatprep.subr.bf16.mxu0 %v1989_v3  ;;  %s2086_s29 = scalar_lea.vmem %s2568_s0, %s1978_s24  ;;  %v1994_v17 = vld [vmem:[%s2569_s1] sm:$0xff]   ;;  %v1996_v39 = vld [vmem:[%s2569_s1 + $0x78] sm:$0xff]   ;;  %v1998_v53 = vld [vmem:[%s2569_s1 + $0x70] sm:$0xff]   ;;  %v2592_v2 = vmov 0 }
   0xf   : > { %1844 = vmatprep.subr.bf16.mxu1 %v1990_v4  ;;  %v174_v8 = vadd.s32 8, %v2073_v5  ;;  %v185_v9 = vand.u32 7, %v2073_v5  ;;  %v337_v12 = vld [vmem:[%s2086_s29 + $0x1] sm:$0xff]  ;;  %v2094_v13 = vld [vmem:[%s2086_s29 + $0x9] sm:$0xff]  ;;  %v175_v16 = vadd.s32 16, %v2073_v5  ;;  %v2120_v24 = vld [vmem:[%s2086_s29 + $0x11] sm:$0xff] }
  0x10   : > { %v293_v15 = vld [vmem:[%s2086_s29] sm:$0xff]  ;;  %v345_v18 = vpack.c.bf16 %v2094_v13, %v337_v12  ;;  %v2111_v20 = vld [vmem:[%s2086_s29 + $0x8] sm:$0xff]  ;;  %v176_v26 = vadd.s32 24, %v2073_v5  ;;  %v2127_v27 = vld [vmem:[%s2086_s29 + $0x10] sm:$0xff]  ;;  %v2145_v34 = vadd.s32 32, %v2073_v5  ;;  %v2165_v40 = vadd.s32 40, %v2073_v5 }
  0x11   : > { %1829 = vmatpush3.bf16.msra.mxu0 %v1989_v3  ;;  %v192_v11 = vand.u32 7, %v174_v8  ;;  %vm2096_vm1 = vcmp.gt.s32.totalorder %v185_v9, 0  ;;  %v2123_v25 = vld [vmem:[%s2086_s29 + $0x19] sm:$0xff]  ;;  %v199_v29 = vand.u32 7, %v175_v16  ;;  %vm2167_vm6 = vcmp.lt.s32.totalorder %v185_v9, 7  ;;  %v2203_v52 = vld [vmem:[%s2086_s29 + $0x28] sm:$0xff] }
  0x12   : > { %1845 = vmatpush3.bf16.msra.mxu1 %v1990_v4  ;;  %1830 = vmatprep.subr.bf16.mxu0 %v1991_v6  ;;  %v317_v21 = vsel %vm2096_vm1, %v293_v15, 0.0  ;;  %v2130_v28 = vld [vmem:[%s2086_s29 + $0x18] sm:$0xff]  ;;  %v206_v30 = vand.u32 7, %v176_v26  ;;  %v2138_v32 = vpack.c.bf16 %v2123_v25, %v2120_v24  ;;  %v723_v43 = vsel %vm2096_vm1, %v2111_v20, 0.0  ;;  %v2200_v51 = vld [vmem:[%s2086_s29 + $0x20] sm:$0xff]  ;;  %v2213_v55 = vld [vmem:[%s2086_s29 + $0x29] sm:$0xff] }
  0x13   : > { %1846 = vmatprep.subr.bf16.mxu1 %v1992_v7  ;;  %vm2106_vm2 = vcmp.gt.s32.totalorder %v192_v11, 0  ;;  %1834 = vmatprep.mubr.msk.bf16.mxu0 %vm2572_vm0, %v345_v18  ;;  %vm2140_vm3 = vcmp.gt.s32.totalorder %v199_v29, 0  ;;  %vm2151_vm5 = vcmp.lt.s32.totalorder %v199_v29, 7  ;;  %v2159_v38 = vld [vmem:[%s2086_s29 + $0x12] sm:$0xff]  ;;  %vm2171_vm7 = vcmp.lt.s32.totalorder %v192_v11, 7  ;;  %v2189_v48 = vld [vmem:[%s2086_s29 + $0x1a] sm:$0xff] }
  0x14   : > { %v318_v22 = vsel %vm2106_vm2, %v2111_v20, 0.0  ;;  %vm2147_vm4 = vcmp.gt.s32.totalorder %v206_v30, 0  ;;  %v319_v37 = vsel %vm2140_vm3, %v2127_v27, 0.0  ;;  %vm2184_vm8 = vcmp.lt.s32.totalorder %v206_v30, 7  ;;  %v2210_v54 = vld [vmem:[%s2086_s29 + $0x21] sm:$0xff]  ;;  %v2231_v62 = vld [vmem:[%s2086_s29 + $0x31] sm:$0xff] }
  0x15   : > { %1831 = vmatpush3.bf16.msra.mxu0 %v1991_v6  ;;  %v325_v23 = vpack.c.bf16 %v318_v22, %v317_v21  ;;  %v2583_v35 = vsel %vm2147_vm4, 4294967295, %v2582_v35  ;;  %v320_v44 = vsel %vm2147_vm4, %v2130_v28, 0.0  ;;  %v724_v49 = vsel %vm2106_vm2, %v2127_v27, 0.0  ;;  %v2234_v63 = vld [vmem:[%s2086_s29 + $0x39] sm:$0xff]  ;;  %v2238_v1 = vld [vmem:[%s2086_s29 + $0x30] sm:$0xff]  ;;  %v2268_v11 = vld [vmem:[%s2086_s29 + $0x22] sm:$0xff] }
  0x16   : > { %1847 = vmatpush3.bf16.msra.mxu1 %v1992_v7  ;;  %1832 = vmatprep.subr.bf16.mxu0 %v1993_v10  ;;  %v326_v47 = vpack.c.bf16 %v320_v44, %v319_v37  ;;  %v587_v50 = vsel %vm2151_vm5, %v2159_v38, 0.0  ;;  %v213_v56 = vand.u32 7, %v2145_v34  ;;  %v220_v57 = vand.u32 7, %v2165_v40  ;;  %v2250_v6 = vld [vmem:[%s2086_s29 + $0x38] sm:$0xff]  ;;  %v2000_v16 = vld [vmem:[%s2569_s1 + $0x68] sm:$0xff]   ;;  %v2001_v22 = vld [vmem:[%s2569_s1 + $0x40] sm:$0xff]  }
  0x17   : > { %1848 = vmatprep.subr.bf16.mxu1 %v1994_v17  ;;  %1850 = vmatprep.mubr.msk.bf16.mxu1 %vm2572_vm0, %v325_v23  ;;  %v2218_v58 = vadd.s32 48, %v2073_v5  ;;  %v588_v59 = vsel %vm2184_vm8, %v2189_v48, 0.0  ;;  %v725_v60 = vsel %vm2140_vm3, %v2130_v28, 0.0  ;;  %v2228_v61 = vpack.c.bf16 %v2213_v55, %v2210_v54  ;;  %v2002_v30 = vld [vmem:[%s2569_s1 + $0x60] sm:$0xff]   ;;  %v562_v34 = vld [vmem:[%s2086_s29 + $0xa] sm:$0xff] }
  0x18   : > { %v180_v0 = vadd.s32 56, %v2073_v5  ;;  %vm2240_vm9 = vcmp.gt.s32.totalorder %v213_v56, 0  ;;  %vm2244_vm10 = vcmp.gt.s32.totalorder %v220_v57, 0  ;;  %v2594_v3 = vmov 0  ;;  %v1266_v18 = vld [vmem:[%s2086_s29 + $0x49] sm:$0xff] }
  0x19   : > { %1833 = vmatpush3.bf16.msra.mxu0 %v1993_v10  ;;  %v2593_v2 = vsel %vm2240_vm9, 4294967295, %v2592_v2  ;;  %v2595_v3 = vsel %vm2244_vm10, 4294967295, %v2594_v3  ;;  %v227_v4 = vand.u32 7, %v2218_v58  ;;  %v321_v5 = vsel %vm2240_vm9, %v2200_v51, 0.0  ;;  %v1999_v10 = vld [vmem:[%s2569_s1 + $0x48] sm:$0xff]  }
  0x1a   : > { %1849 = vmatpush3.bf16.msra.mxu1 %v1994_v17  ;;  %1858 = vmatprep.subr.bf16.mxu0 %v1995_v31  ;;  %v322_v7 = vsel %vm2244_vm10, %v2203_v52, 0.0  ;;  %v2262_v8 = vpack.c.bf16 %v2234_v63, %v2231_v62  ;;  %v234_v9 = vand.u32 7, %v180_v0  ;;  %v2278_v17 = vld [vmem:[%s2086_s29 + $0x2a] sm:$0xff]  ;;  %v731_v23 = vpack.c.bf16 %v724_v49, %v723_v43 }
  0x1b   : > { %1874 = vmatprep.subr.bf16.mxu1 %v1996_v39  ;;  %v327_v12 = vpack.c.bf16 %v322_v7, %v321_v5  ;;  %vm2270_vm11 = vcmp.gt.s32.totalorder %v227_v4, 0  ;;  %v726_v26 = vsel %vm2147_vm4, %v2200_v51, 0.0  ;;  %vm2304_vm13 = vcmp.lt.s32.totalorder %v213_v56, 7  ;;  %v2005_v7 = vld [vmem:[%s2569_s1 + $0x90] sm:$0xff]  }
  0x1c   : > { %1835 = vmatmul.mubr.msk.bf16.vlgmr.msra.gmra.mxu0 %vm2572_vm0, %v2138_v32  ;;  %vm2280_vm12 = vcmp.gt.s32.totalorder %v234_v9, 0  ;;  %v323_v20 = vsel %vm2270_vm11, %v2238_v1, 0.0  ;;  %vm2308_vm14 = vcmp.lt.s32.totalorder %v220_v57, 7  ;;  %v586_v43 = vsel %vm2171_vm7, %v562_v34, 0.0  ;;  %v2004_v57 = vld [vmem:[%s2569_s1 + $0xb8] sm:$0xff]  }
  0x1d   : > { %1851 = vmatmul.mubr.msk.bf16.vlgmr.msra.gmra.mxu1 %vm2572_vm0, %v326_v47  ;;  %1859 = vmatpush3.bf16.msra.mxu0 %v1995_v31  ;;  %v324_v21 = vsel %vm2280_vm12, %v2250_v6, 0.0  ;;  %v561_v31 = vld [vmem:[%s2086_s29 + $0x2] sm:$0xff]  ;;  %v589_v47 = vsel %vm2304_vm13, %v2268_v11, 0.0  ;;  %v590_v49 = vsel %vm2308_vm14, %v2278_v17, 0.0  ;;  %v594_v56 = vpack.c.bf16 %v588_v59, %v587_v50  ;;  %v2353_v59 = vld [vmem:[%s2086_s29 + $0x32] sm:$0xff] }
  0x1e   : > { %1875 = vmatpush3.bf16.msra.mxu1 %v1996_v39  ;;  %1860 = vmatprep.subr.bf16.mxu0 %v1997_v45  ;;  %v328_v29 = vpack.c.bf16 %v324_v21, %v323_v20  ;;  %v585_v40 = vsel %vm2167_vm6, %v561_v31, 0.0  ;;  %v728_v58 = vsel %vm2244_vm10, %v2238_v1, 0.0  ;;  %v595_v0 = vpack.c.bf16 %v590_v49, %v589_v47  ;;  %v2362_v20 = vld [vmem:[%s2086_s29 + $0x40] sm:$0xff]  ;;  %v2007_v21 = vld [vmem:[%s2569_s1 + $0x88] sm:$0xff]  }
  0x1f   : > { %1876 = vmatprep.subr.bf16.mxu1 %v1998_v53  ;;  %1838 = vmatprep.mubr.msk.bf16.mxu0 %vm2572_vm0, %v2228_v61  ;;  %v593_v44 = vpack.c.bf16 %v586_v43, %v585_v40  ;;  %v732_v5 = vpack.c.bf16 %v726_v26, %v725_v60  ;;  %vm2344_vm15 = vcmp.lt.s32.totalorder %v227_v4, 7  ;;  %v2006_v60 = vld [vmem:[%s2569_s1 + $0xb0] sm:$0xff]   ;;  %vm2608_vm10 = vcmask 523264   ;;  %v2010_v47 = vld [vmem:[%s2569_s1 + $0xa0] sm:$0xff]  }
  0x20   : > { %1854 = vmatprep.mubr.msk.bf16.mxu1 %vm2572_vm0, %v327_v12  ;;  %v2356_v12 = vld [vmem:[%s2086_s29 + $0x3a] sm:$0xff]  ;;  %v591_v4 = vsel %vm2344_vm15, %v2353_v59, 0.0  ;;  %v730_v26 = vsel %vm2280_vm12, %v2362_v20, 0.0  ;;  %v991_v31 = vsel %vm2167_vm6, %v562_v34, 0.0  ;;  %v861_v40 = vpack.c.bf16 %v2120_v24, %v2094_v13 }
  0x21   : > { %1861 = vmatpush3.bf16.msra.mxu0 %v1997_v45  ;;  %v2003_v45 = vld [vmem:[%s2569_s1 + $0x98] sm:$0xff]   ;;  %v993_v13 = vsel %vm2151_vm5, %v2189_v48, 0.0  ;;  %v994_v34 = vsel %vm2184_vm8, %v2268_v11, 0.0  ;;  %v995_v49 = vsel %vm2304_vm13, %v2278_v17, 0.0  ;;  %v1398_v15 = vsel %vm2171_vm7, %v2189_v48, 0.0  ;;  %v2022_v48 = vld [vmem:[%s2569_s1 + $0x100] sm:$0xff]  }
  0x22   : > { %1877 = vmatpush3.bf16.msra.mxu1 %v1998_v53  ;;  %1862 = vmatprep.subr.bf16.mxu0 %v1999_v10  ;;  %v727_v53 = vsel %vm2240_vm9, %v2203_v52, 0.0  ;;  %vm2609_vm9 = vmmov %vm2608_vm10  ;;  %v2011_v24 = vld [vmem:[%s2569_s1 + $0xd8] sm:$0xff]   ;;  %v1399_v37 = vsel %vm2151_vm5, %v2268_v11, 0.0  ;;  %v1400_v39 = vsel %vm2184_vm8, %v2278_v17, 0.0 }
  0x23   : > { %1878 = vmatprep.subr.bf16.mxu1 %v2000_v16  ;;  %vm2610_vm4 = vmmov %vm2609_vm9  ;;  %v1406_v36 = vpack.c.bf16 %v1400_v39, %v1399_v37 }
  0x24   : > { %1839 = vmatmul.mubr.msk.bf16.gmra.mxu0 %vm2572_vm0, %v2262_v8 }
  0x25   : > { %1863 = vmatpush3.bf16.msra.mxu0 %v1999_v10  ;;  %1855 = vmatmul.mubr.msk.bf16.gmra.mxu1 %vm2572_vm0, %v328_v29 }
  0x26   : > { %1864 = vmatprep.subr.bf16.mxu0 %v2001_v22  ;;  %1879 = vmatpush3.bf16.msra.mxu1 %v2000_v16  ;;  %v733_v16 = vpack.c.bf16 %v728_v58, %v727_v53  ;;  %v862_v53 = vpack.c.bf16 %v2210_v54, %v2123_v25  ;;  %v863_v58 = vpack.c.bf16 %v2231_v62, %v2213_v55  ;;  %v2429_v54 = vld [vmem:[%s2086_s29 + $0x42] sm:$0xff]  ;;  %v1129_v62 = vsel %vm2096_vm1, %v2127_v27, 0.0  ;;  %vm2617_vm1 = vmmov %vm2610_vm4 }
  0x27   : > { %1882 = vmatprep.mubr.msk.bf16.mxu1 %vm2572_vm0, %v731_v23  ;;  %1880 = vmatprep.subr.bf16.mxu1 %v2002_v30  ;;  %v729_v23 = vsel %vm2270_vm11, %v2250_v6, 0.0  ;;  %v2437_v55 = vld [vmem:[%s2086_s29 + $0x41] sm:$0xff]  ;;  %vm2631_vm5 = vmmov %vm2617_vm1 }
  0x28   : > { %1866 = vmatprep.mubr.msk.bf16.mxu0 %vm2572_vm0, %v593_v44  ;;  %vm2348_vm0 = vcmp.lt.s32.totalorder %v234_v9, 7  ;;  %v734_v43 = vpack.c.bf16 %v730_v26, %v729_v23  ;;  %v2009_v44 = vld [vmem:[%s2569_s1 + $0x80] sm:$0xff]   ;;  %v864_v19 = vpack.c.bf16 %v2437_v55, %v2234_v63  ;;  %v2016_v27 = vld [vmem:[%s2569_s1 + $0xe8] sm:$0xff]   ;;  %v2019_v26 = vld [vmem:[%s2569_s1 + $0x118] sm:$0xff]   ;;  %v1270_v42 = vpack.c.bf16 %v1266_v18, %v2437_v55 }
  0x29   : > { %1865 = vmatpush3.bf16.msra.mxu0 %v2001_v22  ;;  %v592_v9 = vsel %vm2348_vm0, %v2356_v12, 0.0  ;;  %v992_v22 = vsel %vm2171_vm7, %v2159_v38, 0.0  ;;  %v998_v14 = vsel %vm2348_vm0, %v2429_v54, 0.0  ;;  %v2018_v63 = vld [vmem:[%s2569_s1 + $0xe0] sm:$0xff]   ;;  %vm2628_vm7 = vmmov %vm2617_vm1 }
  0x2a   : > { %1890 = vmatprep.subr.bf16.mxu0 %v2003_v45  ;;  %1881 = vmatpush3.bf16.msra.mxu1 %v2002_v30  ;;  %v596_v29 = vpack.c.bf16 %v592_v9, %v591_v4  ;;  %v2008_v30 = vld [vmem:[%s2569_s1 + $0xa8] sm:$0xff]   ;;  %v997_v4 = vsel %vm2344_vm15, %v2356_v12, 0.0  ;;  %vm2632_vm8 = vmmov %vm2617_vm1 }
  0x2b   : > { %1906 = vmatprep.subr.bf16.mxu1 %v2004_v57  ;;  %v1002_v9 = vpack.c.bf16 %v998_v14, %v997_v4 }
  0x2c   : > { %1867 = vmatmul.mubr.msk.bf16.vlgmr.msra.gmra.mxu0 %vm2608_vm10, %v594_v56  ;;  %vm2612_vm10 = vmmov %vm2610_vm4  ;;  %v2012_v56 = vld [vmem:[%s2569_s1 + $0xf8] sm:$0xff]  }
  0x2d   : > { %1891 = vmatpush3.bf16.msra.mxu0 %v2003_v45  ;;  %1870 = vmatprep.mubr.msk.bf16.mxu0 %vm2609_vm9, %v595_v0  ;;  %vm2611_vm9 = vmmov %vm2610_vm4  ;;  %v999_v45 = vpack.c.bf16 %v992_v22, %v991_v31  ;;  %v1000_v0 = vpack.c.bf16 %v994_v34, %v993_v13  ;;  %v1131_v22 = vsel %vm2140_vm3, %v2200_v51, 0.0  ;;  %vm2622_vm3 = vnez %v2595_v3  ;;  %v2021_v3 = vld [vmem:[%s2569_s1 + $0x108] sm:$0xff]  }
  0x2e   : > { %1883 = vmatmul.mubr.msk.bf16.vlgmr.msra.gmra.mxu1 %vm2610_vm4, %v732_v5  ;;  %1892 = vmatprep.subr.bf16.mxu0 %v2005_v7  ;;  %v2013_v5 = vld [vmem:[%s2569_s1 + $0xd0] sm:$0xff]  }
  0x2f   : > { %1907 = vmatpush3.bf16.msra.mxu1 %v2004_v57  ;;  %1886 = vmatprep.mubr.msk.bf16.mxu1 %vm2611_vm9, %v733_v16  ;;  %vm2613_vm9 = vmmov %vm2610_vm4  ;;  %v996_v57 = vsel %vm2308_vm14, %v2353_v59, 0.0  ;;  %v2015_v16 = vld [vmem:[%s2569_s1 + $0xc8] sm:$0xff]  }
  0x30   : > { %1908 = vmatprep.subr.bf16.mxu1 %v2006_v60  ;;  %v1001_v25 = vpack.c.bf16 %v996_v57, %v995_v49 }
  0x31   : > { %1893 = vmatpush3.bf16.msra.mxu0 %v2005_v7  ;;  %v2014_v7 = vld [vmem:[%s2569_s1 + $0xf0] sm:$0xff]  }
  0x32   : > { %1894 = vmatprep.subr.bf16.mxu0 %v2007_v21 }
  0x33   : > { %1909 = vmatpush3.bf16.msra.mxu1 %v2006_v60  ;;  %v1130_v60 = vsel %vm2106_vm2, %v2130_v28, 0.0  ;;  %vm2618_vm2 = vnez %v2583_v35  ;;  %v1134_v35 = vsel %vm2622_vm3, %v2250_v6, 0.0  ;;  %v1397_v6 = vsel %vm2167_vm6, %v2159_v38, 0.0  ;;  %vm2627_vm6 = vmmov %vm2617_vm1 }
  0x34   : > { %1871 = vmatmul.mubr.msk.bf16.gmra.mxu0 %vm2610_vm4, %v596_v29  ;;  %1910 = vmatprep.subr.bf16.mxu1 %v2008_v30  ;;  %v1137_v28 = vpack.c.bf16 %v1130_v60, %v1129_v62  ;;  %v1132_v23 = vsel %vm2618_vm2, %v2203_v52, 0.0  ;;  %v2020_v29 = vld [vmem:[%s2569_s1 + $0x110] sm:$0xff]   ;;  %vm2623_vm2 = vmmov %vm2617_vm1  ;;  %v1402_v38 = vsel %vm2308_vm14, %v2356_v12, 0.0  ;;  %v1405_v41 = vpack.c.bf16 %v1398_v15, %v1397_v6 }
  0x35   : > { %1895 = vmatpush3.bf16.msra.mxu0 %v2007_v21  ;;  %1898 = vmatprep.mubr.msk.bf16.mxu0 %vm2612_vm10, %v861_v40  ;;  %vm2614_vm10 = vmmov %vm2610_vm4  ;;  %v2017_v21 = vld [vmem:[%s2569_s1 + $0xc0] sm:$0xff]   ;;  %v1138_v51 = vpack.c.bf16 %v1132_v23, %v1131_v22 }
  0x36   : > { %1887 = vmatmul.mubr.msk.bf16.gmra.mxu1 %vm2613_vm9, %v734_v43  ;;  %1896 = vmatprep.subr.bf16.mxu0 %v2009_v44  ;;  %vm2615_vm9 = vmmov %vm2610_vm4 }
  0x37   : > { %1911 = vmatpush3.bf16.msra.mxu1 %v2008_v30  ;;  %1914 = vmatprep.mubr.msk.bf16.mxu1 %vm2610_vm4, %v999_v45  ;;  %v1396_v30 = vld [vmem:[%s2086_s29 + $0x4a] sm:$0xff] }
  0x38   : > { %1912 = vmatprep.subr.bf16.mxu1 %v2010_v47  ;;  %v1404_v12 = vsel %vm2348_vm0, %v1396_v30, 0.0  ;;  %vm1542_vm0 = vcmask 621568  }
  0x39   : > { %1897 = vmatpush3.bf16.msra.mxu0 %v2009_v44 }
  0x3a   : > { %1922 = vmatprep.subr.bf16.mxu0 %v2011_v24 }
  0x3b   : > { %1913 = vmatpush3.bf16.msra.mxu1 %v2010_v47 }
  0x3c   : > { %1899 = vmatmul.mubr.msk.bf16.vlgmr.msra.gmra.mxu0 %vm2614_vm10, %v862_v53  ;;  %1938 = vmatprep.subr.bf16.mxu1 %v2012_v56  ;;  %vm2616_vm10 = vmmov %vm2610_vm4 }
  0x3d   : > { %1923 = vmatpush3.bf16.msra.mxu0 %v2011_v24  ;;  %1902 = vmatprep.mubr.msk.bf16.mxu0 %vm2615_vm9, %v863_v58  ;;  %vm2619_vm9 = vmmov %vm2617_vm1 }
  0x3e   : > { %1915 = vmatmul.mubr.msk.bf16.vlgmr.msra.gmra.mxu1 %vm2610_vm4, %v1000_v0  ;;  %1924 = vmatprep.subr.bf16.mxu0 %v2013_v5  ;;  %vm2620_vm4 = vmmov %vm2617_vm1 }
  0x3f   : > { %1939 = vmatpush3.bf16.msra.mxu1 %v2012_v56  ;;  %1918 = vmatprep.mubr.msk.bf16.mxu1 %vm2616_vm10, %v1001_v25  ;;  %vm2621_vm10 = vnez %v2593_v2  ;;  %v1128_v2 = vld [vmem:[%s2086_s29 + $0x48] sm:$0xff]  ;;  %s1753_s29 = sshll.u32 %s2634_s13, 6 }
  0x40   : > { %1940 = vmatprep.subr.bf16.mxu1 %v2014_v7  ;;  %v1133_v33 = vsel %vm2621_vm10, %v2238_v1, 0.0  ;;  %v1136_v1 = vsel %vm2280_vm12, %v1128_v2, 0.0  ;;  %vm2629_vm12 = vmmov %vm2617_vm1  ;;  %s2547_s21 = scalar_lea.vmem %s2571_s3, %s1753_s29 }
  0x41   : > { %1925 = vmatpush3.bf16.msra.mxu0 %v2013_v5  ;;  %v1139_v52 = vpack.c.bf16 %v1134_v35, %v1133_v33 }
  0x42   : > { %1926 = vmatprep.subr.bf16.mxu0 %v2015_v16 }
  0x43   : > { %1941 = vmatpush3.bf16.msra.mxu1 %v2014_v7 }
  0x44   : > { %1903 = vmatmul.mubr.msk.bf16.gmra.mxu0 %vm2617_vm1, %v864_v19  ;;  %1942 = vmatprep.subr.bf16.mxu1 %v2016_v27 }
  0x45   : > { %1927 = vmatpush3.bf16.msra.mxu0 %v2015_v16  ;;  %1930 = vmatprep.mubr.msk.bf16.mxu0 %vm2619_vm9, %v1137_v28  ;;  %vm2624_vm9 = vmmov %vm2617_vm1 }
  0x46   : > { %1919 = vmatmul.mubr.msk.bf16.gmra.mxu1 %vm2620_vm4, %v1002_v9  ;;  %1928 = vmatprep.subr.bf16.mxu0 %v2017_v21  ;;  %vm2625_vm4 = vmmov %vm2617_vm1 }
  0x47   : > { %1943 = vmatpush3.bf16.msra.mxu1 %v2016_v27  ;;  %1946 = vmatprep.mubr.msk.bf16.mxu1 %vm2617_vm1, %v2138_v32  ;;  %v1135_v32 = vsel %vm2270_vm11, %v2362_v20, 0.0  ;;  %vm2626_vm11 = vmmov %vm2617_vm1  ;;  %v1401_v20 = vsel %vm2304_vm13, %v2353_v59, 0.0  ;;  %v1403_v59 = vsel %vm2344_vm15, %v2429_v54, 0.0 }
  0x48   : > { %1944 = vmatprep.subr.bf16.mxu1 %v2018_v63  ;;  %vm2630_vm13 = vmmov %vm2617_vm1  ;;  %v1408_v46 = vpack.c.bf16 %v1404_v12, %v1403_v59 }
  0x49   : > { %1929 = vmatpush3.bf16.msra.mxu0 %v2017_v21 }
  0x4a   : > { %1954 = vmatprep.subr.bf16.mxu0 %v2019_v26 }
  0x4b   : > { %1945 = vmatpush3.bf16.msra.mxu1 %v2018_v63 }
  0x4c   : > { %1931 = vmatmul.mubr.msk.bf16.vlgmr.msra.gmra.mxu0 %vm2623_vm2, %v1138_v51  ;;  %1970 = vmatprep.subr.bf16.mxu1 %v2019_v26 }
  0x4d   : > { %1955 = vmatpush3.bf16.msra.mxu0 %v2019_v26  ;;  %1934 = vmatprep.mubr.msk.bf16.mxu0 %vm2624_vm9, %v1139_v52 }
  0x4e   : > { %1947 = vmatmul.mubr.msk.bf16.vlgmr.msra.gmra.mxu1 %vm2625_vm4, %v2228_v61  ;;  %1956 = vmatprep.subr.bf16.mxu0 %v2020_v29  ;;  %v1140_v61 = vpack.c.bf16 %v1136_v1, %v1135_v32 }
  0x4f   : > { %1974 = vmatpush3.bf16.msra.mxu1 %v2019_v26  ;;  %1950 = vmatprep.mubr.msk.bf16.mxu1 %vm2626_vm11, %v2262_v8  ;;  %v1407_v8 = vpack.c.bf16 %v1402_v38, %v1401_v20 }
  0x50   : > { %1971 = vmatprep.subr.bf16.mxu1 %v2020_v29 }
  0x51   : > { %1957 = vmatpush3.bf16.msra.mxu0 %v2020_v29 }
  0x52   : > { %1958 = vmatprep.subr.bf16.mxu0 %v2021_v3 }
  0x53   : > { %1975 = vmatpush3.bf16.msra.mxu1 %v2020_v29 }
  0x54   : > { %1935 = vmatmul.mubr.msk.bf16.gmra.mxu0 %vm2627_vm6, %v1140_v61  ;;  %1972 = vmatprep.subr.bf16.mxu1 %v2021_v3 }
  0x55   : > { %1959 = vmatpush3.bf16.msra.mxu0 %v2021_v3  ;;  %1962 = vmatprep.mubr.msk.bf16.mxu0 %vm2628_vm7, %v1405_v41 }
  0x56   : > { %1951 = vmatmul.mubr.msk.bf16.gmra.mxu1 %vm2629_vm12, %v1270_v42  ;;  %1960 = vmatprep.subr.bf16.mxu0 %v2022_v48 }
  0x57   : > { %1976 = vmatpush3.bf16.msra.mxu1 %v2021_v3  ;;  %1966 = vmatprep.mubr.msk.bf16.mxu1 %vm2630_vm13, %v1407_v8 }
  0x58   : > { %1973 = vmatprep.subr.bf16.mxu1 %v2022_v48 }
  0x59   : > { %1961 = vmatpush3.bf16.msra.mxu0 %v2022_v48 }
  0x5b   : > { %1977 = vmatpush3.bf16.msra.mxu1 %v2022_v48 }
  0x5c   : > { %1963 = vmatmul.mubr.msk.bf16.vlgmr.msra.gmra.mxu0 %vm2631_vm5, %v1406_v36 }
  0x5e   : > { %1967 = vmatmul.mubr.msk.bf16.vlgmr.msra.gmra.mxu1 %vm2632_vm8, %v1408_v46 }
  0xdc   : > { %v1836_v11 = vpop.f32.mrf.mxu0 }
  0xdd   : > { %v1852_v17 = vpop.f32.mrf.mxu1 }
  0xde   : > { %v429_v31 = vpop.f32.mrf.mxu0  ;;  %v539_v1 = vadd.f32 %v1852_v17, %v1836_v11 }
  0xdf   : > { %v530_v10 = vpop.f32.mrf.mxu1 }
  0xe0   : > { %v1837_v40 = vpop.f32.mrf.mxu0  ;;  %v531_v15 = vadd.f32 %v530_v10, %v429_v31 }
  0xe1   : > { %v1853_v43 = vpop.f32.mrf.mxu1 }
  0xe2   : > { %v432_v50 = vpop.f32.mrf.mxu0  ;;  %v542_v20 = vadd.f32 %v1853_v43, %v1837_v40 }
  0xe3   : > { %v533_v44 = vpop.f32.mrf.mxu1 }
  0xe4   : > { %v1840_v45 = vpop.f32.mrf.mxu0  ;;  %v534_v30 = vadd.f32 %v533_v44, %v432_v50 }
  0xe5   : > { %v1856_v47 = vpop.f32.mrf.mxu1 }
  0xe6   : > { %v445_v13 = vpop.f32.mrf.mxu0  ;;  %v555_v18 = vadd.f32 %v1856_v47, %v1840_v45 }
  0xe7   : > { %v546_v24 = vpop.f32.mrf.mxu1 }
  0xe8   : > { %v1841_v34 = vpop.f32.mrf.mxu0  ;;  %v547_v42 = vadd.f32 %v546_v24, %v445_v13 }
  0xe9   : > { %v1857_v49 = vpop.f32.mrf.mxu1 }
  0xea   : > { %v448_v53 = vpop.f32.mrf.mxu0  ;;  %v558_v37 = vadd.f32 %v1857_v49, %v1841_v34 }
  0xeb   : > { %v549_v56 = vpop.f32.mrf.mxu1 }
  0xec   : > { %v1868_v57 = vpop.f32.mrf.mxu0  ;;  %v550_v11 = vadd.f32 %v549_v56, %v448_v53 }
  0xed   : > { %v709_v61 = vadd.f32 %v1868_v57, %v539_v1 }
  0xee   : > { %v1884_v58 = vpop.f32.mrf.mxu1  ;;  %v676_v0 = vpop.f32.mrf.mxu0 }
  0xef   : > { %v707_v48 = vadd.f32 %v676_v0, %v531_v15  ;;  %v847_v36 = vadd.f32 %v1884_v58, %v709_v61 }
  0xf0   : > { %v814_v5 = vpop.f32.mrf.mxu1  ;;  %v1869_v25 = vpop.f32.mrf.mxu0 }
  0xf1   : > { %v710_v39 = vadd.f32 %v1869_v25, %v542_v20  ;;  %v845_v47 = vadd.f32 %v814_v5, %v707_v48 }
  0xf2   : > { %v1885_v54 = vpop.f32.mrf.mxu1  ;;  %v679_v7 = vpop.f32.mrf.mxu0 }
  0xf3   : > { %v708_v17 = vadd.f32 %v679_v7, %v534_v30  ;;  %v848_v43 = vadd.f32 %v1885_v54, %v710_v39 }
  0xf4   : > { %v817_v55 = vpop.f32.mrf.mxu1  ;;  %v1872_v62 = vpop.f32.mrf.mxu0 }
  0xf5   : > { %v713_v8 = vadd.f32 %v1872_v62, %v555_v18  ;;  %v846_v34 = vadd.f32 %v817_v55, %v708_v17 }
  0xf6   : > { %v1888_v60 = vpop.f32.mrf.mxu1  ;;  %v692_v16 = vpop.f32.mrf.mxu0 }
  0xf7   : > { %v711_v46 = vadd.f32 %v692_v16, %v547_v42  ;;  %v851_v57 = vadd.f32 %v1888_v60, %v713_v8 }
  0xf8   : > { %v830_v4 = vpop.f32.mrf.mxu1  ;;  %v1873_v14 = vpop.f32.mrf.mxu0 }
  0xf9   : > { %v714_v10 = vadd.f32 %v1873_v14, %v558_v37  ;;  %v849_v0 = vadd.f32 %v830_v4, %v711_v46 }
  0xfa   : > { %v1889_v19 = vpop.f32.mrf.mxu1  ;;  %v695_v27 = vpop.f32.mrf.mxu0 }
  0xfb   : > { %v712_v1 = vadd.f32 %v695_v27, %v550_v11  ;;  %v852_v49 = vadd.f32 %v1889_v19, %v714_v10 }
  0xfc   : > { %v833_v28 = vpop.f32.mrf.mxu1  ;;  %v1900_v9 = vpop.f32.mrf.mxu0 }
  0xfd   : > { %v977_v40 = vadd.f32 %v1900_v9, %v847_v36  ;;  %v850_v7 = vadd.f32 %v833_v28, %v712_v1 }
  0xfe   : > { %v1916_v21 = vpop.f32.mrf.mxu1  ;;  %v944_v63 = vpop.f32.mrf.mxu0 }
  0xff   : > { %v975_v50 = vadd.f32 %v944_v63, %v845_v47  ;;  %v1115_v53 = vadd.f32 %v1916_v21, %v977_v40 }
 0x100   : > { %v1082_v22 = vpop.f32.mrf.mxu1  ;;  %v1901_v23 = vpop.f32.mrf.mxu0 }
 0x101   : > { %v978_v25 = vadd.f32 %v1901_v23, %v848_v43  ;;  %v1113_v9 = vadd.f32 %v1082_v22, %v975_v50 }
 0x102   : > { %v1917_v26 = vpop.f32.mrf.mxu1  ;;  %v947_v33 = vpop.f32.mrf.mxu0 }
 0x103   : > { %v976_v16 = vadd.f32 %v947_v33, %v846_v34  ;;  %v1116_v15 = vadd.f32 %v1917_v26, %v978_v25  ;;  %v1750_v26 = vld [vmem:[%s2570_s2] ss:$0 sm:$0xff] }
 0x104   : > { %v1085_v35 = vpop.f32.mrf.mxu1  ;;  %v1904_v51 = vpop.f32.mrf.mxu0 }
 0x105   : > { %v981_v44 = vadd.f32 %v1904_v51, %v851_v57  ;;  %v1114_v18 = vadd.f32 %v1085_v35, %v976_v16 }
 0x106   : > { %v1920_v52 = vpop.f32.mrf.mxu1  ;;  %v960_v29 = vpop.f32.mrf.mxu0 }
 0x107   : > { %v979_v56 = vadd.f32 %v960_v29, %v849_v0  ;;  %v1119_v54 = vadd.f32 %v1920_v52, %v981_v44 }
 0x108   : > { %v1098_v2 = vpop.f32.mrf.mxu1  ;;  %v1905_v32 = vpop.f32.mrf.mxu0 }
 0x109   : > { %v982_v14 = vadd.f32 %v1905_v32, %v852_v49  ;;  %v1117_v55 = vadd.f32 %v1098_v2, %v979_v56 }
 0x10a   : > { %v1921_v3 = vpop.f32.mrf.mxu1  ;;  %v963_v6 = vpop.f32.mrf.mxu0 }
 0x10b   : > { %v980_v4 = vadd.f32 %v963_v6, %v850_v7  ;;  %v1120_v61 = vadd.f32 %v1921_v3, %v982_v14 }
 0x10c   : > { %v1101_v38 = vpop.f32.mrf.mxu1  ;;  %v1932_v41 = vpop.f32.mrf.mxu0 }
 0x10d   : > { %v1253_v27 = vadd.f32 %v1932_v41, %v1115_v53  ;;  %v1118_v20 = vadd.f32 %v1101_v38, %v980_v4 }
 0x10e   : > { %v1948_v59 = vpop.f32.mrf.mxu1  ;;  %v1220_v12 = vpop.f32.mrf.mxu0 }
 0x10f   : > { %v1251_v19 = vadd.f32 %v1220_v12, %v1113_v9  ;;  %v1383_v33 = vadd.f32 %v1948_v59, %v1253_v27 }
 0x110   : > { %v1350_v31 = vpop.f32.mrf.mxu1  ;;  %v1933_v45 = vpop.f32.mrf.mxu0 }
 0x111   : > { %v1254_v21 = vadd.f32 %v1933_v45, %v1116_v15  ;;  %v1381_v2 = vadd.f32 %v1350_v31, %v1251_v19 }
 0x112   : > { %v1949_v13 = vpop.f32.mrf.mxu1  ;;  %v1223_v24 = vpop.f32.mrf.mxu0 }
 0x113   : > { %v1252_v22 = vadd.f32 %v1223_v24, %v1114_v18  ;;  %v1384_v35 = vadd.f32 %v1949_v13, %v1254_v21 }
 0x114   : > { %v1353_v58 = vpop.f32.mrf.mxu1  ;;  %v1936_v62 = vpop.f32.mrf.mxu0 }
 0x115   : > { %v1257_v23 = vadd.f32 %v1936_v62, %v1119_v54  ;;  %v1382_v12 = vadd.f32 %v1353_v58, %v1252_v22 }
 0x116   : > { %v1952_v5 = vpop.f32.mrf.mxu1  ;;  %v1236_v60 = vpop.f32.mrf.mxu0 }
 0x117   : > { %v1255_v32 = vadd.f32 %v1236_v60, %v1117_v55  ;;  %v1387_v6 = vadd.f32 %v1952_v5, %v1257_v23 }
 0x118   : > { %v1366_v63 = vpop.f32.mrf.mxu1  ;;  %v1937_v51 = vpop.f32.mrf.mxu0 }
 0x119   : > { %v1258_v52 = vadd.f32 %v1937_v51, %v1120_v61  ;;  %v1385_v30 = vadd.f32 %v1366_v63, %v1255_v32 }
 0x11a   : > { %v1953_v29 = vpop.f32.mrf.mxu1  ;;  %v1239_v28 = vpop.f32.mrf.mxu0 }
 0x11b   : > { %v1256_v3 = vadd.f32 %v1239_v28, %v1118_v20  ;;  %v1388_v36 = vadd.f32 %v1953_v29, %v1258_v52 }
 0x11c   : > { %v1369_v42 = vpop.f32.mrf.mxu1  ;;  %v1964_v41 = vpop.f32.mrf.mxu0 }
 0x11d   : > { %v1521_v48 = vadd.f32 %v1964_v41, %v1383_v33  ;;  %v1386_v47 = vadd.f32 %v1369_v42, %v1256_v3 }
 0x11e   : > { %v1968_v38 = vpop.f32.mrf.mxu1  ;;  %v1488_v8 = vpop.f32.mrf.mxu0 }
 0x11f   : > { %v1536_v37 = vadd.f32 %v1750_v26, %v1521_v48  ;;  %v1525_v39 = vadd.f32 %v1968_v38, %v1387_v6  ;;  %v1519_v59 = vadd.f32 %v1488_v8, %v1381_v2 }
 0x120   : > { %v1504_v46 = vpop.f32.mrf.mxu1  ;;  %v1965_v11 = vpop.f32.mrf.mxu0 }
 0x121   : > { %1545 = vst.msk [vmem:[%s2547_s21 + $0x10] sm:$0xff] %vm1542_vm0, %v1536_v37  ;;  %v1540_v17 = vadd.f32 %v1750_v26, %v1525_v39  ;;  %v1534_v10 = vadd.f32 %v1750_v26, %v1519_v59  ;;  %v1523_v31 = vadd.f32 %v1504_v46, %v1385_v30  ;;  %v1522_v45 = vadd.f32 %v1965_v11, %v1384_v35 }
 0x122   : > { %v1969_v57 = vpop.f32.mrf.mxu1  ;;  %v1491_v40 = vpop.f32.mrf.mxu0 }
 0x123   : > { %1549 = vst.msk [vmem:[%s2547_s21 + $0x30] sm:$0xff] %vm1542_vm0, %v1540_v17  ;;  %1543 = vst.msk [vmem:[%s2547_s21] sm:$0xff] %vm1542_vm0, %v1534_v10  ;;  %v1538_v43 = vadd.f32 %v1750_v26, %v1523_v31  ;;  %v1537_v1 = vadd.f32 %v1750_v26, %v1522_v45  ;;  %v1526_v13 = vadd.f32 %v1969_v57, %v1388_v36 }
 0x124   : > { %v1520_v24 = vadd.f32 %v1491_v40, %v1382_v12  ;;  %v1507_v0 = vpop.f32.mrf.mxu1 }
 0x125   : > { %1547 = vst.msk [vmem:[%s2547_s21 + $0x20] sm:$0xff] %vm1542_vm0, %v1538_v43  ;;  %1546 = vst.msk [vmem:[%s2547_s21 + $0x18] sm:$0xff] %vm1542_vm0, %v1537_v1  ;;  %v1541_v50 = vadd.f32 %v1750_v26, %v1526_v13  ;;  %v1524_v34 = vadd.f32 %v1507_v0, %v1386_v47 }
 0x126   : > { %v1535_v44 = vadd.f32 %v1750_v26, %v1520_v24 }
 0x127   : > { %1550 = vst.msk [vmem:[%s2547_s21 + $0x38] sm:$0xff] %vm1542_vm0, %v1541_v50  ;;  %v1539_v49 = vadd.f32 %v1750_v26, %v1524_v34 }
 0x128   : > { %1544 = vst.msk [vmem:[%s2547_s21 + $0x8] sm:$0xff] %vm1542_vm0, %v1535_v44 }
 0x129   : > { %1548 = vst.msk [vmem:[%s2547_s21 + $0x28] sm:$0xff] %vm1542_vm0, %v1539_v49 }
 0x12a PF: > { %s13_s12 = sadd.s32 1, %s2029_s12  }
 0x12b   : > { %p10_p4 = scmp.ge.s32.totalorder %s13_s12, 6  }
 0x12d   :  { %12 = sbr.rel (!%p10_p4) target bundleno = 1 (0x1), region = 70 }

</bundles_post_ra>
